<compile_context>
chip_gen: v5e
topology: v5e:2x2
jax: 0.10.0
libtpu: 0.0.40
codegen_flags: <defaults>
</compile_context>

<pallas_src>
import math

import jax
import jax.numpy as jnp
from jax.experimental import pallas as pl
from jax.experimental.pallas import tpu as pltpu

K_DIM = 1024  # parameter is (1024, 1024), so x's last dim must be 1024
N_DIM = 1024


def matmul_kernel(x_ref, p_ref, o_ref):
    # Full-K, full-N blocks -> one MXU matmul per row tile, f32 accumulation on the
    # MXU, result written straight into the (already f32) output tile.
    o_ref[...] = jnp.dot(
        x_ref[...], p_ref[...], preferred_element_type=jnp.float32
    ).astype(o_ref.dtype)


def matmul_param_forward(x, p):
    M, K = x.shape
    Kp, N = p.shape
    assert K == Kp

    # Keep the whole batch resident when M is small (grid collapses to (1,));
    # otherwise tile rows at 512 so x/out tiles stay at 2 MiB each while the MXU
    # rows are filled. Partial last row-block is handled by Pallas masking.
    tm = M if M <= 512 else 512
    grid = (pl.cdiv(M, tm),)

    flops = 2 * M * K * N
    bytes_accessed = 4 * (M * K + K * N + M * N)

    return pl.pallas_call(
        matmul_kernel,
        out_shape=jax.ShapeDtypeStruct((M, N), x.dtype),
        grid_spec=pltpu.PrefetchScalarGridSpec(
            num_scalar_prefetch=0,
            grid=grid,
            in_specs=[
                # x row-block: the only operand whose block index changes per step.
                pl.BlockSpec((tm, K), lambda i: (i, 0)),
                # p fully VMEM-resident (4 MiB f32): constant block index, so the
                # pipeline DMAs it from HBM exactly once for the whole call.
                pl.BlockSpec((K, N), lambda i: (0, 0)),
            ],
            out_specs=pl.BlockSpec((tm, N), lambda i: (i, 0)),
        ),
        compiler_params=pltpu.CompilerParams(
            # Row tiles are independent -> v7x may shard the M axis across its two
            # TensorCores; on v5e/v6e this is just a short sequential loop.
            dimension_semantics=("parallel",),
            # Worst case ~16 MiB at tm=512: raise above v5e's 16 MiB scoped default,
            # stay at/below v7x's 32 MiB scoped default.
            vmem_limit_bytes=32 * 1024 * 1024,
        ),
        cost_estimate=pl.CostEstimate(
            flops=flops, transcendentals=0, bytes_accessed=bytes_accessed
        ),
    )(x, p)
    # TODO(synk): if this forward is on a hot path, hide the weight DMA across calls
    # (cross-call prefetch, P10) and/or stream p as bf16 to halve its HBM bytes.


def init_param(key):
    # nn.init.xavier_uniform_ for a (1024, 1024) weight:
    # bound = sqrt(6 / (fan_in + fan_out))
    bound = math.sqrt(6.0 / (K_DIM + N_DIM))
    return jax.random.uniform(
        key, (K_DIM, N_DIM), dtype=jnp.float32, minval=-bound, maxval=bound
    )


if __name__ == "__main__":
    key = jax.random.PRNGKey(0)
    k_x, k_p = jax.random.split(key)

    # Small batch of rows; last dim must match the parameter's first dim (1024).
    M = 8
    x = jax.random.normal(k_x, (M, K_DIM), dtype=jnp.float32)
    p = init_param(k_p)

    out = matmul_param_forward(x, p)
    out = jax.block_until_ready(out)

    # Sanity check against plain JAX reference. MXU f32 matmul at default precision
    # can carry ~1e-3-level error at K=1024, so use a tolerance that covers it.
    ref = x @ p
    assert out.shape == (M, N_DIM)
    assert jnp.allclose(out, ref, atol=2e-2, rtol=2e-2), float(
        jnp.max(jnp.abs(out - ref))
    )

    print("KERNEL_OK")
</pallas_src>

<mosaic_0001>
module attributes {stable_mosaic.version = 11 : i64} {
  func.func @matmul_kernel(%arg0: i32, %arg1: memref<8x1024xf32, #tpu.memory_space<vmem>>, %arg2: memref<1024x1024xf32, #tpu.memory_space<vmem>>, %arg3: memref<8x1024xf32, #tpu.memory_space<vmem>>) attributes {dimension_semantics = [#tpu.dimension_semantics<parallel>], iteration_bounds = array<i64: 1>, scalar_prefetch = 0 : i64, scratch_operands = 0 : i64, tpu.core_type = #tpu.core_type<tc>, window_params = [{transform_indices = @transform_0, window_bounds = array<i64: 8, 1024>}, {pipeline_mode = #tpu.pipeline_mode<synchronous>, transform_indices = @transform_1, window_bounds = array<i64: 1024, 1024>}, {transform_indices = @transform_2, window_bounds = array<i64: 8, 1024>}]} {
    %c0 = arith.constant 0 : index
    %c0_0 = arith.constant 0 : index
    %0 = vector.load %arg1[%c0, %c0_0] : memref<8x1024xf32, #tpu.memory_space<vmem>>, vector<8x1024xf32>
    %c0_1 = arith.constant 0 : index
    %c0_2 = arith.constant 0 : index
    %1 = vector.load %arg2[%c0_1, %c0_2] : memref<1024x1024xf32, #tpu.memory_space<vmem>>, vector<1024x1024xf32>
    %cst = arith.constant dense<0.000000e+00> : vector<8x1024xf32>
    %2 = tpu.matmul %0, %1, %cst {dimension_numbers = #tpu.dot_dimension_numbers<[1], [0], [0], [1], [0, 0, 1, 1], [], []>} : vector<8x1024xf32>, vector<1024x1024xf32>, vector<8x1024xf32> -> vector<8x1024xf32>
    %c0_3 = arith.constant 0 : index
    %c0_4 = arith.constant 0 : index
    %3 = vector.load %arg3[%c0_3, %c0_4] : memref<8x1024xf32, #tpu.memory_space<vmem>>, vector<8x1024xf32>
    tpu.vector_store %arg3[%c0_3, %c0_4], %2 {strides = array<i32>} : memref<8x1024xf32, #tpu.memory_space<vmem>>, vector<8x1024xf32>,
    return
  }
  func.func @transform_0(%arg0: i32) -> (i32, i32) {
    %c0_i32 = arith.constant 0 : i32
    %c0_i32_0 = arith.constant 0 : i32
    return %arg0, %c0_i32 : i32, i32
  }
  func.func @transform_1(%arg0: i32) -> (i32, i32) {
    %c0_i32 = arith.constant 0 : i32
    %c0_i32_0 = arith.constant 0 : i32
    %c0_i32_1 = arith.constant 0 : i32
    return %c0_i32, %c0_i32_0 : i32, i32
  }
  func.func @transform_2(%arg0: i32) -> (i32, i32) {
    %c0_i32 = arith.constant 0 : i32
    %c0_i32_0 = arith.constant 0 : i32
    return %arg0, %c0_i32 : i32, i32
  }
}

</mosaic_0001>

<bundles_post_ra>
// kernel: tpu_custom_call.1
= control target key start
LH: loop header
LB: loop body
LE: loop exit
PB: predicated region body
PF: predicated region fallthrough
CT: control target
= control target key end

     0   :  { %7 = vsyncpa [#allocation3], 0  ;;  %s2644_s0 = inlined_call_operand.hbm [shape: f32[8,1024], index: 0, kind: input, shape index: {}]   ;;  %s2645_s1 = inlined_call_operand.hbm [shape: f32[1024,1024], index: 1, kind: input, shape index: {}]   ;;  %s2646_s2 = inlined_call_operand.hbm [shape: f32[8,1024], index: 2, kind: output, shape index: {}]  }
   0x1   :  { %8 = vsyncpa [#allocation6], 0 }
   0x2   :  { %9 = vsyncpa [#allocation4], 0  ;;  %s15_s11 = sshll.u32 %s2644_s0, 4  ;;  %s2487_s12 = smov [#allocation2]   ;;  %s16_s11 = int_to_ptr.hbm [resolvable:$true] %s15_s11 }
   0x3   :  { %s17_s13 = sshll.u32 %s2487_s12, 4  ;;  %s25_s16 = sshll.u32 %s2645_s1, 4  ;;  %s18_s13 = int_to_ptr.vmem [resolvable:$true] %s17_s13  ;;  %s26_s16 = int_to_ptr.hbm [resolvable:$true] %s25_s16 }
   0x4   :  { %20 = dma.hbm_to_vmem [thread:$0]  %s16_s11, 1024, %s18_s13, [#allocation3]  }
   0x5   :  { %s2488_s17 = smov [#allocation5]   ;;  %s2489_s19 = smov 1024  }
   0x6   :  { %s27_s18 = sshll.u32 %s2488_s17, 4  ;;  %s2490_s20 = smov 64   ;;  %s28_s18 = int_to_ptr.vmem [resolvable:$true] %s27_s18 }
   0x7   :  { %33 = dma.hbm_to_vmem [thread:$0]  %s26_s16, 131072, %s28_s18, [#allocation6], %s2489_s19, %s2489_s19, %s2490_s20  }
   0x8   :  { %2481 = dma.done.wait [#allocation3], 1024  }
   0x9   :  { %2482 = vsyncadd [#allocation3], 4294966272 }
   0xa   :  { %2483 = dma.done.wait [#allocation6], 131072  }
   0xb   :  { %2484 = vsyncadd [#allocation6], 4294836224  ;;  %v170_v0 = vld [vmem:[#allocation5 + $0x3c0] sm:$0xff]  ;;  %s2491_s0 = smov [#allocation7]   ;;  %s2369_s23 = sshll.u32 %s2646_s2, 4  ;;  %s2370_s23 = int_to_ptr.hbm [resolvable:$true] %s2369_s23 }
   0xc   :  { %v426_v1 = vld [vmem:[#allocation5 + $0xbc0] sm:$0xff]  ;;  %1074 = vmatpush.msra.mxu0 %v170_v0  ;;  %s2367_s1 = sshll.u32 %s2491_s0, 4  ;;  %s2368_s1 = int_to_ptr.vmem [resolvable:$true] %s2367_s1 }
   0xd   :  { %v162_v2 = vld [vmem:[#allocation5 + $0x380] sm:$0xff]  ;;  %1114 = vmatpush.msra.mxu2 %v426_v1 }
   0xe   :  { %v298_v3 = vld [vmem:[#allocation5 + $0x7c0] sm:$0xff]  ;;  %1075 = vmatpush.msra.mxu0 %v162_v2 }
   0xf   :  { %v418_v4 = vld [vmem:[#allocation5 + $0xb80] sm:$0xff]  ;;  %1094 = vmatpush.msra.mxu1 %v298_v3 }
  0x10   :  { %v554_v5 = vld [vmem:[#allocation5 + $0xfc0] sm:$0xff]  ;;  %1115 = vmatpush.msra.mxu2 %v418_v4 }
  0x11   :  { %1134 = vmatpush.msra.mxu3 %v554_v5  ;;  %v154_v6 = vld [vmem:[#allocation5 + $0x340] sm:$0xff] }
  0x12   :  { %v290_v7 = vld [vmem:[#allocation5 + $0x780] sm:$0xff]  ;;  %1076 = vmatpush.msra.mxu0 %v154_v6 }
  0x13   :  { %v410_v8 = vld [vmem:[#allocation5 + $0xb40] sm:$0xff]  ;;  %1095 = vmatpush.msra.mxu1 %v290_v7 }
  0x14   :  { %v546_v9 = vld [vmem:[#allocation5 + $0xf80] sm:$0xff]  ;;  %1116 = vmatpush.msra.mxu2 %v410_v8 }
  0x15   :  { %v282_v10 = vld [vmem:[#allocation5 + $0x740] sm:$0xff]  ;;  %1135 = vmatpush.msra.mxu3 %v546_v9 }
  0x16   :  { %v146_v11 = vld [vmem:[#allocation5 + $0x300] sm:$0xff]  ;;  %1096 = vmatpush.msra.mxu1 %v282_v10 }
  0x17   :  { %v402_v12 = vld [vmem:[#allocation5 + $0xb00] sm:$0xff]  ;;  %1077 = vmatpush.msra.mxu0 %v146_v11 }
  0x18   :  { %v538_v13 = vld [vmem:[#allocation5 + $0xf40] sm:$0xff]  ;;  %1117 = vmatpush.msra.mxu2 %v402_v12 }
  0x19   :  { %v274_v14 = vld [vmem:[#allocation5 + $0x700] sm:$0xff]  ;;  %1136 = vmatpush.msra.mxu3 %v538_v13 }
  0x1a   :  { %v530_v15 = vld [vmem:[#allocation5 + $0xf00] sm:$0xff]  ;;  %1097 = vmatpush.msra.mxu1 %v274_v14 }
  0x1b   :  { %v138_v16 = vld [vmem:[#allocation5 + $0x2c0] sm:$0xff]  ;;  %1137 = vmatpush.msra.mxu3 %v530_v15 }
  0x1c   :  { %v394_v17 = vld [vmem:[#allocation5 + $0xac0] sm:$0xff]  ;;  %1078 = vmatpush.msra.mxu0 %v138_v16 }
  0x1d   :  { %v266_v18 = vld [vmem:[#allocation5 + $0x6c0] sm:$0xff]  ;;  %1118 = vmatpush.msra.mxu2 %v394_v17 }
  0x1e   :  { %v522_v19 = vld [vmem:[#allocation5 + $0xec0] sm:$0xff]  ;;  %1098 = vmatpush.msra.mxu1 %v266_v18 }
  0x1f   :  { %v130_v20 = vld [vmem:[#allocation5 + $0x280] sm:$0xff]  ;;  %1138 = vmatpush.msra.mxu3 %v522_v19 }
  0x20   :  { %v386_v21 = vld [vmem:[#allocation5 + $0xa80] sm:$0xff]  ;;  %1079 = vmatpush.msra.mxu0 %v130_v20 }
  0x21   :  { %v258_v22 = vld [vmem:[#allocation5 + $0x680] sm:$0xff]  ;;  %1119 = vmatpush.msra.mxu2 %v386_v21 }
  0x22   :  { %v514_v23 = vld [vmem:[#allocation5 + $0xe80] sm:$0xff]  ;;  %1099 = vmatpush.msra.mxu1 %v258_v22 }
  0x23   :  { %v122_v24 = vld [vmem:[#allocation5 + $0x240] sm:$0xff]  ;;  %1139 = vmatpush.msra.mxu3 %v514_v23 }
  0x24   :  { %v378_v25 = vld [vmem:[#allocation5 + $0xa40] sm:$0xff]  ;;  %1080 = vmatpush.msra.mxu0 %v122_v24 }
  0x25   :  { %v250_v26 = vld [vmem:[#allocation5 + $0x640] sm:$0xff]  ;;  %1120 = vmatpush.msra.mxu2 %v378_v25 }
  0x26   :  { %v506_v27 = vld [vmem:[#allocation5 + $0xe40] sm:$0xff]  ;;  %1100 = vmatpush.msra.mxu1 %v250_v26 }
  0x27   :  { %v114_v28 = vld [vmem:[#allocation5 + $0x200] sm:$0xff]  ;;  %1140 = vmatpush.msra.mxu3 %v506_v27 }
  0x28   :  { %v370_v29 = vld [vmem:[#allocation5 + $0xa00] sm:$0xff]  ;;  %1081 = vmatpush.msra.mxu0 %v114_v28 }
  0x29   :  { %v242_v30 = vld [vmem:[#allocation5 + $0x600] sm:$0xff]  ;;  %1121 = vmatpush.msra.mxu2 %v370_v29 }
  0x2a   :  { %v498_v31 = vld [vmem:[#allocation5 + $0xe00] sm:$0xff]  ;;  %1101 = vmatpush.msra.mxu1 %v242_v30 }
  0x2b   :  { %v106_v32 = vld [vmem:[#allocation5 + $0x1c0] sm:$0xff]  ;;  %1141 = vmatpush.msra.mxu3 %v498_v31 }
  0x2c   :  { %v362_v33 = vld [vmem:[#allocation5 + $0x9c0] sm:$0xff]  ;;  %1082 = vmatpush.msra.mxu0 %v106_v32 }
  0x2d   :  { %v234_v34 = vld [vmem:[#allocation5 + $0x5c0] sm:$0xff]  ;;  %1122 = vmatpush.msra.mxu2 %v362_v33 }
  0x2e   :  { %v490_v35 = vld [vmem:[#allocation5 + $0xdc0] sm:$0xff]  ;;  %1102 = vmatpush.msra.mxu1 %v234_v34 }
  0x2f   :  { %v98_v36 = vld [vmem:[#allocation5 + $0x180] sm:$0xff]  ;;  %1142 = vmatpush.msra.mxu3 %v490_v35 }
  0x30   :  { %v354_v37 = vld [vmem:[#allocation5 + $0x980] sm:$0xff]  ;;  %1083 = vmatpush.msra.mxu0 %v98_v36 }
  0x31   :  { %v226_v38 = vld [vmem:[#allocation5 + $0x580] sm:$0xff]  ;;  %1123 = vmatpush.msra.mxu2 %v354_v37 }
  0x32   :  { %v482_v39 = vld [vmem:[#allocation5 + $0xd80] sm:$0xff]  ;;  %1103 = vmatpush.msra.mxu1 %v226_v38 }
  0x33   :  { %v90_v40 = vld [vmem:[#allocation5 + $0x140] sm:$0xff]  ;;  %1143 = vmatpush.msra.mxu3 %v482_v39 }
  0x34   :  { %v346_v41 = vld [vmem:[#allocation5 + $0x940] sm:$0xff]  ;;  %1084 = vmatpush.msra.mxu0 %v90_v40 }
  0x35   :  { %v218_v42 = vld [vmem:[#allocation5 + $0x540] sm:$0xff]  ;;  %1124 = vmatpush.msra.mxu2 %v346_v41 }
  0x36   :  { %v474_v43 = vld [vmem:[#allocation5 + $0xd40] sm:$0xff]  ;;  %1104 = vmatpush.msra.mxu1 %v218_v42 }
  0x37   :  { %v82_v44 = vld [vmem:[#allocation5 + $0x100] sm:$0xff]  ;;  %1144 = vmatpush.msra.mxu3 %v474_v43 }
  0x38   :  { %v338_v45 = vld [vmem:[#allocation5 + $0x900] sm:$0xff]  ;;  %1085 = vmatpush.msra.mxu0 %v82_v44 }
  0x39   :  { %v210_v46 = vld [vmem:[#allocation5 + $0x500] sm:$0xff]  ;;  %1125 = vmatpush.msra.mxu2 %v338_v45 }
  0x3a   :  { %v466_v47 = vld [vmem:[#allocation5 + $0xd00] sm:$0xff]  ;;  %1105 = vmatpush.msra.mxu1 %v210_v46 }
  0x3b   :  { %v74_v48 = vld [vmem:[#allocation5 + $0xc0] sm:$0xff]  ;;  %1145 = vmatpush.msra.mxu3 %v466_v47 }
  0x3c   :  { %v330_v49 = vld [vmem:[#allocation5 + $0x8c0] sm:$0xff]  ;;  %1086 = vmatpush.msra.mxu0 %v74_v48 }
  0x3d   :  { %v202_v50 = vld [vmem:[#allocation5 + $0x4c0] sm:$0xff]  ;;  %1126 = vmatpush.msra.mxu2 %v330_v49 }
  0x3e   :  { %v458_v51 = vld [vmem:[#allocation5 + $0xcc0] sm:$0xff]  ;;  %1106 = vmatpush.msra.mxu1 %v202_v50 }
  0x3f   :  { %v66_v52 = vld [vmem:[#allocation5 + $0x80] sm:$0xff]  ;;  %1146 = vmatpush.msra.mxu3 %v458_v51 }
  0x40   :  { %v322_v53 = vld [vmem:[#allocation5 + $0x880] sm:$0xff]  ;;  %1087 = vmatpush.msra.mxu0 %v66_v52 }
  0x41   :  { %v194_v54 = vld [vmem:[#allocation5 + $0x480] sm:$0xff]  ;;  %1127 = vmatpush.msra.mxu2 %v322_v53 }
  0x42   :  { %v450_v55 = vld [vmem:[#allocation5 + $0xc80] sm:$0xff]  ;;  %1107 = vmatpush.msra.mxu1 %v194_v54 }
  0x43   :  { %v58_v56 = vld [vmem:[#allocation5 + $0x40] sm:$0xff]  ;;  %1147 = vmatpush.msra.mxu3 %v450_v55 }
  0x44   :  { %v314_v57 = vld [vmem:[#allocation5 + $0x840] sm:$0xff]  ;;  %1088 = vmatpush.msra.mxu0 %v58_v56 }
  0x45   :  { %v186_v58 = vld [vmem:[#allocation5 + $0x440] sm:$0xff]  ;;  %1128 = vmatpush.msra.mxu2 %v314_v57 }
  0x46   :  { %v442_v59 = vld [vmem:[#allocation5 + $0xc40] sm:$0xff]  ;;  %1108 = vmatpush.msra.mxu1 %v186_v58  ;;  %v2513_v58 = vld [vmem:[#allocation2 + $0x10] sm:$0xff] }
  0x47   :  { %v50_v60 = vld [vmem:[#allocation5] sm:$0xff]  ;;  %1148 = vmatpush.msra.mxu3 %v442_v59 }
  0x48   :  { %v306_v61 = vld [vmem:[#allocation5 + $0x800] sm:$0xff]  ;;  %1089 = vmatpush.msra.mxu0 %v50_v60 }
  0x49   :  { %v682_v62 = vld [vmem:[#allocation5 + $0x13c0] sm:$0xff]  ;;  %1129 = vmatpush.msra.mxu2 %v306_v61 }
  0x4a   :  { %v938_v63 = vld [vmem:[#allocation5 + $0x1bc0] sm:$0xff]  ;;  %1154 = vmatpush.msrb.mxu0 %v682_v62  ;;  %1130 = vmatmul.f32.vlgmr.msra.gmra.mxu2 %v2513_v58 }
  0x4b   :  { %v178_v0 = vld [vmem:[#allocation5 + $0x400] sm:$0xff]  ;;  %1194 = vmatpush.msrb.mxu2 %v938_v63 }
  0x4c   :  { %v434_v1 = vld [vmem:[#allocation5 + $0xc00] sm:$0xff]  ;;  %1109 = vmatpush.msra.mxu1 %v178_v0  ;;  %v2518_v0 = vld [vmem:[#allocation2 + $0x18] sm:$0xff] }
  0x4d   :  { %v674_v2 = vld [vmem:[#allocation5 + $0x1380] sm:$0xff]  ;;  %1149 = vmatpush.msra.mxu3 %v434_v1  ;;  %v171_v1 = vld [vmem:[#allocation5 + $0x3c8] sm:$0xff] }
  0x4e   :  { %v810_v3 = vld [vmem:[#allocation5 + $0x17c0] sm:$0xff]  ;;  %1155 = vmatpush.msrb.mxu0 %v674_v2  ;;  %v427_v2 = vld [vmem:[#allocation5 + $0xbc8] sm:$0xff]  ;;  %1150 = vmatmul.f32.vlgmr.msra.gmra.mxu3 %v2518_v0 }
  0x4f   :  { %v930_v4 = vld [vmem:[#allocation5 + $0x1b80] sm:$0xff]  ;;  %1174 = vmatpush.msrb.mxu1 %v810_v3 }
  0x50   :  { %v1066_v5 = vld [vmem:[#allocation5 + $0x1fc0] sm:$0xff]  ;;  %1195 = vmatpush.msrb.mxu2 %v930_v4 }
  0x51   :  { %v666_v6 = vld [vmem:[#allocation5 + $0x1340] sm:$0xff]  ;;  %1214 = vmatpush.msrb.mxu3 %v1066_v5  ;;  %v2521_v5 = vld [vmem:[#allocation2 + $0x8] sm:$0xff] }
  0x52   :  { %v802_v7 = vld [vmem:[#allocation5 + $0x1780] sm:$0xff]  ;;  %1156 = vmatpush.msrb.mxu0 %v666_v6  ;;  %v163_v6 = vld [vmem:[#allocation5 + $0x388] sm:$0xff]  ;;  %1110 = vmatmul.f32.vlgmr.msra.gmra.mxu1 %v2521_v5 }
  0x53   :  { %v922_v8 = vld [vmem:[#allocation5 + $0x1b40] sm:$0xff]  ;;  %1175 = vmatpush.msrb.mxu1 %v802_v7  ;;  %v299_v7 = vld [vmem:[#allocation5 + $0x7c8] sm:$0xff] }
  0x54   :  { %v1058_v9 = vld [vmem:[#allocation5 + $0x1f80] sm:$0xff]  ;;  %1196 = vmatpush.msrb.mxu2 %v922_v8  ;;  %v419_v8 = vld [vmem:[#allocation5 + $0xb88] sm:$0xff] }
  0x55   :  { %v658_v10 = vld [vmem:[#allocation5 + $0x1300] sm:$0xff]  ;;  %1215 = vmatpush.msrb.mxu3 %v1058_v9  ;;  %v555_v9 = vld [vmem:[#allocation5 + $0xfc8] sm:$0xff] }
  0x56   :  { %v794_v11 = vld [vmem:[#allocation5 + $0x1740] sm:$0xff]  ;;  %1157 = vmatpush.msrb.mxu0 %v658_v10  ;;  %v155_v10 = vld [vmem:[#allocation5 + $0x348] sm:$0xff] }
  0x57   :  { %v914_v12 = vld [vmem:[#allocation5 + $0x1b00] sm:$0xff]  ;;  %1176 = vmatpush.msrb.mxu1 %v794_v11  ;;  %v291_v11 = vld [vmem:[#allocation5 + $0x788] sm:$0xff] }
  0x58   :  { %v1050_v13 = vld [vmem:[#allocation5 + $0x1f40] sm:$0xff]  ;;  %1197 = vmatpush.msrb.mxu2 %v914_v12  ;;  %v411_v12 = vld [vmem:[#allocation5 + $0xb48] sm:$0xff] }
  0x59   :  { %v650_v14 = vld [vmem:[#allocation5 + $0x12c0] sm:$0xff]  ;;  %1216 = vmatpush.msrb.mxu3 %v1050_v13  ;;  %v547_v13 = vld [vmem:[#allocation5 + $0xf88] sm:$0xff] }
  0x5a   :  { %v786_v15 = vld [vmem:[#allocation5 + $0x1700] sm:$0xff]  ;;  %1158 = vmatpush.msrb.mxu0 %v650_v14  ;;  %v2525_v14 = vld [vmem:[#allocation2 + $0x30] sm:$0xff] }
  0x5b   :  { %v906_v16 = vld [vmem:[#allocation5 + $0x1ac0] sm:$0xff]  ;;  %1177 = vmatpush.msrb.mxu1 %v786_v15  ;;  %v147_v15 = vld [vmem:[#allocation5 + $0x308] sm:$0xff] }
  0x5c   :  { %v1042_v17 = vld [vmem:[#allocation5 + $0x1f00] sm:$0xff]  ;;  %1198 = vmatpush.msrb.mxu2 %v906_v16  ;;  %v283_v16 = vld [vmem:[#allocation5 + $0x748] sm:$0xff] }
  0x5d   :  { %v642_v18 = vld [vmem:[#allocation5 + $0x1280] sm:$0xff]  ;;  %1217 = vmatpush.msrb.mxu3 %v1042_v17  ;;  %v403_v17 = vld [vmem:[#allocation5 + $0xb08] sm:$0xff] }
  0x5e   :  { %v778_v19 = vld [vmem:[#allocation5 + $0x16c0] sm:$0xff]  ;;  %1159 = vmatpush.msrb.mxu0 %v642_v18  ;;  %v539_v18 = vld [vmem:[#allocation5 + $0xf48] sm:$0xff] }
  0x5f   :  { %v898_v20 = vld [vmem:[#allocation5 + $0x1a80] sm:$0xff]  ;;  %1178 = vmatpush.msrb.mxu1 %v778_v19 }
  0x60   :  { %v1034_v21 = vld [vmem:[#allocation5 + $0x1ec0] sm:$0xff]  ;;  %1199 = vmatpush.msrb.mxu2 %v898_v20  ;;  %v2530_v20 = vld [vmem:[#allocation2 + $0x38] sm:$0xff] }
  0x61   :  { %v634_v22 = vld [vmem:[#allocation5 + $0x1240] sm:$0xff]  ;;  %1218 = vmatpush.msrb.mxu3 %v1034_v21  ;;  %v139_v21 = vld [vmem:[#allocation5 + $0x2c8] sm:$0xff] }
  0x62   :  { %v770_v23 = vld [vmem:[#allocation5 + $0x1680] sm:$0xff]  ;;  %1160 = vmatpush.msrb.mxu0 %v634_v22  ;;  %v275_v22 = vld [vmem:[#allocation5 + $0x708] sm:$0xff] }
  0x63   :  { %v890_v24 = vld [vmem:[#allocation5 + $0x1a40] sm:$0xff]  ;;  %1179 = vmatpush.msrb.mxu1 %v770_v23  ;;  %v395_v23 = vld [vmem:[#allocation5 + $0xac8] sm:$0xff] }
  0x64   :  { %v1026_v25 = vld [vmem:[#allocation5 + $0x1e80] sm:$0xff]  ;;  %1200 = vmatpush.msrb.mxu2 %v890_v24  ;;  %v531_v24 = vld [vmem:[#allocation5 + $0xf08] sm:$0xff] }
  0x65   :  { %v626_v26 = vld [vmem:[#allocation5 + $0x1200] sm:$0xff]  ;;  %1219 = vmatpush.msrb.mxu3 %v1026_v25  ;;  %v2533_v25 = vld [vmem:[#allocation2 + $0x28] sm:$0xff] }
  0x66   :  { %v762_v27 = vld [vmem:[#allocation5 + $0x1640] sm:$0xff]  ;;  %1161 = vmatpush.msrb.mxu0 %v626_v26  ;;  %v131_v26 = vld [vmem:[#allocation5 + $0x288] sm:$0xff] }
  0x67   :  { %v882_v28 = vld [vmem:[#allocation5 + $0x1a00] sm:$0xff]  ;;  %1180 = vmatpush.msrb.mxu1 %v762_v27  ;;  %v267_v27 = vld [vmem:[#allocation5 + $0x6c8] sm:$0xff] }
  0x68   :  { %v1018_v29 = vld [vmem:[#allocation5 + $0x1e40] sm:$0xff]  ;;  %1201 = vmatpush.msrb.mxu2 %v882_v28  ;;  %v387_v28 = vld [vmem:[#allocation5 + $0xa88] sm:$0xff] }
  0x69   :  { %v618_v30 = vld [vmem:[#allocation5 + $0x11c0] sm:$0xff]  ;;  %1220 = vmatpush.msrb.mxu3 %v1018_v29  ;;  %v523_v29 = vld [vmem:[#allocation5 + $0xec8] sm:$0xff] }
  0x6a   :  { %v754_v31 = vld [vmem:[#allocation5 + $0x1600] sm:$0xff]  ;;  %1162 = vmatpush.msrb.mxu0 %v618_v30  ;;  %v123_v30 = vld [vmem:[#allocation5 + $0x248] sm:$0xff] }
  0x6b   :  { %v874_v32 = vld [vmem:[#allocation5 + $0x19c0] sm:$0xff]  ;;  %1181 = vmatpush.msrb.mxu1 %v754_v31  ;;  %v259_v31 = vld [vmem:[#allocation5 + $0x688] sm:$0xff] }
  0x6c   :  { %v1010_v33 = vld [vmem:[#allocation5 + $0x1e00] sm:$0xff]  ;;  %1202 = vmatpush.msrb.mxu2 %v874_v32  ;;  %v379_v32 = vld [vmem:[#allocation5 + $0xa48] sm:$0xff] }
  0x6d   :  { %v610_v34 = vld [vmem:[#allocation5 + $0x1180] sm:$0xff]  ;;  %1221 = vmatpush.msrb.mxu3 %v1010_v33  ;;  %v515_v33 = vld [vmem:[#allocation5 + $0xe88] sm:$0xff] }
  0x6e   :  { %v746_v35 = vld [vmem:[#allocation5 + $0x15c0] sm:$0xff]  ;;  %1163 = vmatpush.msrb.mxu0 %v610_v34  ;;  %v115_v34 = vld [vmem:[#allocation5 + $0x208] sm:$0xff] }
  0x6f   :  { %v866_v36 = vld [vmem:[#allocation5 + $0x1980] sm:$0xff]  ;;  %1182 = vmatpush.msrb.mxu1 %v746_v35  ;;  %v251_v35 = vld [vmem:[#allocation5 + $0x648] sm:$0xff] }
  0x70   :  { %v1002_v37 = vld [vmem:[#allocation5 + $0x1dc0] sm:$0xff]  ;;  %1203 = vmatpush.msrb.mxu2 %v866_v36  ;;  %v371_v36 = vld [vmem:[#allocation5 + $0xa08] sm:$0xff] }
  0x71   :  { %v602_v38 = vld [vmem:[#allocation5 + $0x1140] sm:$0xff]  ;;  %1222 = vmatpush.msrb.mxu3 %v1002_v37  ;;  %v507_v37 = vld [vmem:[#allocation5 + $0xe48] sm:$0xff] }
  0x72   :  { %v738_v39 = vld [vmem:[#allocation5 + $0x1580] sm:$0xff]  ;;  %1164 = vmatpush.msrb.mxu0 %v602_v38  ;;  %v107_v38 = vld [vmem:[#allocation5 + $0x1c8] sm:$0xff] }
  0x73   :  { %v858_v40 = vld [vmem:[#allocation5 + $0x1940] sm:$0xff]  ;;  %1183 = vmatpush.msrb.mxu1 %v738_v39  ;;  %v243_v39 = vld [vmem:[#allocation5 + $0x608] sm:$0xff] }
  0x74   :  { %v994_v41 = vld [vmem:[#allocation5 + $0x1d80] sm:$0xff]  ;;  %1204 = vmatpush.msrb.mxu2 %v858_v40  ;;  %v363_v40 = vld [vmem:[#allocation5 + $0x9c8] sm:$0xff] }
  0x75   :  { %v594_v42 = vld [vmem:[#allocation5 + $0x1100] sm:$0xff]  ;;  %1223 = vmatpush.msrb.mxu3 %v994_v41  ;;  %v499_v41 = vld [vmem:[#allocation5 + $0xe08] sm:$0xff] }
  0x76   :  { %v730_v43 = vld [vmem:[#allocation5 + $0x1540] sm:$0xff]  ;;  %1165 = vmatpush.msrb.mxu0 %v594_v42  ;;  %v99_v42 = vld [vmem:[#allocation5 + $0x188] sm:$0xff] }
  0x77   :  { %v850_v44 = vld [vmem:[#allocation5 + $0x1900] sm:$0xff]  ;;  %1184 = vmatpush.msrb.mxu1 %v730_v43  ;;  %v235_v43 = vld [vmem:[#allocation5 + $0x5c8] sm:$0xff] }
  0x78   :  { %v986_v45 = vld [vmem:[#allocation5 + $0x1d40] sm:$0xff]  ;;  %1205 = vmatpush.msrb.mxu2 %v850_v44  ;;  %v355_v44 = vld [vmem:[#allocation5 + $0x988] sm:$0xff] }
  0x79   :  { %v586_v46 = vld [vmem:[#allocation5 + $0x10c0] sm:$0xff]  ;;  %1224 = vmatpush.msrb.mxu3 %v986_v45  ;;  %v491_v45 = vld [vmem:[#allocation5 + $0xdc8] sm:$0xff] }
  0x7a   :  { %v722_v47 = vld [vmem:[#allocation5 + $0x1500] sm:$0xff]  ;;  %1166 = vmatpush.msrb.mxu0 %v586_v46  ;;  %v91_v46 = vld [vmem:[#allocation5 + $0x148] sm:$0xff] }
  0x7b   :  { %v842_v48 = vld [vmem:[#allocation5 + $0x18c0] sm:$0xff]  ;;  %1185 = vmatpush.msrb.mxu1 %v722_v47  ;;  %v227_v47 = vld [vmem:[#allocation5 + $0x588] sm:$0xff] }
  0x7c   :  { %v978_v49 = vld [vmem:[#allocation5 + $0x1d00] sm:$0xff]  ;;  %1206 = vmatpush.msrb.mxu2 %v842_v48  ;;  %v347_v48 = vld [vmem:[#allocation5 + $0x948] sm:$0xff] }
  0x7d   :  { %v578_v50 = vld [vmem:[#allocation5 + $0x1080] sm:$0xff]  ;;  %1225 = vmatpush.msrb.mxu3 %v978_v49  ;;  %v483_v49 = vld [vmem:[#allocation5 + $0xd88] sm:$0xff] }
  0x7e   :  { %v714_v51 = vld [vmem:[#allocation5 + $0x14c0] sm:$0xff]  ;;  %1167 = vmatpush.msrb.mxu0 %v578_v50  ;;  %v83_v50 = vld [vmem:[#allocation5 + $0x108] sm:$0xff] }
  0x7f   :  { %v834_v52 = vld [vmem:[#allocation5 + $0x1880] sm:$0xff]  ;;  %1186 = vmatpush.msrb.mxu1 %v714_v51  ;;  %v219_v51 = vld [vmem:[#allocation5 + $0x548] sm:$0xff] }
  0x80   :  { %v970_v53 = vld [vmem:[#allocation5 + $0x1cc0] sm:$0xff]  ;;  %1207 = vmatpush.msrb.mxu2 %v834_v52  ;;  %v339_v52 = vld [vmem:[#allocation5 + $0x908] sm:$0xff] }
  0x81   :  { %v570_v54 = vld [vmem:[#allocation5 + $0x1040] sm:$0xff]  ;;  %1226 = vmatpush.msrb.mxu3 %v970_v53  ;;  %v475_v53 = vld [vmem:[#allocation5 + $0xd48] sm:$0xff] }
  0x82   :  { %v706_v55 = vld [vmem:[#allocation5 + $0x1480] sm:$0xff]  ;;  %1168 = vmatpush.msrb.mxu0 %v570_v54  ;;  %v75_v54 = vld [vmem:[#allocation5 + $0xc8] sm:$0xff] }
  0x83   :  { %v826_v56 = vld [vmem:[#allocation5 + $0x1840] sm:$0xff]  ;;  %1187 = vmatpush.msrb.mxu1 %v706_v55  ;;  %v211_v55 = vld [vmem:[#allocation5 + $0x508] sm:$0xff] }
  0x84   :  { %v962_v57 = vld [vmem:[#allocation5 + $0x1c80] sm:$0xff]  ;;  %1208 = vmatpush.msrb.mxu2 %v826_v56  ;;  %v331_v56 = vld [vmem:[#allocation5 + $0x8c8] sm:$0xff] }
  0x85   :  { %v562_v59 = vld [vmem:[#allocation5 + $0x1000] sm:$0xff]  ;;  %1227 = vmatpush.msrb.mxu3 %v962_v57  ;;  %v467_v57 = vld [vmem:[#allocation5 + $0xd08] sm:$0xff] }
  0x86   :  { %v698_v60 = vld [vmem:[#allocation5 + $0x1440] sm:$0xff]  ;;  %1169 = vmatpush.msrb.mxu0 %v562_v59  ;;  %v67_v59 = vld [vmem:[#allocation5 + $0x88] sm:$0xff] }
  0x87   :  { %v818_v61 = vld [vmem:[#allocation5 + $0x1800] sm:$0xff]  ;;  %1188 = vmatpush.msrb.mxu1 %v698_v60  ;;  %v203_v60 = vld [vmem:[#allocation5 + $0x4c8] sm:$0xff] }
  0x88   :  { %v954_v62 = vld [vmem:[#allocation5 + $0x1c40] sm:$0xff]  ;;  %1209 = vmatpush.msrb.mxu2 %v818_v61  ;;  %v323_v61 = vld [vmem:[#allocation5 + $0x888] sm:$0xff] }
  0x89   :  { %v2515_v63 = vld [vmem:[#allocation2] sm:$0xff]  ;;  %1228 = vmatpush.msrb.mxu3 %v954_v62  ;;  %1210 = vmatmul.f32.vlgmr.msrb.gmra.mxu2 %v2525_v14  ;;  %v459_v62 = vld [vmem:[#allocation5 + $0xcc8] sm:$0xff] }
  0x8a   :  { %v690_v3 = vld [vmem:[#allocation5 + $0x1400] sm:$0xff]  ;;  %1090 = vmatmul.f32.vlgmr.msra.gmra.mxu0 %v2515_v63  ;;  %1274 = vmatpush.msra.mxu2 %v427_v2  ;;  %v195_v2 = vld [vmem:[#allocation5 + $0x488] sm:$0xff] }
  0x8b   :  { %v946_v4 = vld [vmem:[#allocation5 + $0x1c00] sm:$0xff]  ;;  %1234 = vmatpush.msra.mxu0 %v171_v1  ;;  %1189 = vmatpush.msrb.mxu1 %v690_v3  ;;  %v59_v1 = vld [vmem:[#allocation5 + $0x48] sm:$0xff] }
  0x8c   :  { %1229 = vmatpush.msrb.mxu3 %v946_v4  ;;  %1275 = vmatpush.msra.mxu2 %v419_v8  ;;  %v2527_v19 = vld [vmem:[#allocation2 + $0x20] sm:$0xff]  ;;  %v315_v3 = vld [vmem:[#allocation5 + $0x848] sm:$0xff] }
  0x8d   :  { %1235 = vmatpush.msra.mxu0 %v163_v6  ;;  %1254 = vmatpush.msra.mxu1 %v299_v7  ;;  %v451_v4 = vld [vmem:[#allocation5 + $0xc88] sm:$0xff] }
  0x8e   :  { %1294 = vmatpush.msra.mxu3 %v555_v9  ;;  %1276 = vmatpush.msra.mxu2 %v411_v12  ;;  %v51_v6 = vld [vmem:[#allocation5 + $0x8] sm:$0xff] }
  0x8f   :  { %1236 = vmatpush.msra.mxu0 %v155_v10  ;;  %1255 = vmatpush.msra.mxu1 %v291_v11  ;;  %v187_v7 = vld [vmem:[#allocation5 + $0x448] sm:$0xff] }
  0x90   :  { %1295 = vmatpush.msra.mxu3 %v547_v13  ;;  %1277 = vmatpush.msra.mxu2 %v403_v17  ;;  %v307_v8 = vld [vmem:[#allocation5 + $0x808] sm:$0xff] }
  0x91   :  { %1237 = vmatpush.msra.mxu0 %v147_v15  ;;  %1256 = vmatpush.msra.mxu1 %v283_v16  ;;  %v443_v9 = vld [vmem:[#allocation5 + $0xc48] sm:$0xff] }
  0x92   :  { %1296 = vmatpush.msra.mxu3 %v539_v18  ;;  %1170 = vmatmul.f32.vlgmr.msrb.gmra.mxu0 %v2527_v19  ;;  %v683_v10 = vld [vmem:[#allocation5 + $0x13c8] sm:$0xff] }
  0x93   :  { %1230 = vmatmul.f32.vlgmr.msrb.gmra.mxu3 %v2530_v20  ;;  %1238 = vmatpush.msra.mxu0 %v139_v21  ;;  %v939_v11 = vld [vmem:[#allocation5 + $0x1bc8] sm:$0xff] }
  0x94   :  { %1257 = vmatpush.msra.mxu1 %v275_v22  ;;  %1278 = vmatpush.msra.mxu2 %v395_v23  ;;  %v179_v12 = vld [vmem:[#allocation5 + $0x408] sm:$0xff] }
  0x95   :  { %1297 = vmatpush.msra.mxu3 %v531_v24  ;;  %1190 = vmatmul.f32.vlgmr.msrb.gmra.mxu1 %v2533_v25  ;;  %v435_v13 = vld [vmem:[#allocation5 + $0xc08] sm:$0xff] }
  0x96   :  { %1239 = vmatpush.msra.mxu0 %v131_v26  ;;  %1258 = vmatpush.msra.mxu1 %v267_v27  ;;  %v675_v15 = vld [vmem:[#allocation5 + $0x1388] sm:$0xff] }
  0x97   :  { %1279 = vmatpush.msra.mxu2 %v387_v28  ;;  %1298 = vmatpush.msra.mxu3 %v523_v29  ;;  %v811_v16 = vld [vmem:[#allocation5 + $0x17c8] sm:$0xff] }
  0x98   :  { %1240 = vmatpush.msra.mxu0 %v123_v30  ;;  %1259 = vmatpush.msra.mxu1 %v259_v31  ;;  %v931_v17 = vld [vmem:[#allocation5 + $0x1b88] sm:$0xff] }
  0x99   :  { %1280 = vmatpush.msra.mxu2 %v379_v32  ;;  %1299 = vmatpush.msra.mxu3 %v515_v33  ;;  %v1067_v18 = vld [vmem:[#allocation5 + $0x1fc8] sm:$0xff] }
  0x9a   :  { %1241 = vmatpush.msra.mxu0 %v115_v34  ;;  %1260 = vmatpush.msra.mxu1 %v251_v35  ;;  %v667_v21 = vld [vmem:[#allocation5 + $0x1348] sm:$0xff] }
  0x9b   :  { %1281 = vmatpush.msra.mxu2 %v371_v36  ;;  %1300 = vmatpush.msra.mxu3 %v507_v37  ;;  %v803_v22 = vld [vmem:[#allocation5 + $0x1788] sm:$0xff] }
  0x9c   :  { %1242 = vmatpush.msra.mxu0 %v107_v38  ;;  %1261 = vmatpush.msra.mxu1 %v243_v39  ;;  %v923_v23 = vld [vmem:[#allocation5 + $0x1b48] sm:$0xff] }
  0x9d   :  { %1282 = vmatpush.msra.mxu2 %v363_v40  ;;  %1301 = vmatpush.msra.mxu3 %v499_v41  ;;  %v1059_v24 = vld [vmem:[#allocation5 + $0x1f88] sm:$0xff] }
  0x9e   :  { %1243 = vmatpush.msra.mxu0 %v99_v42  ;;  %1262 = vmatpush.msra.mxu1 %v235_v43  ;;  %v659_v26 = vld [vmem:[#allocation5 + $0x1308] sm:$0xff] }
  0x9f   :  { %1283 = vmatpush.msra.mxu2 %v355_v44  ;;  %1302 = vmatpush.msra.mxu3 %v491_v45  ;;  %v795_v27 = vld [vmem:[#allocation5 + $0x1748] sm:$0xff] }
  0xa0   :  { %1244 = vmatpush.msra.mxu0 %v91_v46  ;;  %1263 = vmatpush.msra.mxu1 %v227_v47  ;;  %v915_v28 = vld [vmem:[#allocation5 + $0x1b08] sm:$0xff] }
  0xa1   :  { %1284 = vmatpush.msra.mxu2 %v347_v48  ;;  %1303 = vmatpush.msra.mxu3 %v483_v49  ;;  %v1051_v29 = vld [vmem:[#allocation5 + $0x1f48] sm:$0xff] }
  0xa2   :  { %1245 = vmatpush.msra.mxu0 %v83_v50  ;;  %1264 = vmatpush.msra.mxu1 %v219_v51  ;;  %v651_v30 = vld [vmem:[#allocation5 + $0x12c8] sm:$0xff] }
  0xa3   :  { %1285 = vmatpush.msra.mxu2 %v339_v52  ;;  %1304 = vmatpush.msra.mxu3 %v475_v53  ;;  %v787_v31 = vld [vmem:[#allocation5 + $0x1708] sm:$0xff] }
  0xa4   :  { %1246 = vmatpush.msra.mxu0 %v75_v54  ;;  %1265 = vmatpush.msra.mxu1 %v211_v55  ;;  %v907_v32 = vld [vmem:[#allocation5 + $0x1ac8] sm:$0xff] }
  0xa5   :  { %1286 = vmatpush.msra.mxu2 %v331_v56  ;;  %1305 = vmatpush.msra.mxu3 %v467_v57  ;;  %v1043_v33 = vld [vmem:[#allocation5 + $0x1f08] sm:$0xff] }
  0xa6   :  { %1247 = vmatpush.msra.mxu0 %v67_v59  ;;  %1266 = vmatpush.msra.mxu1 %v203_v60  ;;  %v643_v34 = vld [vmem:[#allocation5 + $0x1288] sm:$0xff] }
  0xa7   :  { %1287 = vmatpush.msra.mxu2 %v323_v61  ;;  %1306 = vmatpush.msra.mxu3 %v459_v62  ;;  %v779_v35 = vld [vmem:[#allocation5 + $0x16c8] sm:$0xff] }
  0xa8   :  { %1248 = vmatpush.msra.mxu0 %v59_v1  ;;  %1267 = vmatpush.msra.mxu1 %v195_v2  ;;  %v899_v36 = vld [vmem:[#allocation5 + $0x1a88] sm:$0xff] }
  0xa9   :  { %1288 = vmatpush.msra.mxu2 %v315_v3  ;;  %1307 = vmatpush.msra.mxu3 %v451_v4  ;;  %v1035_v37 = vld [vmem:[#allocation5 + $0x1ec8] sm:$0xff] }
  0xaa   :  { %1249 = vmatpush.msra.mxu0 %v51_v6  ;;  %1268 = vmatpush.msra.mxu1 %v187_v7  ;;  %v635_v38 = vld [vmem:[#allocation5 + $0x1248] sm:$0xff] }
  0xab   :  { %1289 = vmatpush.msra.mxu2 %v307_v8  ;;  %1308 = vmatpush.msra.mxu3 %v443_v9  ;;  %v771_v39 = vld [vmem:[#allocation5 + $0x1688] sm:$0xff] }
  0xac   :  { %1314 = vmatpush.msrb.mxu0 %v683_v10  ;;  %1269 = vmatpush.msra.mxu1 %v179_v12  ;;  %v891_v40 = vld [vmem:[#allocation5 + $0x1a48] sm:$0xff] }
  0xad   :  { %1354 = vmatpush.msrb.mxu2 %v939_v11  ;;  %1309 = vmatpush.msra.mxu3 %v435_v13  ;;  %v1027_v41 = vld [vmem:[#allocation5 + $0x1e88] sm:$0xff] }
  0xae   :  { %1315 = vmatpush.msrb.mxu0 %v675_v15  ;;  %1334 = vmatpush.msrb.mxu1 %v811_v16  ;;  %v627_v42 = vld [vmem:[#allocation5 + $0x1208] sm:$0xff] }
  0xaf   :  { %1355 = vmatpush.msrb.mxu2 %v931_v17  ;;  %1374 = vmatpush.msrb.mxu3 %v1067_v18  ;;  %v763_v43 = vld [vmem:[#allocation5 + $0x1648] sm:$0xff] }
  0xb0   :  { %1316 = vmatpush.msrb.mxu0 %v667_v21  ;;  %1335 = vmatpush.msrb.mxu1 %v803_v22  ;;  %v883_v44 = vld [vmem:[#allocation5 + $0x1a08] sm:$0xff]  ;;  %v172_v21 = vld [vmem:[#allocation5 + $0x3d0] sm:$0xff] }
  0xb1   :  { %1356 = vmatpush.msrb.mxu2 %v923_v23  ;;  %1375 = vmatpush.msrb.mxu3 %v1059_v24  ;;  %v1019_v45 = vld [vmem:[#allocation5 + $0x1e48] sm:$0xff]  ;;  %v428_v22 = vld [vmem:[#allocation5 + $0xbd0] sm:$0xff] }
  0xb2   :  { %1317 = vmatpush.msrb.mxu0 %v659_v26  ;;  %1336 = vmatpush.msrb.mxu1 %v795_v27  ;;  %v619_v46 = vld [vmem:[#allocation5 + $0x11c8] sm:$0xff]  ;;  %v164_v26 = vld [vmem:[#allocation5 + $0x390] sm:$0xff] }
  0xb3   :  { %1357 = vmatpush.msrb.mxu2 %v915_v28  ;;  %1376 = vmatpush.msrb.mxu3 %v1051_v29  ;;  %v755_v47 = vld [vmem:[#allocation5 + $0x1608] sm:$0xff]  ;;  %v300_v27 = vld [vmem:[#allocation5 + $0x7d0] sm:$0xff] }
  0xb4   :  { %1318 = vmatpush.msrb.mxu0 %v651_v30  ;;  %1337 = vmatpush.msrb.mxu1 %v787_v31  ;;  %v875_v48 = vld [vmem:[#allocation5 + $0x19c8] sm:$0xff]  ;;  %v420_v28 = vld [vmem:[#allocation5 + $0xb90] sm:$0xff] }
  0xb5   :  { %1358 = vmatpush.msrb.mxu2 %v907_v32  ;;  %1377 = vmatpush.msrb.mxu3 %v1043_v33  ;;  %v1011_v49 = vld [vmem:[#allocation5 + $0x1e08] sm:$0xff]  ;;  %v556_v29 = vld [vmem:[#allocation5 + $0xfd0] sm:$0xff] }
  0xb6   :  { %1319 = vmatpush.msrb.mxu0 %v643_v34  ;;  %1338 = vmatpush.msrb.mxu1 %v779_v35  ;;  %v611_v50 = vld [vmem:[#allocation5 + $0x1188] sm:$0xff]  ;;  %v292_v30 = vld [vmem:[#allocation5 + $0x790] sm:$0xff] }
  0xb7   :  { %1359 = vmatpush.msrb.mxu2 %v899_v36  ;;  %1378 = vmatpush.msrb.mxu3 %v1035_v37  ;;  %v747_v51 = vld [vmem:[#allocation5 + $0x15c8] sm:$0xff]  ;;  %v412_v31 = vld [vmem:[#allocation5 + $0xb50] sm:$0xff] }
  0xb8   :  { %1320 = vmatpush.msrb.mxu0 %v635_v38  ;;  %1339 = vmatpush.msrb.mxu1 %v771_v39  ;;  %v867_v52 = vld [vmem:[#allocation5 + $0x1988] sm:$0xff]  ;;  %v548_v32 = vld [vmem:[#allocation5 + $0xf90] sm:$0xff] }
  0xb9   :  { %1360 = vmatpush.msrb.mxu2 %v891_v40  ;;  %1379 = vmatpush.msrb.mxu3 %v1027_v41  ;;  %v1003_v53 = vld [vmem:[#allocation5 + $0x1dc8] sm:$0xff]  ;;  %v404_v33 = vld [vmem:[#allocation5 + $0xb10] sm:$0xff] }
  0xba   :  { %1321 = vmatpush.msrb.mxu0 %v627_v42  ;;  %1340 = vmatpush.msrb.mxu1 %v763_v43  ;;  %v603_v54 = vld [vmem:[#allocation5 + $0x1148] sm:$0xff]  ;;  %v540_v34 = vld [vmem:[#allocation5 + $0xf50] sm:$0xff] }
  0xbb   :  { %1361 = vmatpush.msrb.mxu2 %v883_v44  ;;  %1380 = vmatpush.msrb.mxu3 %v1019_v45  ;;  %v739_v55 = vld [vmem:[#allocation5 + $0x1588] sm:$0xff]  ;;  %v276_v35 = vld [vmem:[#allocation5 + $0x710] sm:$0xff] }
  0xbc   :  { %1322 = vmatpush.msrb.mxu0 %v619_v46  ;;  %1341 = vmatpush.msrb.mxu1 %v755_v47  ;;  %v859_v56 = vld [vmem:[#allocation5 + $0x1948] sm:$0xff]  ;;  %v396_v36 = vld [vmem:[#allocation5 + $0xad0] sm:$0xff] }
  0xbd   :  { %1362 = vmatpush.msrb.mxu2 %v875_v48  ;;  %1381 = vmatpush.msrb.mxu3 %v1011_v49  ;;  %v995_v57 = vld [vmem:[#allocation5 + $0x1d88] sm:$0xff]  ;;  %v532_v37 = vld [vmem:[#allocation5 + $0xf10] sm:$0xff] }
  0xbe   :  { %1323 = vmatpush.msrb.mxu0 %v611_v50  ;;  %1342 = vmatpush.msrb.mxu1 %v747_v51  ;;  %v595_v59 = vld [vmem:[#allocation5 + $0x1108] sm:$0xff]  ;;  %v132_v38 = vld [vmem:[#allocation5 + $0x290] sm:$0xff] }
  0xbf   :  { %1363 = vmatpush.msrb.mxu2 %v867_v52  ;;  %1382 = vmatpush.msrb.mxu3 %v1003_v53  ;;  %v731_v60 = vld [vmem:[#allocation5 + $0x1548] sm:$0xff]  ;;  %v268_v39 = vld [vmem:[#allocation5 + $0x6d0] sm:$0xff] }
  0xc0   :  { %1324 = vmatpush.msrb.mxu0 %v603_v54  ;;  %1343 = vmatpush.msrb.mxu1 %v739_v55  ;;  %v851_v61 = vld [vmem:[#allocation5 + $0x1908] sm:$0xff]  ;;  %v388_v40 = vld [vmem:[#allocation5 + $0xa90] sm:$0xff] }
  0xc1   :  { %v987_v62 = vld [vmem:[#allocation5 + $0x1d48] sm:$0xff]  ;;  %1364 = vmatpush.msrb.mxu2 %v859_v56  ;;  %1383 = vmatpush.msrb.mxu3 %v995_v57  ;;  %v524_v41 = vld [vmem:[#allocation5 + $0xed0] sm:$0xff] }
  0xc2   :  { %v587_v1 = vld [vmem:[#allocation5 + $0x10c8] sm:$0xff]  ;;  %1325 = vmatpush.msrb.mxu0 %v595_v59  ;;  %1344 = vmatpush.msrb.mxu1 %v731_v60  ;;  %v260_v42 = vld [vmem:[#allocation5 + $0x690] sm:$0xff] }
  0xc3   :  { %v723_v2 = vld [vmem:[#allocation5 + $0x1508] sm:$0xff]  ;;  %1365 = vmatpush.msrb.mxu2 %v851_v61  ;;  %1384 = vmatpush.msrb.mxu3 %v987_v62  ;;  %v380_v43 = vld [vmem:[#allocation5 + $0xa50] sm:$0xff] }
  0xc4   :  { %v843_v3 = vld [vmem:[#allocation5 + $0x18c8] sm:$0xff]  ;;  %1326 = vmatpush.msrb.mxu0 %v587_v1  ;;  %1345 = vmatpush.msrb.mxu1 %v723_v2  ;;  %v516_v44 = vld [vmem:[#allocation5 + $0xe90] sm:$0xff] }
  0xc5   :  { %v979_v4 = vld [vmem:[#allocation5 + $0x1d08] sm:$0xff]  ;;  %1366 = vmatpush.msrb.mxu2 %v843_v3  ;;  %1250 = vmatmul.f32.vlgmr.msra.gmra.mxu0 %v2515_v63  ;;  %v148_v63 = vld [vmem:[#allocation5 + $0x310] sm:$0xff] }
  0xc6   :  { %v579_v6 = vld [vmem:[#allocation5 + $0x1088] sm:$0xff]  ;;  %1385 = vmatpush.msrb.mxu3 %v979_v4  ;;  %1290 = vmatmul.f32.vlgmr.msra.gmra.mxu2 %v2513_v58  ;;  %v156_v58 = vld [vmem:[#allocation5 + $0x350] sm:$0xff] }
  0xc7   :  { %v715_v7 = vld [vmem:[#allocation5 + $0x14c8] sm:$0xff]  ;;  %1327 = vmatpush.msrb.mxu0 %v579_v6  ;;  %1310 = vmatmul.f32.vlgmr.msra.gmra.mxu3 %v2518_v0  ;;  %v284_v0 = vld [vmem:[#allocation5 + $0x750] sm:$0xff] }
  0xc8   :  { %v835_v8 = vld [vmem:[#allocation5 + $0x1888] sm:$0xff]  ;;  %1346 = vmatpush.msrb.mxu1 %v715_v7  ;;  %v372_v45 = vld [vmem:[#allocation5 + $0xa10] sm:$0xff] }
  0xc9   :  { %v971_v9 = vld [vmem:[#allocation5 + $0x1cc8] sm:$0xff]  ;;  %1367 = vmatpush.msrb.mxu2 %v835_v8  ;;  %1270 = vmatmul.f32.vlgmr.msra.gmra.mxu1 %v2521_v5  ;;  %v140_v5 = vld [vmem:[#allocation5 + $0x2d0] sm:$0xff] }
  0xca   :  { %v571_v10 = vld [vmem:[#allocation5 + $0x1048] sm:$0xff]  ;;  %1386 = vmatpush.msrb.mxu3 %v971_v9  ;;  %v508_v46 = vld [vmem:[#allocation5 + $0xe50] sm:$0xff] }
  0xcb   :  { %v707_v11 = vld [vmem:[#allocation5 + $0x1488] sm:$0xff]  ;;  %1328 = vmatpush.msrb.mxu0 %v571_v10  ;;  %v108_v47 = vld [vmem:[#allocation5 + $0x1d0] sm:$0xff] }
  0xcc   :  { %v827_v12 = vld [vmem:[#allocation5 + $0x1848] sm:$0xff]  ;;  %1347 = vmatpush.msrb.mxu1 %v707_v11  ;;  %v244_v48 = vld [vmem:[#allocation5 + $0x610] sm:$0xff] }
  0xcd   :  { %v963_v13 = vld [vmem:[#allocation5 + $0x1c88] sm:$0xff]  ;;  %1368 = vmatpush.msrb.mxu2 %v827_v12  ;;  %v500_v49 = vld [vmem:[#allocation5 + $0xe10] sm:$0xff] }
  0xce   :  { %v563_v15 = vld [vmem:[#allocation5 + $0x1008] sm:$0xff]  ;;  %1387 = vmatpush.msrb.mxu3 %v963_v13  ;;  %v100_v50 = vld [vmem:[#allocation5 + $0x190] sm:$0xff] }
  0xcf   :  { %v699_v16 = vld [vmem:[#allocation5 + $0x1448] sm:$0xff]  ;;  %1329 = vmatpush.msrb.mxu0 %v563_v15  ;;  %v236_v51 = vld [vmem:[#allocation5 + $0x5d0] sm:$0xff] }
  0xd0   :  { %v819_v17 = vld [vmem:[#allocation5 + $0x1808] sm:$0xff]  ;;  %1348 = vmatpush.msrb.mxu1 %v699_v16  ;;  %1330 = vmatmul.f32.vlgmr.msrb.gmra.mxu0 %v2527_v19  ;;  %v116_v19 = vld [vmem:[#allocation5 + $0x210] sm:$0xff] }
  0xd1   :  { %v955_v18 = vld [vmem:[#allocation5 + $0x1c48] sm:$0xff]  ;;  %1369 = vmatpush.msrb.mxu2 %v819_v17  ;;  %1394 = vmatpush.msra.mxu0 %v172_v21  ;;  %v356_v52 = vld [vmem:[#allocation5 + $0x990] sm:$0xff] }
  0xd2   :  { %v691_v23 = vld [vmem:[#allocation5 + $0x1408] sm:$0xff]  ;;  %1388 = vmatpush.msrb.mxu3 %v955_v18  ;;  %1370 = vmatmul.f32.vlgmr.msrb.gmra.mxu2 %v2525_v14  ;;  %v124_v14 = vld [vmem:[#allocation5 + $0x250] sm:$0xff] }
  0xd3   :  { %v947_v24 = vld [vmem:[#allocation5 + $0x1c08] sm:$0xff]  ;;  %1434 = vmatpush.msra.mxu2 %v428_v22  ;;  %1349 = vmatpush.msrb.mxu1 %v691_v23  ;;  %v492_v53 = vld [vmem:[#allocation5 + $0xdd0] sm:$0xff] }
  0xd4   :  { %1389 = vmatpush.msrb.mxu3 %v947_v24  ;;  %1395 = vmatpush.msra.mxu0 %v164_v26  ;;  %v92_v54 = vld [vmem:[#allocation5 + $0x150] sm:$0xff] }
  0xd5   :  { %1414 = vmatpush.msra.mxu1 %v300_v27  ;;  %1435 = vmatpush.msra.mxu2 %v420_v28  ;;  %v228_v55 = vld [vmem:[#allocation5 + $0x590] sm:$0xff] }
  0xd6   :  { %1454 = vmatpush.msra.mxu3 %v556_v29  ;;  %1396 = vmatpush.msra.mxu0 %v156_v58  ;;  %v348_v56 = vld [vmem:[#allocation5 + $0x950] sm:$0xff] }
  0xd7   :  { %1415 = vmatpush.msra.mxu1 %v292_v30  ;;  %1436 = vmatpush.msra.mxu2 %v412_v31  ;;  %v484_v57 = vld [vmem:[#allocation5 + $0xd90] sm:$0xff] }
  0xd8   :  { %1455 = vmatpush.msra.mxu3 %v548_v32  ;;  %1397 = vmatpush.msra.mxu0 %v148_v63  ;;  %v84_v59 = vld [vmem:[#allocation5 + $0x110] sm:$0xff] }
  0xd9   :  { %1416 = vmatpush.msra.mxu1 %v284_v0  ;;  %1437 = vmatpush.msra.mxu2 %v404_v33  ;;  %v220_v60 = vld [vmem:[#allocation5 + $0x550] sm:$0xff] }
  0xda   :  { %1456 = vmatpush.msra.mxu3 %v540_v34  ;;  %1398 = vmatpush.msra.mxu0 %v140_v5  ;;  %v340_v61 = vld [vmem:[#allocation5 + $0x910] sm:$0xff] }
  0xdb   :  { %1390 = vmatmul.f32.vlgmr.msrb.gmra.mxu3 %v2530_v20  ;;  %1417 = vmatpush.msra.mxu1 %v276_v35  ;;  %v252_v20 = vld [vmem:[#allocation5 + $0x650] sm:$0xff] }
  0xdc   :  { %1438 = vmatpush.msra.mxu2 %v396_v36  ;;  %1457 = vmatpush.msra.mxu3 %v532_v37  ;;  %v476_v62 = vld [vmem:[#allocation5 + $0xd50] sm:$0xff] }
  0xdd   :  { %1350 = vmatmul.f32.vlgmr.msrb.gmra.mxu1 %v2533_v25  ;;  %1399 = vmatpush.msra.mxu0 %v132_v38  ;;  %v364_v25 = vld [vmem:[#allocation5 + $0x9d0] sm:$0xff] }
  0xde   :  { %1418 = vmatpush.msra.mxu1 %v268_v39  ;;  %1439 = vmatpush.msra.mxu2 %v388_v40  ;;  %v76_v1 = vld [vmem:[#allocation5 + $0xd0] sm:$0xff] }
  0xdf   :  { %1458 = vmatpush.msra.mxu3 %v524_v41  ;;  %1400 = vmatpush.msra.mxu0 %v124_v14  ;;  %v212_v2 = vld [vmem:[#allocation5 + $0x510] sm:$0xff] }
  0xe0   :  { %1419 = vmatpush.msra.mxu1 %v260_v42  ;;  %1440 = vmatpush.msra.mxu2 %v380_v43  ;;  %v332_v3 = vld [vmem:[#allocation5 + $0x8d0] sm:$0xff] }
  0xe1   :  { %1459 = vmatpush.msra.mxu3 %v516_v44  ;;  %1401 = vmatpush.msra.mxu0 %v116_v19  ;;  %v468_v4 = vld [vmem:[#allocation5 + $0xd10] sm:$0xff] }
  0xe2   :  { %1420 = vmatpush.msra.mxu1 %v252_v20  ;;  %1441 = vmatpush.msra.mxu2 %v372_v45  ;;  %v68_v6 = vld [vmem:[#allocation5 + $0x90] sm:$0xff] }
  0xe3   :  { %1460 = vmatpush.msra.mxu3 %v508_v46  ;;  %1402 = vmatpush.msra.mxu0 %v108_v47  ;;  %v204_v7 = vld [vmem:[#allocation5 + $0x4d0] sm:$0xff] }
  0xe4   :  { %1421 = vmatpush.msra.mxu1 %v244_v48  ;;  %1442 = vmatpush.msra.mxu2 %v364_v25  ;;  %v324_v8 = vld [vmem:[#allocation5 + $0x890] sm:$0xff] }
  0xe5   :  { %1461 = vmatpush.msra.mxu3 %v500_v49  ;;  %1403 = vmatpush.msra.mxu0 %v100_v50  ;;  %v460_v9 = vld [vmem:[#allocation5 + $0xcd0] sm:$0xff] }
  0xe6   :  { %1422 = vmatpush.msra.mxu1 %v236_v51  ;;  %1443 = vmatpush.msra.mxu2 %v356_v52  ;;  %v60_v10 = vld [vmem:[#allocation5 + $0x50] sm:$0xff] }
  0xe7   :  { %1462 = vmatpush.msra.mxu3 %v492_v53  ;;  %1404 = vmatpush.msra.mxu0 %v92_v54  ;;  %v196_v11 = vld [vmem:[#allocation5 + $0x490] sm:$0xff] }
  0xe8   :  { %1423 = vmatpush.msra.mxu1 %v228_v55  ;;  %1444 = vmatpush.msra.mxu2 %v348_v56  ;;  %v316_v12 = vld [vmem:[#allocation5 + $0x850] sm:$0xff] }
  0xe9   :  { %1463 = vmatpush.msra.mxu3 %v484_v57  ;;  %1405 = vmatpush.msra.mxu0 %v84_v59  ;;  %v452_v13 = vld [vmem:[#allocation5 + $0xc90] sm:$0xff] }
  0xea   :  { %1424 = vmatpush.msra.mxu1 %v220_v60  ;;  %1445 = vmatpush.msra.mxu2 %v340_v61  ;;  %v52_v15 = vld [vmem:[#allocation5 + $0x10] sm:$0xff] }
  0xeb   :  { %1464 = vmatpush.msra.mxu3 %v476_v62  ;;  %1406 = vmatpush.msra.mxu0 %v76_v1  ;;  %v188_v16 = vld [vmem:[#allocation5 + $0x450] sm:$0xff] }
  0xec   :  { %1425 = vmatpush.msra.mxu1 %v212_v2  ;;  %1446 = vmatpush.msra.mxu2 %v332_v3  ;;  %v308_v17 = vld [vmem:[#allocation5 + $0x810] sm:$0xff] }
  0xed   :  { %1465 = vmatpush.msra.mxu3 %v468_v4  ;;  %1407 = vmatpush.msra.mxu0 %v68_v6  ;;  %v444_v18 = vld [vmem:[#allocation5 + $0xc50] sm:$0xff] }
  0xee   :  { %1426 = vmatpush.msra.mxu1 %v204_v7  ;;  %1447 = vmatpush.msra.mxu2 %v324_v8  ;;  %v684_v21 = vld [vmem:[#allocation5 + $0x13d0] sm:$0xff] }
  0xef   :  { %1466 = vmatpush.msra.mxu3 %v460_v9  ;;  %1408 = vmatpush.msra.mxu0 %v60_v10  ;;  %v940_v22 = vld [vmem:[#allocation5 + $0x1bd0] sm:$0xff] }
  0xf0   :  { %1427 = vmatpush.msra.mxu1 %v196_v11  ;;  %1448 = vmatpush.msra.mxu2 %v316_v12  ;;  %v180_v23 = vld [vmem:[#allocation5 + $0x410] sm:$0xff]  ;;  %v1111_v11 = vpop.f32.mrf.mxu1 }
  0xf1   :  { %1467 = vmatpush.msra.mxu3 %v452_v13  ;;  %1409 = vmatpush.msra.mxu0 %v52_v15  ;;  %v436_v24 = vld [vmem:[#allocation5 + $0xc10] sm:$0xff] }
  0xf2   :  { %1428 = vmatpush.msra.mxu1 %v188_v16  ;;  %1449 = vmatpush.msra.mxu2 %v308_v17  ;;  %v676_v26 = vld [vmem:[#allocation5 + $0x1390] sm:$0xff]  ;;  %v1131_v16 = vpop.f32.mrf.mxu2 }
  0xf3   :  { %1468 = vmatpush.msra.mxu3 %v444_v18  ;;  %v812_v27 = vld [vmem:[#allocation5 + $0x17d0] sm:$0xff]  ;;  %1474 = vmatpush.msrb.mxu0 %v684_v21 }
  0xf4   :  { %1514 = vmatpush.msrb.mxu2 %v940_v22  ;;  %v932_v28 = vld [vmem:[#allocation5 + $0x1b90] sm:$0xff]  ;;  %1429 = vmatpush.msra.mxu1 %v180_v23 }
  0xf5   :  { %v1068_v29 = vld [vmem:[#allocation5 + $0x1fd0] sm:$0xff]  ;;  %1469 = vmatpush.msra.mxu3 %v436_v24  ;;  %1475 = vmatpush.msrb.mxu0 %v676_v26  ;;  %v1151_v26 = vpop.f32.mrf.mxu3 }
  0xf6   :  { %v668_v58 = vld [vmem:[#allocation5 + $0x1350] sm:$0xff]  ;;  %1494 = vmatpush.msrb.mxu1 %v812_v27  ;;  %1515 = vmatpush.msrb.mxu2 %v932_v28 }
  0xf7   :  { %v804_v30 = vld [vmem:[#allocation5 + $0x1790] sm:$0xff]  ;;  %1534 = vmatpush.msrb.mxu3 %v1068_v29  ;;  %1476 = vmatpush.msrb.mxu0 %v668_v58  ;;  %v173_v58 = vld [vmem:[#allocation5 + $0x3d8] sm:$0xff] }
  0xf8   :  { %v924_v31 = vld [vmem:[#allocation5 + $0x1b50] sm:$0xff]  ;;  %1495 = vmatpush.msrb.mxu1 %v804_v30  ;;  %v429_v30 = vld [vmem:[#allocation5 + $0xbd8] sm:$0xff] }
  0xf9   :  { %v1060_v32 = vld [vmem:[#allocation5 + $0x1f90] sm:$0xff]  ;;  %1516 = vmatpush.msrb.mxu2 %v924_v31 }
  0xfa   :  { %v660_v63 = vld [vmem:[#allocation5 + $0x1310] sm:$0xff]  ;;  %1535 = vmatpush.msrb.mxu3 %v1060_v32 }
  0xfb   :  { %v796_v0 = vld [vmem:[#allocation5 + $0x1750] sm:$0xff]  ;;  %1477 = vmatpush.msrb.mxu0 %v660_v63  ;;  %v2548_v63 = vld [vmem:[#allocation2] sm:$0xff] }
  0xfc   :  { %v916_v33 = vld [vmem:[#allocation5 + $0x1b10] sm:$0xff]  ;;  %1496 = vmatpush.msrb.mxu1 %v796_v0  ;;  %1410 = vmatmul.f32.vlgmr.msra.gmra.mxu0 %v2548_v63 }
  0xfd   :  { %v1052_v34 = vld [vmem:[#allocation5 + $0x1f50] sm:$0xff]  ;;  %1517 = vmatpush.msrb.mxu2 %v916_v33 }
  0xfe   :  { %v652_v5 = vld [vmem:[#allocation5 + $0x12d0] sm:$0xff]  ;;  %1536 = vmatpush.msrb.mxu3 %v1052_v34  ;;  %v2551_v34 = vld [vmem:[#allocation2 + $0x18] sm:$0xff] }
  0xff   :  { %v788_v35 = vld [vmem:[#allocation5 + $0x1710] sm:$0xff]  ;;  %1478 = vmatpush.msrb.mxu0 %v652_v5  ;;  %1470 = vmatmul.f32.vlgmr.msra.gmra.mxu3 %v2551_v34  ;;  %v165_v5 = vld [vmem:[#allocation5 + $0x398] sm:$0xff] }
 0x100   :  { %v908_v36 = vld [vmem:[#allocation5 + $0x1ad0] sm:$0xff]  ;;  %1497 = vmatpush.msrb.mxu1 %v788_v35  ;;  %v301_v35 = vld [vmem:[#allocation5 + $0x7d8] sm:$0xff] }
 0x101   :  { %v1044_v37 = vld [vmem:[#allocation5 + $0x1f10] sm:$0xff]  ;;  %1518 = vmatpush.msrb.mxu2 %v908_v36  ;;  %v421_v36 = vld [vmem:[#allocation5 + $0xb98] sm:$0xff] }
 0x102   :  { %v644_v38 = vld [vmem:[#allocation5 + $0x1290] sm:$0xff]  ;;  %1537 = vmatpush.msrb.mxu3 %v1044_v37  ;;  %v557_v37 = vld [vmem:[#allocation5 + $0xfd8] sm:$0xff] }
 0x103   :  { %v780_v39 = vld [vmem:[#allocation5 + $0x16d0] sm:$0xff]  ;;  %1479 = vmatpush.msrb.mxu0 %v644_v38 }
 0x104   :  { %v900_v40 = vld [vmem:[#allocation5 + $0x1a90] sm:$0xff]  ;;  %1498 = vmatpush.msrb.mxu1 %v780_v39  ;;  %v2554_v39 = vld [vmem:[#allocation2 + $0x8] sm:$0xff] }
 0x105   :  { %v1036_v41 = vld [vmem:[#allocation5 + $0x1ed0] sm:$0xff]  ;;  %1519 = vmatpush.msrb.mxu2 %v900_v40  ;;  %1430 = vmatmul.f32.vlgmr.msra.gmra.mxu1 %v2554_v39  ;;  %v157_v40 = vld [vmem:[#allocation5 + $0x358] sm:$0xff] }
 0x106   :  { %v636_v14 = vld [vmem:[#allocation5 + $0x1250] sm:$0xff]  ;;  %1538 = vmatpush.msrb.mxu3 %v1036_v41  ;;  %v293_v41 = vld [vmem:[#allocation5 + $0x798] sm:$0xff] }
 0x107   :  { %v772_v42 = vld [vmem:[#allocation5 + $0x1690] sm:$0xff]  ;;  %1480 = vmatpush.msrb.mxu0 %v636_v14  ;;  %v1091_v3 = vpop.f32.mrf.mxu0 }
 0x108   :  { %v892_v43 = vld [vmem:[#allocation5 + $0x1a50] sm:$0xff]  ;;  %1499 = vmatpush.msrb.mxu1 %v772_v42  ;;  %v1112_v15 = vadd.f32 %v1111_v11, %v1091_v3  ;;  %v517_v3 = vld [vmem:[#allocation5 + $0xe98] sm:$0xff] }
 0x109   :  { %v1028_v44 = vld [vmem:[#allocation5 + $0x1e90] sm:$0xff]  ;;  %1520 = vmatpush.msrb.mxu2 %v892_v43  ;;  %v413_v43 = vld [vmem:[#allocation5 + $0xb58] sm:$0xff] }
 0x10a   :  { %v628_v19 = vld [vmem:[#allocation5 + $0x1210] sm:$0xff]  ;;  %1539 = vmatpush.msrb.mxu3 %v1028_v44  ;;  %v1132_v22 = vadd.f32 %v1131_v16, %v1112_v15  ;;  %v549_v44 = vld [vmem:[#allocation5 + $0xf98] sm:$0xff] }
 0x10b   :  { %v764_v20 = vld [vmem:[#allocation5 + $0x1650] sm:$0xff]  ;;  %1481 = vmatpush.msrb.mxu0 %v628_v19  ;;  %v149_v19 = vld [vmem:[#allocation5 + $0x318] sm:$0xff] }
 0x10c   :  { %v884_v45 = vld [vmem:[#allocation5 + $0x1a10] sm:$0xff]  ;;  %1500 = vmatpush.msrb.mxu1 %v764_v20  ;;  %v1152_v28 = vadd.f32 %v1151_v26, %v1132_v22  ;;  %v1211_v42 = vpop.f32.mrf.mxu2  ;;  %v365_v11 = vld [vmem:[#allocation5 + $0x9d8] sm:$0xff] }
 0x10d   :  { %v1020_v46 = vld [vmem:[#allocation5 + $0x1e50] sm:$0xff]  ;;  %1521 = vmatpush.msrb.mxu2 %v884_v45  ;;  %v285_v45 = vld [vmem:[#allocation5 + $0x758] sm:$0xff] }
 0x10e   :  { %v620_v47 = vld [vmem:[#allocation5 + $0x11d0] sm:$0xff]  ;;  %1540 = vmatpush.msrb.mxu3 %v1020_v46  ;;  %v405_v46 = vld [vmem:[#allocation5 + $0xb18] sm:$0xff] }
 0x10f   :  { %v756_v48 = vld [vmem:[#allocation5 + $0x1610] sm:$0xff]  ;;  %1482 = vmatpush.msrb.mxu0 %v620_v47  ;;  %v1171_v32 = vpop.f32.mrf.mxu0  ;;  %v237_v15 = vld [vmem:[#allocation5 + $0x5d8] sm:$0xff] }
 0x110   :  { %v876_v25 = vld [vmem:[#allocation5 + $0x19d0] sm:$0xff]  ;;  %1501 = vmatpush.msrb.mxu1 %v756_v48  ;;  %v1172_v33 = vadd.f32 %v1171_v32, %v1152_v28  ;;  %v541_v48 = vld [vmem:[#allocation5 + $0xf58] sm:$0xff] }
 0x111   :  { %v1012_v49 = vld [vmem:[#allocation5 + $0x1e10] sm:$0xff]  ;;  %1522 = vmatpush.msrb.mxu2 %v876_v25  ;;  %v357_v16 = vld [vmem:[#allocation5 + $0x998] sm:$0xff] }
 0x112   :  { %v612_v50 = vld [vmem:[#allocation5 + $0x1190] sm:$0xff]  ;;  %1541 = vmatpush.msrb.mxu3 %v1012_v49  ;;  %v1191_v38 = vpop.f32.mrf.mxu1  ;;  %v349_v22 = vld [vmem:[#allocation5 + $0x958] sm:$0xff] }
 0x113   :  { %v748_v51 = vld [vmem:[#allocation5 + $0x15d0] sm:$0xff]  ;;  %1483 = vmatpush.msrb.mxu0 %v612_v50  ;;  %v1192_v14 = vadd.f32 %v1191_v38, %v1172_v33  ;;  %v141_v50 = vld [vmem:[#allocation5 + $0x2d8] sm:$0xff] }
 0x114   :  { %v868_v52 = vld [vmem:[#allocation5 + $0x1990] sm:$0xff]  ;;  %1502 = vmatpush.msrb.mxu1 %v748_v51  ;;  %v277_v51 = vld [vmem:[#allocation5 + $0x718] sm:$0xff] }
 0x115   :  { %v1004_v53 = vld [vmem:[#allocation5 + $0x1dd0] sm:$0xff]  ;;  %1523 = vmatpush.msrb.mxu2 %v868_v52  ;;  %v1212_v20 = vadd.f32 %v1211_v42, %v1192_v14  ;;  %v397_v52 = vld [vmem:[#allocation5 + $0xad8] sm:$0xff] }
 0x116   :  { %v604_v54 = vld [vmem:[#allocation5 + $0x1150] sm:$0xff]  ;;  %1542 = vmatpush.msrb.mxu3 %v1004_v53  ;;  %v1231_v47 = vpop.f32.mrf.mxu3  ;;  %v2560_v53 = vld [vmem:[#allocation2 + $0x20] sm:$0xff]  ;;  %v221_v26 = vld [vmem:[#allocation5 + $0x558] sm:$0xff] }
 0x117   :  { %v740_v55 = vld [vmem:[#allocation5 + $0x1590] sm:$0xff]  ;;  %1484 = vmatpush.msrb.mxu0 %v604_v54  ;;  %v1232_v25 = vadd.f32 %v1231_v47, %v1212_v20  ;;  %v533_v54 = vld [vmem:[#allocation5 + $0xf18] sm:$0xff] }
 0x118   :  { %v860_v56 = vld [vmem:[#allocation5 + $0x1950] sm:$0xff]  ;;  %1503 = vmatpush.msrb.mxu1 %v740_v55  ;;  %v2563_v55 = vld [vmem:[#allocation2 + $0x38] sm:$0xff] }
 0x119   :  { %v996_v57 = vld [vmem:[#allocation5 + $0x1d90] sm:$0xff]  ;;  %1524 = vmatpush.msrb.mxu2 %v860_v56  ;;  %2354 = vst [vmem:[#allocation7] sm:$0xff] %v1232_v25  ;;  %v133_v56 = vld [vmem:[#allocation5 + $0x298] sm:$0xff] }
 0x11a   :  { %v596_v59 = vld [vmem:[#allocation5 + $0x1110] sm:$0xff]  ;;  %1543 = vmatpush.msrb.mxu3 %v996_v57  ;;  %v269_v57 = vld [vmem:[#allocation5 + $0x6d8] sm:$0xff] }
 0x11b   :  { %v732_v60 = vld [vmem:[#allocation5 + $0x1550] sm:$0xff]  ;;  %1485 = vmatpush.msrb.mxu0 %v596_v59  ;;  %v389_v59 = vld [vmem:[#allocation5 + $0xa98] sm:$0xff] }
 0x11c   :  { %v852_v61 = vld [vmem:[#allocation5 + $0x1910] sm:$0xff]  ;;  %1504 = vmatpush.msrb.mxu1 %v732_v60  ;;  %v525_v60 = vld [vmem:[#allocation5 + $0xed8] sm:$0xff] }
 0x11d   :  { %v988_v62 = vld [vmem:[#allocation5 + $0x1d50] sm:$0xff]  ;;  %1525 = vmatpush.msrb.mxu2 %v852_v61  ;;  %v2566_v61 = vld [vmem:[#allocation2 + $0x28] sm:$0xff]  ;;  %v477_v28 = vld [vmem:[#allocation5 + $0xd58] sm:$0xff] }
 0x11e   :  { %v588_v1 = vld [vmem:[#allocation5 + $0x10d0] sm:$0xff]  ;;  %1544 = vmatpush.msrb.mxu3 %v988_v62  ;;  %v125_v62 = vld [vmem:[#allocation5 + $0x258] sm:$0xff] }
 0x11f   :  { %v724_v2 = vld [vmem:[#allocation5 + $0x1510] sm:$0xff]  ;;  %1486 = vmatpush.msrb.mxu0 %v588_v1  ;;  %v261_v1 = vld [vmem:[#allocation5 + $0x698] sm:$0xff] }
 0x120   :  { %v844_v4 = vld [vmem:[#allocation5 + $0x18d0] sm:$0xff]  ;;  %1505 = vmatpush.msrb.mxu1 %v724_v2  ;;  %v381_v2 = vld [vmem:[#allocation5 + $0xa58] sm:$0xff] }
 0x121   :  { %v980_v6 = vld [vmem:[#allocation5 + $0x1d10] sm:$0xff]  ;;  %1526 = vmatpush.msrb.mxu2 %v844_v4  ;;  %v117_v4 = vld [vmem:[#allocation5 + $0x218] sm:$0xff] }
 0x122   :  { %v580_v7 = vld [vmem:[#allocation5 + $0x1090] sm:$0xff]  ;;  %1545 = vmatpush.msrb.mxu3 %v980_v6  ;;  %v253_v6 = vld [vmem:[#allocation5 + $0x658] sm:$0xff] }
 0x123   :  { %v716_v8 = vld [vmem:[#allocation5 + $0x14d0] sm:$0xff]  ;;  %1487 = vmatpush.msrb.mxu0 %v580_v7  ;;  %v373_v7 = vld [vmem:[#allocation5 + $0xa18] sm:$0xff] }
 0x124   :  { %v836_v9 = vld [vmem:[#allocation5 + $0x1890] sm:$0xff]  ;;  %1506 = vmatpush.msrb.mxu1 %v716_v8  ;;  %v509_v8 = vld [vmem:[#allocation5 + $0xe58] sm:$0xff] }
 0x125   :  { %v972_v10 = vld [vmem:[#allocation5 + $0x1cd0] sm:$0xff]  ;;  %1527 = vmatpush.msrb.mxu2 %v836_v9  ;;  %v109_v9 = vld [vmem:[#allocation5 + $0x1d8] sm:$0xff] }
 0x126   :  { %v572_v12 = vld [vmem:[#allocation5 + $0x1050] sm:$0xff]  ;;  %1546 = vmatpush.msrb.mxu3 %v972_v10  ;;  %v245_v10 = vld [vmem:[#allocation5 + $0x618] sm:$0xff] }
 0x127   :  { %v708_v13 = vld [vmem:[#allocation5 + $0x1490] sm:$0xff]  ;;  %1488 = vmatpush.msrb.mxu0 %v572_v12  ;;  %v501_v12 = vld [vmem:[#allocation5 + $0xe18] sm:$0xff] }
 0x128   :  { %v828_v17 = vld [vmem:[#allocation5 + $0x1850] sm:$0xff]  ;;  %1507 = vmatpush.msrb.mxu1 %v708_v13  ;;  %v101_v13 = vld [vmem:[#allocation5 + $0x198] sm:$0xff] }
 0x129   :  { %v964_v18 = vld [vmem:[#allocation5 + $0x1c90] sm:$0xff]  ;;  %1528 = vmatpush.msrb.mxu2 %v828_v17  ;;  %v493_v17 = vld [vmem:[#allocation5 + $0xdd8] sm:$0xff] }
 0x12a   :  { %v564_v21 = vld [vmem:[#allocation5 + $0x1010] sm:$0xff]  ;;  %1547 = vmatpush.msrb.mxu3 %v964_v18  ;;  %v93_v18 = vld [vmem:[#allocation5 + $0x158] sm:$0xff] }
 0x12b   :  { %v700_v23 = vld [vmem:[#allocation5 + $0x1450] sm:$0xff]  ;;  %1489 = vmatpush.msrb.mxu0 %v564_v21  ;;  %v229_v21 = vld [vmem:[#allocation5 + $0x598] sm:$0xff] }
 0x12c   :  { %v820_v24 = vld [vmem:[#allocation5 + $0x1810] sm:$0xff]  ;;  %1508 = vmatpush.msrb.mxu1 %v700_v23  ;;  %1490 = vmatmul.f32.vlgmr.msrb.gmra.mxu0 %v2560_v53  ;;  %v485_v23 = vld [vmem:[#allocation5 + $0xd98] sm:$0xff] }
 0x12d   :  { %v956_v27 = vld [vmem:[#allocation5 + $0x1c50] sm:$0xff]  ;;  %1529 = vmatpush.msrb.mxu2 %v820_v24  ;;  %1554 = vmatpush.msra.mxu0 %v173_v58  ;;  %v85_v24 = vld [vmem:[#allocation5 + $0x118] sm:$0xff] }
 0x12e   :  { %v2545_v29 = vld [vmem:[#allocation2 + $0x10] sm:$0xff]  ;;  %1548 = vmatpush.msrb.mxu3 %v956_v27  ;;  %v341_v27 = vld [vmem:[#allocation5 + $0x918] sm:$0xff] }
 0x12f   :  { %1450 = vmatmul.f32.vlgmr.msra.gmra.mxu2 %v2545_v29  ;;  %v692_v31 = vld [vmem:[#allocation5 + $0x1410] sm:$0xff]  ;;  %1555 = vmatpush.msra.mxu0 %v165_v5  ;;  %v77_v58 = vld [vmem:[#allocation5 + $0xd8] sm:$0xff] }
 0x130   :  { %v948_v0 = vld [vmem:[#allocation5 + $0x1c10] sm:$0xff]  ;;  %1594 = vmatpush.msra.mxu2 %v429_v30  ;;  %1509 = vmatpush.msrb.mxu1 %v692_v31  ;;  %v213_v30 = vld [vmem:[#allocation5 + $0x518] sm:$0xff] }
 0x131   :  { %1549 = vmatpush.msrb.mxu3 %v948_v0  ;;  %1556 = vmatpush.msra.mxu0 %v157_v40  ;;  %v2557_v49 = vld [vmem:[#allocation2 + $0x30] sm:$0xff]  ;;  %v333_v31 = vld [vmem:[#allocation5 + $0x8d8] sm:$0xff] }
 0x132   :  { %1574 = vmatpush.msra.mxu1 %v301_v35  ;;  %1595 = vmatpush.msra.mxu2 %v421_v36  ;;  %v469_v32 = vld [vmem:[#allocation5 + $0xd18] sm:$0xff] }
 0x133   :  { %1614 = vmatpush.msra.mxu3 %v557_v37  ;;  %1557 = vmatpush.msra.mxu0 %v149_v19  ;;  %v69_v0 = vld [vmem:[#allocation5 + $0x98] sm:$0xff] }
 0x134   :  { %1575 = vmatpush.msra.mxu1 %v293_v41  ;;  %1596 = vmatpush.msra.mxu2 %v413_v43  ;;  %v205_v33 = vld [vmem:[#allocation5 + $0x4d8] sm:$0xff] }
 0x135   :  { %1615 = vmatpush.msra.mxu3 %v549_v44  ;;  %1558 = vmatpush.msra.mxu0 %v141_v50  ;;  %v325_v5 = vld [vmem:[#allocation5 + $0x898] sm:$0xff] }
 0x136   :  { %1576 = vmatpush.msra.mxu1 %v285_v45  ;;  %1597 = vmatpush.msra.mxu2 %v405_v46  ;;  %v461_v35 = vld [vmem:[#allocation5 + $0xcd8] sm:$0xff] }
 0x137   :  { %1530 = vmatmul.f32.vlgmr.msrb.gmra.mxu2 %v2557_v49  ;;  %1616 = vmatpush.msra.mxu3 %v541_v48  ;;  %v61_v36 = vld [vmem:[#allocation5 + $0x58] sm:$0xff] }
 0x138   :  { %1550 = vmatmul.f32.vlgmr.msrb.gmra.mxu3 %v2563_v55  ;;  %1577 = vmatpush.msra.mxu1 %v277_v51  ;;  %v197_v37 = vld [vmem:[#allocation5 + $0x498] sm:$0xff] }
 0x139   :  { %1598 = vmatpush.msra.mxu2 %v397_v52  ;;  %1617 = vmatpush.msra.mxu3 %v533_v54  ;;  %v317_v38 = vld [vmem:[#allocation5 + $0x858] sm:$0xff] }
 0x13a   :  { %1510 = vmatmul.f32.vlgmr.msrb.gmra.mxu1 %v2566_v61  ;;  %1559 = vmatpush.msra.mxu0 %v133_v56  ;;  %v453_v40 = vld [vmem:[#allocation5 + $0xc98] sm:$0xff] }
 0x13b   :  { %1578 = vmatpush.msra.mxu1 %v269_v57  ;;  %1599 = vmatpush.msra.mxu2 %v389_v59  ;;  %v53_v41 = vld [vmem:[#allocation5 + $0x18] sm:$0xff] }
 0x13c   :  { %1618 = vmatpush.msra.mxu3 %v525_v60  ;;  %1560 = vmatpush.msra.mxu0 %v125_v62  ;;  %v189_v14 = vld [vmem:[#allocation5 + $0x458] sm:$0xff] }
 0x13d   :  { %1579 = vmatpush.msra.mxu1 %v261_v1  ;;  %1600 = vmatpush.msra.mxu2 %v381_v2  ;;  %v309_v42 = vld [vmem:[#allocation5 + $0x818] sm:$0xff] }
 0x13e   :  { %1619 = vmatpush.msra.mxu3 %v517_v3  ;;  %1561 = vmatpush.msra.mxu0 %v117_v4  ;;  %v445_v43 = vld [vmem:[#allocation5 + $0xc58] sm:$0xff] }
 0x13f   :  { %1580 = vmatpush.msra.mxu1 %v253_v6  ;;  %1601 = vmatpush.msra.mxu2 %v373_v7  ;;  %v685_v44 = vld [vmem:[#allocation5 + $0x13d8] sm:$0xff] }
 0x140   :  { %1620 = vmatpush.msra.mxu3 %v509_v8  ;;  %1562 = vmatpush.msra.mxu0 %v109_v9  ;;  %v941_v19 = vld [vmem:[#allocation5 + $0x1bd8] sm:$0xff] }
 0x141   :  { %1581 = vmatpush.msra.mxu1 %v245_v10  ;;  %1602 = vmatpush.msra.mxu2 %v365_v11  ;;  %v181_v20 = vld [vmem:[#allocation5 + $0x418] sm:$0xff] }
 0x142   :  { %1621 = vmatpush.msra.mxu3 %v501_v12  ;;  %1563 = vmatpush.msra.mxu0 %v101_v13  ;;  %v437_v45 = vld [vmem:[#allocation5 + $0xc18] sm:$0xff] }
 0x143   :  { %1582 = vmatpush.msra.mxu1 %v237_v15  ;;  %1603 = vmatpush.msra.mxu2 %v357_v16  ;;  %v677_v46 = vld [vmem:[#allocation5 + $0x1398] sm:$0xff] }
 0x144   :  { %1622 = vmatpush.msra.mxu3 %v493_v17  ;;  %1564 = vmatpush.msra.mxu0 %v93_v18  ;;  %v813_v47 = vld [vmem:[#allocation5 + $0x17d8] sm:$0xff] }
 0x145   :  { %1583 = vmatpush.msra.mxu1 %v229_v21  ;;  %1604 = vmatpush.msra.mxu2 %v349_v22  ;;  %v933_v48 = vld [vmem:[#allocation5 + $0x1b98] sm:$0xff] }
 0x146   :  { %1623 = vmatpush.msra.mxu3 %v485_v23  ;;  %1565 = vmatpush.msra.mxu0 %v85_v24  ;;  %v1069_v25 = vld [vmem:[#allocation5 + $0x1fd8] sm:$0xff] }
 0x147   :  { %1584 = vmatpush.msra.mxu1 %v221_v26  ;;  %1605 = vmatpush.msra.mxu2 %v341_v27  ;;  %v669_v50 = vld [vmem:[#allocation5 + $0x1358] sm:$0xff] }
 0x148   :  { %1624 = vmatpush.msra.mxu3 %v477_v28  ;;  %1566 = vmatpush.msra.mxu0 %v77_v58  ;;  %v805_v51 = vld [vmem:[#allocation5 + $0x1798] sm:$0xff] }
 0x149   :  { %1585 = vmatpush.msra.mxu1 %v213_v30  ;;  %1606 = vmatpush.msra.mxu2 %v333_v31  ;;  %v925_v52 = vld [vmem:[#allocation5 + $0x1b58] sm:$0xff] }
 0x14a   :  { %1625 = vmatpush.msra.mxu3 %v469_v32  ;;  %1567 = vmatpush.msra.mxu0 %v69_v0  ;;  %v1061_v54 = vld [vmem:[#allocation5 + $0x1f98] sm:$0xff] }
 0x14b   :  { %1586 = vmatpush.msra.mxu1 %v205_v33  ;;  %1607 = vmatpush.msra.mxu2 %v325_v5  ;;  %v661_v56 = vld [vmem:[#allocation5 + $0x1318] sm:$0xff] }
 0x14c   :  { %1626 = vmatpush.msra.mxu3 %v461_v35  ;;  %1568 = vmatpush.msra.mxu0 %v61_v36  ;;  %v797_v57 = vld [vmem:[#allocation5 + $0x1758] sm:$0xff] }
 0x14d   :  { %1587 = vmatpush.msra.mxu1 %v197_v37  ;;  %1608 = vmatpush.msra.mxu2 %v317_v38  ;;  %v917_v59 = vld [vmem:[#allocation5 + $0x1b18] sm:$0xff]  ;;  %v1251_v38 = vpop.f32.mrf.mxu0 }
 0x14e   :  { %1627 = vmatpush.msra.mxu3 %v453_v40  ;;  %1569 = vmatpush.msra.mxu0 %v53_v41  ;;  %v1053_v60 = vld [vmem:[#allocation5 + $0x1f58] sm:$0xff] }
 0x14f   :  { %1588 = vmatpush.msra.mxu1 %v189_v14  ;;  %1609 = vmatpush.msra.mxu2 %v309_v42  ;;  %v653_v62 = vld [vmem:[#allocation5 + $0x12d8] sm:$0xff] }
 0x150   :  { %1628 = vmatpush.msra.mxu3 %v445_v43  ;;  %1634 = vmatpush.msrb.mxu0 %v685_v44  ;;  %v789_v1 = vld [vmem:[#allocation5 + $0x1718] sm:$0xff] }
 0x151   :  { %1674 = vmatpush.msrb.mxu2 %v941_v19  ;;  %1589 = vmatpush.msra.mxu1 %v181_v20  ;;  %v909_v2 = vld [vmem:[#allocation5 + $0x1ad8] sm:$0xff]  ;;  %v1271_v19 = vpop.f32.mrf.mxu1 }
 0x152   :  { %1629 = vmatpush.msra.mxu3 %v437_v45  ;;  %1635 = vmatpush.msrb.mxu0 %v677_v46  ;;  %v1045_v3 = vld [vmem:[#allocation5 + $0x1f18] sm:$0xff]  ;;  %v1272_v46 = vadd.f32 %v1271_v19, %v1251_v38  ;;  %v502_v38 = vld [vmem:[#allocation5 + $0xe20] sm:$0xff] }
 0x153   :  { %1654 = vmatpush.msrb.mxu1 %v813_v47  ;;  %1675 = vmatpush.msrb.mxu2 %v933_v48  ;;  %v645_v4 = vld [vmem:[#allocation5 + $0x1298] sm:$0xff]  ;;  %v1291_v47 = vpop.f32.mrf.mxu2  ;;  %v350_v19 = vld [vmem:[#allocation5 + $0x960] sm:$0xff] }
 0x154   :  { %1694 = vmatpush.msrb.mxu3 %v1069_v25  ;;  %1636 = vmatpush.msrb.mxu0 %v669_v50  ;;  %v781_v6 = vld [vmem:[#allocation5 + $0x16d8] sm:$0xff] }
 0x155   :  { %1655 = vmatpush.msrb.mxu1 %v805_v51  ;;  %1676 = vmatpush.msrb.mxu2 %v925_v52  ;;  %v901_v7 = vld [vmem:[#allocation5 + $0x1a98] sm:$0xff]  ;;  %v1292_v51 = vadd.f32 %v1291_v47, %v1272_v46  ;;  %v222_v46 = vld [vmem:[#allocation5 + $0x560] sm:$0xff] }
 0x156   :  { %1695 = vmatpush.msrb.mxu3 %v1061_v54  ;;  %1637 = vmatpush.msrb.mxu0 %v661_v56  ;;  %v1037_v8 = vld [vmem:[#allocation5 + $0x1ed8] sm:$0xff]  ;;  %v1311_v56 = vpop.f32.mrf.mxu3  ;;  %v342_v47 = vld [vmem:[#allocation5 + $0x920] sm:$0xff] }
 0x157   :  { %1656 = vmatpush.msrb.mxu1 %v797_v57  ;;  %1677 = vmatpush.msrb.mxu2 %v917_v59  ;;  %v637_v9 = vld [vmem:[#allocation5 + $0x1258] sm:$0xff]  ;;  %v1312_v59 = vadd.f32 %v1311_v56, %v1292_v51  ;;  %v334_v51 = vld [vmem:[#allocation5 + $0x8e0] sm:$0xff] }
 0x158   :  { %1696 = vmatpush.msrb.mxu3 %v1053_v60  ;;  %1638 = vmatpush.msrb.mxu0 %v653_v62  ;;  %v773_v10 = vld [vmem:[#allocation5 + $0x1698] sm:$0xff]  ;;  %v174_v60 = vld [vmem:[#allocation5 + $0x3e0] sm:$0xff] }
 0x159   :  { %1657 = vmatpush.msrb.mxu1 %v789_v1  ;;  %1678 = vmatpush.msrb.mxu2 %v909_v2  ;;  %v893_v11 = vld [vmem:[#allocation5 + $0x1a58] sm:$0xff]  ;;  %v430_v62 = vld [vmem:[#allocation5 + $0xbe0] sm:$0xff]  ;;  %v1331_v2 = vpop.f32.mrf.mxu0 }
 0x15a   :  { %1697 = vmatpush.msrb.mxu3 %v1045_v3  ;;  %1639 = vmatpush.msrb.mxu0 %v645_v4  ;;  %v1029_v12 = vld [vmem:[#allocation5 + $0x1e98] sm:$0xff]  ;;  %v1332_v4 = vadd.f32 %v1331_v2, %v1312_v59  ;;  %v206_v56 = vld [vmem:[#allocation5 + $0x4e0] sm:$0xff] }
 0x15b   :  { %1658 = vmatpush.msrb.mxu1 %v781_v6  ;;  %1679 = vmatpush.msrb.mxu2 %v901_v7  ;;  %v629_v13 = vld [vmem:[#allocation5 + $0x1218] sm:$0xff]  ;;  %v166_v6 = vld [vmem:[#allocation5 + $0x3a0] sm:$0xff] }
 0x15c   :  { %1698 = vmatpush.msrb.mxu3 %v1037_v8  ;;  %v765_v15 = vld [vmem:[#allocation5 + $0x1658] sm:$0xff]  ;;  %1640 = vmatpush.msrb.mxu0 %v637_v9  ;;  %v302_v7 = vld [vmem:[#allocation5 + $0x7e0] sm:$0xff]  ;;  %v1351_v9 = vpop.f32.mrf.mxu1 }
 0x15d   :  { %1659 = vmatpush.msrb.mxu1 %v773_v10  ;;  %v885_v16 = vld [vmem:[#allocation5 + $0x1a18] sm:$0xff]  ;;  %1680 = vmatpush.msrb.mxu2 %v893_v11  ;;  %v558_v8 = vld [vmem:[#allocation5 + $0xfe0] sm:$0xff] }
 0x15e   :  { %v1021_v17 = vld [vmem:[#allocation5 + $0x1e58] sm:$0xff]  ;;  %1699 = vmatpush.msrb.mxu3 %v1029_v12  ;;  %1641 = vmatpush.msrb.mxu0 %v629_v13  ;;  %v158_v10 = vld [vmem:[#allocation5 + $0x360] sm:$0xff]  ;;  %v1352_v12 = vadd.f32 %v1351_v9, %v1332_v4  ;;  %v1371_v13 = vpop.f32.mrf.mxu2 }
 0x15f   :  { %v621_v18 = vld [vmem:[#allocation5 + $0x11d8] sm:$0xff]  ;;  %1660 = vmatpush.msrb.mxu1 %v765_v15  ;;  %1681 = vmatpush.msrb.mxu2 %v885_v16  ;;  %v294_v11 = vld [vmem:[#allocation5 + $0x7a0] sm:$0xff] }
 0x160   :  { %v757_v21 = vld [vmem:[#allocation5 + $0x1618] sm:$0xff]  ;;  %1700 = vmatpush.msrb.mxu3 %v1021_v17  ;;  %1642 = vmatpush.msrb.mxu0 %v621_v18  ;;  %v550_v15 = vld [vmem:[#allocation5 + $0xfa0] sm:$0xff]  ;;  %v1372_v16 = vadd.f32 %v1371_v13, %v1352_v12 }
 0x161   :  { %v877_v22 = vld [vmem:[#allocation5 + $0x19d8] sm:$0xff]  ;;  %1661 = vmatpush.msrb.mxu1 %v757_v21  ;;  %1610 = vmatmul.f32.vlgmr.msra.gmra.mxu2 %v2545_v29  ;;  %v422_v29 = vld [vmem:[#allocation5 + $0xba0] sm:$0xff]  ;;  %v1391_v21 = vpop.f32.mrf.mxu3 }
 0x162   :  { %v1013_v23 = vld [vmem:[#allocation5 + $0x1e18] sm:$0xff]  ;;  %1682 = vmatpush.msrb.mxu2 %v877_v22  ;;  %1570 = vmatmul.f32.vlgmr.msra.gmra.mxu0 %v2548_v63  ;;  %v414_v63 = vld [vmem:[#allocation5 + $0xb60] sm:$0xff]  ;;  %v1392_v22 = vadd.f32 %v1391_v21, %v1372_v16 }
 0x163   :  { %v613_v24 = vld [vmem:[#allocation5 + $0x1198] sm:$0xff]  ;;  %1701 = vmatpush.msrb.mxu3 %v1013_v23  ;;  %1590 = vmatmul.f32.vlgmr.msra.gmra.mxu1 %v2554_v39  ;;  %v286_v17 = vld [vmem:[#allocation5 + $0x760] sm:$0xff] }
 0x164   :  { %v749_v26 = vld [vmem:[#allocation5 + $0x15d8] sm:$0xff]  ;;  %1643 = vmatpush.msrb.mxu0 %v613_v24  ;;  %1630 = vmatmul.f32.vlgmr.msra.gmra.mxu3 %v2551_v34  ;;  %v150_v34 = vld [vmem:[#allocation5 + $0x320] sm:$0xff]  ;;  %2355 = vst [vmem:[#allocation7 + $0x8] sm:$0xff] %v1392_v22 }
 0x165   :  { %v869_v27 = vld [vmem:[#allocation5 + $0x1998] sm:$0xff]  ;;  %1662 = vmatpush.msrb.mxu1 %v749_v26  ;;  %v406_v18 = vld [vmem:[#allocation5 + $0xb20] sm:$0xff] }
 0x166   :  { %v1005_v28 = vld [vmem:[#allocation5 + $0x1dd8] sm:$0xff]  ;;  %1683 = vmatpush.msrb.mxu2 %v869_v27  ;;  %v542_v39 = vld [vmem:[#allocation5 + $0xf60] sm:$0xff] }
 0x167   :  { %v605_v58 = vld [vmem:[#allocation5 + $0x1158] sm:$0xff]  ;;  %1702 = vmatpush.msrb.mxu3 %v1005_v28  ;;  %v142_v23 = vld [vmem:[#allocation5 + $0x2e0] sm:$0xff] }
 0x168   :  { %v741_v30 = vld [vmem:[#allocation5 + $0x1598] sm:$0xff]  ;;  %1644 = vmatpush.msrb.mxu0 %v605_v58  ;;  %v278_v24 = vld [vmem:[#allocation5 + $0x720] sm:$0xff] }
 0x169   :  { %v861_v31 = vld [vmem:[#allocation5 + $0x1958] sm:$0xff]  ;;  %1663 = vmatpush.msrb.mxu1 %v741_v30  ;;  %v398_v26 = vld [vmem:[#allocation5 + $0xae0] sm:$0xff] }
 0x16a   :  { %v997_v32 = vld [vmem:[#allocation5 + $0x1d98] sm:$0xff]  ;;  %1684 = vmatpush.msrb.mxu2 %v861_v31  ;;  %v534_v27 = vld [vmem:[#allocation5 + $0xf20] sm:$0xff] }
 0x16b   :  { %v597_v0 = vld [vmem:[#allocation5 + $0x1118] sm:$0xff]  ;;  %1703 = vmatpush.msrb.mxu3 %v997_v32  ;;  %v134_v28 = vld [vmem:[#allocation5 + $0x2a0] sm:$0xff] }
 0x16c   :  { %v733_v33 = vld [vmem:[#allocation5 + $0x1558] sm:$0xff]  ;;  %1645 = vmatpush.msrb.mxu0 %v597_v0  ;;  %v270_v58 = vld [vmem:[#allocation5 + $0x6e0] sm:$0xff] }
 0x16d   :  { %v853_v5 = vld [vmem:[#allocation5 + $0x1918] sm:$0xff]  ;;  %1664 = vmatpush.msrb.mxu1 %v733_v33  ;;  %v390_v30 = vld [vmem:[#allocation5 + $0xaa0] sm:$0xff] }
 0x16e   :  { %v989_v35 = vld [vmem:[#allocation5 + $0x1d58] sm:$0xff]  ;;  %1685 = vmatpush.msrb.mxu2 %v853_v5  ;;  %v126_v31 = vld [vmem:[#allocation5 + $0x260] sm:$0xff] }
 0x16f   :  { %v589_v36 = vld [vmem:[#allocation5 + $0x10d8] sm:$0xff]  ;;  %1704 = vmatpush.msrb.mxu3 %v989_v35  ;;  %v262_v32 = vld [vmem:[#allocation5 + $0x6a0] sm:$0xff] }
 0x170   :  { %v725_v37 = vld [vmem:[#allocation5 + $0x1518] sm:$0xff]  ;;  %1646 = vmatpush.msrb.mxu0 %v589_v36  ;;  %v382_v0 = vld [vmem:[#allocation5 + $0xa60] sm:$0xff] }
 0x171   :  { %v845_v40 = vld [vmem:[#allocation5 + $0x18d8] sm:$0xff]  ;;  %1665 = vmatpush.msrb.mxu1 %v725_v37  ;;  %v518_v33 = vld [vmem:[#allocation5 + $0xea0] sm:$0xff] }
 0x172   :  { %v981_v41 = vld [vmem:[#allocation5 + $0x1d18] sm:$0xff]  ;;  %1686 = vmatpush.msrb.mxu2 %v845_v40  ;;  %v374_v5 = vld [vmem:[#allocation5 + $0xa20] sm:$0xff] }
 0x173   :  { %v581_v14 = vld [vmem:[#allocation5 + $0x1098] sm:$0xff]  ;;  %1705 = vmatpush.msrb.mxu3 %v981_v41  ;;  %v510_v35 = vld [vmem:[#allocation5 + $0xe60] sm:$0xff] }
 0x174   :  { %v717_v42 = vld [vmem:[#allocation5 + $0x14d8] sm:$0xff]  ;;  %1647 = vmatpush.msrb.mxu0 %v581_v14  ;;  %v110_v36 = vld [vmem:[#allocation5 + $0x1e0] sm:$0xff] }
 0x175   :  { %v837_v43 = vld [vmem:[#allocation5 + $0x1898] sm:$0xff]  ;;  %1666 = vmatpush.msrb.mxu1 %v717_v42  ;;  %v246_v37 = vld [vmem:[#allocation5 + $0x620] sm:$0xff] }
 0x176   :  { %v973_v44 = vld [vmem:[#allocation5 + $0x1cd8] sm:$0xff]  ;;  %1687 = vmatpush.msrb.mxu2 %v837_v43  ;;  %v102_v40 = vld [vmem:[#allocation5 + $0x1a0] sm:$0xff] }
 0x177   :  { %v573_v20 = vld [vmem:[#allocation5 + $0x1058] sm:$0xff]  ;;  %1706 = vmatpush.msrb.mxu3 %v973_v44  ;;  %v238_v41 = vld [vmem:[#allocation5 + $0x5e0] sm:$0xff] }
 0x178   :  { %v709_v45 = vld [vmem:[#allocation5 + $0x1498] sm:$0xff]  ;;  %1648 = vmatpush.msrb.mxu0 %v573_v20  ;;  %v358_v14 = vld [vmem:[#allocation5 + $0x9a0] sm:$0xff] }
 0x179   :  { %v829_v48 = vld [vmem:[#allocation5 + $0x1858] sm:$0xff]  ;;  %1667 = vmatpush.msrb.mxu1 %v709_v45  ;;  %v494_v42 = vld [vmem:[#allocation5 + $0xde0] sm:$0xff] }
 0x17a   :  { %v965_v25 = vld [vmem:[#allocation5 + $0x1c98] sm:$0xff]  ;;  %1688 = vmatpush.msrb.mxu2 %v829_v48  ;;  %v94_v43 = vld [vmem:[#allocation5 + $0x160] sm:$0xff] }
 0x17b   :  { %v565_v50 = vld [vmem:[#allocation5 + $0x1018] sm:$0xff]  ;;  %1707 = vmatpush.msrb.mxu3 %v965_v25  ;;  %v230_v44 = vld [vmem:[#allocation5 + $0x5a0] sm:$0xff] }
 0x17c   :  { %v701_v52 = vld [vmem:[#allocation5 + $0x1458] sm:$0xff]  ;;  %1649 = vmatpush.msrb.mxu0 %v565_v50  ;;  %v486_v20 = vld [vmem:[#allocation5 + $0xda0] sm:$0xff] }
 0x17d   :  { %v821_v54 = vld [vmem:[#allocation5 + $0x1818] sm:$0xff]  ;;  %1668 = vmatpush.msrb.mxu1 %v701_v52  ;;  %1650 = vmatmul.f32.vlgmr.msrb.gmra.mxu0 %v2560_v53  ;;  %v118_v53 = vld [vmem:[#allocation5 + $0x220] sm:$0xff] }
 0x17e   :  { %v957_v57 = vld [vmem:[#allocation5 + $0x1c58] sm:$0xff]  ;;  %1689 = vmatpush.msrb.mxu2 %v821_v54  ;;  %1714 = vmatpush.msra.mxu0 %v174_v60  ;;  %v86_v45 = vld [vmem:[#allocation5 + $0x120] sm:$0xff] }
 0x17f   :  { %v693_v1 = vld [vmem:[#allocation5 + $0x1418] sm:$0xff]  ;;  %1708 = vmatpush.msrb.mxu3 %v957_v57  ;;  %1690 = vmatmul.f32.vlgmr.msrb.gmra.mxu2 %v2557_v49  ;;  %v526_v49 = vld [vmem:[#allocation5 + $0xee0] sm:$0xff] }
 0x180   :  { %v949_v3 = vld [vmem:[#allocation5 + $0x1c18] sm:$0xff]  ;;  %1754 = vmatpush.msra.mxu2 %v430_v62  ;;  %1669 = vmatpush.msrb.mxu1 %v693_v1  ;;  %v478_v48 = vld [vmem:[#allocation5 + $0xd60] sm:$0xff] }
 0x181   :  { %1709 = vmatpush.msrb.mxu3 %v949_v3  ;;  %1715 = vmatpush.msra.mxu0 %v166_v6  ;;  %v78_v25 = vld [vmem:[#allocation5 + $0xe0] sm:$0xff] }
 0x182   :  { %1734 = vmatpush.msra.mxu1 %v302_v7  ;;  %1755 = vmatpush.msra.mxu2 %v422_v29  ;;  %v214_v50 = vld [vmem:[#allocation5 + $0x520] sm:$0xff] }
 0x183   :  { %1774 = vmatpush.msra.mxu3 %v558_v8  ;;  %1716 = vmatpush.msra.mxu0 %v158_v10  ;;  %v470_v52 = vld [vmem:[#allocation5 + $0xd20] sm:$0xff] }
 0x184   :  { %1735 = vmatpush.msra.mxu1 %v294_v11  ;;  %1756 = vmatpush.msra.mxu2 %v414_v63  ;;  %v70_v54 = vld [vmem:[#allocation5 + $0xa0] sm:$0xff] }
 0x185   :  { %1775 = vmatpush.msra.mxu3 %v550_v15  ;;  %1717 = vmatpush.msra.mxu0 %v150_v34  ;;  %v326_v57 = vld [vmem:[#allocation5 + $0x8a0] sm:$0xff] }
 0x186   :  { %1736 = vmatpush.msra.mxu1 %v286_v17  ;;  %1757 = vmatpush.msra.mxu2 %v406_v18  ;;  %v462_v59 = vld [vmem:[#allocation5 + $0xce0] sm:$0xff] }
 0x187   :  { %1776 = vmatpush.msra.mxu3 %v542_v39  ;;  %1718 = vmatpush.msra.mxu0 %v142_v23  ;;  %v62_v60 = vld [vmem:[#allocation5 + $0x60] sm:$0xff] }
 0x188   :  { %1710 = vmatmul.f32.vlgmr.msrb.gmra.mxu3 %v2563_v55  ;;  %1737 = vmatpush.msra.mxu1 %v278_v24  ;;  %v254_v55 = vld [vmem:[#allocation5 + $0x660] sm:$0xff] }
 0x189   :  { %1758 = vmatpush.msra.mxu2 %v398_v26  ;;  %1777 = vmatpush.msra.mxu3 %v534_v27  ;;  %v198_v62 = vld [vmem:[#allocation5 + $0x4a0] sm:$0xff] }
 0x18a   :  { %1670 = vmatmul.f32.vlgmr.msrb.gmra.mxu1 %v2566_v61  ;;  %1719 = vmatpush.msra.mxu0 %v134_v28  ;;  %v366_v61 = vld [vmem:[#allocation5 + $0x9e0] sm:$0xff] }
 0x18b   :  { %1738 = vmatpush.msra.mxu1 %v270_v58  ;;  %1759 = vmatpush.msra.mxu2 %v390_v30  ;;  %v318_v1 = vld [vmem:[#allocation5 + $0x860] sm:$0xff] }
 0x18c   :  { %1778 = vmatpush.msra.mxu3 %v526_v49  ;;  %1720 = vmatpush.msra.mxu0 %v126_v31  ;;  %v454_v2 = vld [vmem:[#allocation5 + $0xca0] sm:$0xff] }
 0x18d   :  { %1739 = vmatpush.msra.mxu1 %v262_v32  ;;  %1760 = vmatpush.msra.mxu2 %v382_v0  ;;  %v54_v3 = vld [vmem:[#allocation5 + $0x20] sm:$0xff] }
 0x18e   :  { %1779 = vmatpush.msra.mxu3 %v518_v33  ;;  %1721 = vmatpush.msra.mxu0 %v118_v53  ;;  %v190_v4 = vld [vmem:[#allocation5 + $0x460] sm:$0xff] }
 0x18f   :  { %1740 = vmatpush.msra.mxu1 %v254_v55  ;;  %1761 = vmatpush.msra.mxu2 %v374_v5  ;;  %v310_v6 = vld [vmem:[#allocation5 + $0x820] sm:$0xff] }
 0x190   :  { %1780 = vmatpush.msra.mxu3 %v510_v35  ;;  %1722 = vmatpush.msra.mxu0 %v110_v36  ;;  %v446_v7 = vld [vmem:[#allocation5 + $0xc60] sm:$0xff] }
 0x191   :  { %1741 = vmatpush.msra.mxu1 %v246_v37  ;;  %1762 = vmatpush.msra.mxu2 %v366_v61  ;;  %v686_v29 = vld [vmem:[#allocation5 + $0x13e0] sm:$0xff] }
 0x192   :  { %1781 = vmatpush.msra.mxu3 %v502_v38  ;;  %1723 = vmatpush.msra.mxu0 %v102_v40  ;;  %v942_v8 = vld [vmem:[#allocation5 + $0x1be0] sm:$0xff] }
 0x193   :  { %1742 = vmatpush.msra.mxu1 %v238_v41  ;;  %1763 = vmatpush.msra.mxu2 %v358_v14  ;;  %v182_v9 = vld [vmem:[#allocation5 + $0x420] sm:$0xff] }
 0x194   :  { %1782 = vmatpush.msra.mxu3 %v494_v42  ;;  %1724 = vmatpush.msra.mxu0 %v94_v43  ;;  %v438_v10 = vld [vmem:[#allocation5 + $0xc20] sm:$0xff] }
 0x195   :  { %1743 = vmatpush.msra.mxu1 %v230_v44  ;;  %1764 = vmatpush.msra.mxu2 %v350_v19  ;;  %v678_v11 = vld [vmem:[#allocation5 + $0x13a0] sm:$0xff] }
 0x196   :  { %1783 = vmatpush.msra.mxu3 %v486_v20  ;;  %1725 = vmatpush.msra.mxu0 %v86_v45  ;;  %v814_v12 = vld [vmem:[#allocation5 + $0x17e0] sm:$0xff] }
 0x197   :  { %1744 = vmatpush.msra.mxu1 %v222_v46  ;;  %1765 = vmatpush.msra.mxu2 %v342_v47  ;;  %v934_v13 = vld [vmem:[#allocation5 + $0x1ba0] sm:$0xff] }
 0x198   :  { %1784 = vmatpush.msra.mxu3 %v478_v48  ;;  %1726 = vmatpush.msra.mxu0 %v78_v25  ;;  %v1070_v63 = vld [vmem:[#allocation5 + $0x1fe0] sm:$0xff] }
 0x199   :  { %1745 = vmatpush.msra.mxu1 %v214_v50  ;;  %1766 = vmatpush.msra.mxu2 %v334_v51  ;;  %v670_v15 = vld [vmem:[#allocation5 + $0x1360] sm:$0xff]  ;;  %v1411_v51 = vpop.f32.mrf.mxu0 }
 0x19a   :  { %1785 = vmatpush.msra.mxu3 %v470_v52  ;;  %1727 = vmatpush.msra.mxu0 %v70_v54  ;;  %v806_v34 = vld [vmem:[#allocation5 + $0x17a0] sm:$0xff] }
 0x19b   :  { %1746 = vmatpush.msra.mxu1 %v206_v56  ;;  %1767 = vmatpush.msra.mxu2 %v326_v57  ;;  %v926_v16 = vld [vmem:[#allocation5 + $0x1b60] sm:$0xff] }
 0x19c   :  { %1786 = vmatpush.msra.mxu3 %v462_v59  ;;  %1728 = vmatpush.msra.mxu0 %v62_v60  ;;  %v1062_v17 = vld [vmem:[#allocation5 + $0x1fa0] sm:$0xff] }
 0x19d   :  { %1747 = vmatpush.msra.mxu1 %v198_v62  ;;  %1768 = vmatpush.msra.mxu2 %v318_v1  ;;  %v662_v18 = vld [vmem:[#allocation5 + $0x1320] sm:$0xff]  ;;  %v1431_v62 = vpop.f32.mrf.mxu1 }
 0x19e   :  { %1787 = vmatpush.msra.mxu3 %v454_v2  ;;  %1729 = vmatpush.msra.mxu0 %v54_v3  ;;  %v798_v21 = vld [vmem:[#allocation5 + $0x1760] sm:$0xff]  ;;  %v1432_v3 = vadd.f32 %v1431_v62, %v1411_v51  ;;  %v519_v51 = vld [vmem:[#allocation5 + $0xea8] sm:$0xff] }
 0x19f   :  { %1748 = vmatpush.msra.mxu1 %v190_v4  ;;  %1769 = vmatpush.msra.mxu2 %v310_v6  ;;  %v918_v39 = vld [vmem:[#allocation5 + $0x1b20] sm:$0xff]  ;;  %v367_v62 = vld [vmem:[#allocation5 + $0x9e8] sm:$0xff] }
 0x1a0   :  { %1788 = vmatpush.msra.mxu3 %v446_v7  ;;  %1794 = vmatpush.msrb.mxu0 %v686_v29  ;;  %v1054_v22 = vld [vmem:[#allocation5 + $0x1f60] sm:$0xff] }
 0x1a1   :  { %1834 = vmatpush.msrb.mxu2 %v942_v8  ;;  %1749 = vmatpush.msra.mxu1 %v182_v9  ;;  %v654_v23 = vld [vmem:[#allocation5 + $0x12e0] sm:$0xff] }
 0x1a2   :  { %1789 = vmatpush.msra.mxu3 %v438_v10  ;;  %1795 = vmatpush.msrb.mxu0 %v678_v11  ;;  %v790_v24 = vld [vmem:[#allocation5 + $0x1720] sm:$0xff]  ;;  %v1471_v11 = vpop.f32.mrf.mxu3 }
 0x1a3   :  { %1814 = vmatpush.msrb.mxu1 %v814_v12  ;;  %1835 = vmatpush.msrb.mxu2 %v934_v13  ;;  %v910_v26 = vld [vmem:[#allocation5 + $0x1ae0] sm:$0xff] }
 0x1a4   :  { %1854 = vmatpush.msrb.mxu3 %v1070_v63  ;;  %1796 = vmatpush.msrb.mxu0 %v670_v15  ;;  %v1046_v27 = vld [vmem:[#allocation5 + $0x1f20] sm:$0xff]  ;;  %v2577_v63 = vld [vmem:[#allocation2 + $0x10] sm:$0xff]  ;;  %v175_v15 = vld [vmem:[#allocation5 + $0x3e8] sm:$0xff] }
 0x1a5   :  { %1815 = vmatpush.msrb.mxu1 %v806_v34  ;;  %1836 = vmatpush.msrb.mxu2 %v926_v16  ;;  %v646_v28 = vld [vmem:[#allocation5 + $0x12a0] sm:$0xff]  ;;  %v431_v34 = vld [vmem:[#allocation5 + $0xbe8] sm:$0xff] }
 0x1a6   :  { %1855 = vmatpush.msrb.mxu3 %v1062_v17  ;;  %1797 = vmatpush.msrb.mxu0 %v662_v18  ;;  %v782_v58 = vld [vmem:[#allocation5 + $0x16e0] sm:$0xff] }
 0x1a7   :  { %1816 = vmatpush.msrb.mxu1 %v798_v21  ;;  %1837 = vmatpush.msrb.mxu2 %v918_v39  ;;  %v902_v30 = vld [vmem:[#allocation5 + $0x1aa0] sm:$0xff] }
 0x1a8   :  { %1856 = vmatpush.msrb.mxu3 %v1054_v22  ;;  %1798 = vmatpush.msrb.mxu0 %v654_v23  ;;  %v1038_v49 = vld [vmem:[#allocation5 + $0x1ee0] sm:$0xff]  ;;  %v2583_v22 = vld [vmem:[#allocation2 + $0x18] sm:$0xff]  ;;  %v167_v23 = vld [vmem:[#allocation5 + $0x3a8] sm:$0xff] }
 0x1a9   :  { %1817 = vmatpush.msrb.mxu1 %v790_v24  ;;  %1838 = vmatpush.msrb.mxu2 %v910_v26  ;;  %v638_v31 = vld [vmem:[#allocation5 + $0x1260] sm:$0xff]  ;;  %v1491_v17 = vpop.f32.mrf.mxu0  ;;  %v303_v24 = vld [vmem:[#allocation5 + $0x7e8] sm:$0xff] }
 0x1aa   :  { %1857 = vmatpush.msrb.mxu3 %v1046_v27  ;;  %v774_v32 = vld [vmem:[#allocation5 + $0x16a0] sm:$0xff]  ;;  %1799 = vmatpush.msrb.mxu0 %v646_v28  ;;  %v423_v26 = vld [vmem:[#allocation5 + $0xba8] sm:$0xff] }
 0x1ab   :  { %1818 = vmatpush.msrb.mxu1 %v782_v58  ;;  %v894_v0 = vld [vmem:[#allocation5 + $0x1a60] sm:$0xff]  ;;  %1839 = vmatpush.msrb.mxu2 %v902_v30  ;;  %v559_v27 = vld [vmem:[#allocation5 + $0xfe8] sm:$0xff] }
 0x1ac   :  { %v1030_v33 = vld [vmem:[#allocation5 + $0x1ea0] sm:$0xff]  ;;  %1858 = vmatpush.msrb.mxu3 %v1038_v49  ;;  %1800 = vmatpush.msrb.mxu0 %v638_v31  ;;  %v2586_v58 = vld [vmem:[#allocation2 + $0x8] sm:$0xff] }
 0x1ad   :  { %v630_v53 = vld [vmem:[#allocation5 + $0x1220] sm:$0xff]  ;;  %1819 = vmatpush.msrb.mxu1 %v774_v32  ;;  %1840 = vmatpush.msrb.mxu2 %v894_v0  ;;  %v159_v30 = vld [vmem:[#allocation5 + $0x368] sm:$0xff] }
 0x1ae   :  { %v766_v55 = vld [vmem:[#allocation5 + $0x1660] sm:$0xff]  ;;  %1859 = vmatpush.msrb.mxu3 %v1030_v33  ;;  %1801 = vmatpush.msrb.mxu0 %v630_v53  ;;  %v295_v49 = vld [vmem:[#allocation5 + $0x7a8] sm:$0xff] }
 0x1af   :  { %v886_v5 = vld [vmem:[#allocation5 + $0x1a20] sm:$0xff]  ;;  %1820 = vmatpush.msrb.mxu1 %v766_v55  ;;  %1770 = vmatmul.f32.vlgmr.msra.gmra.mxu2 %v2577_v63  ;;  %v415_v0 = vld [vmem:[#allocation5 + $0xb68] sm:$0xff] }
 0x1b0   :  { %v1022_v35 = vld [vmem:[#allocation5 + $0x1e60] sm:$0xff]  ;;  %1841 = vmatpush.msrb.mxu2 %v886_v5  ;;  %1790 = vmatmul.f32.vlgmr.msra.gmra.mxu3 %v2583_v22  ;;  %v551_v33 = vld [vmem:[#allocation5 + $0xfa8] sm:$0xff] }
 0x1b1   :  { %v622_v36 = vld [vmem:[#allocation5 + $0x11e0] sm:$0xff]  ;;  %1860 = vmatpush.msrb.mxu3 %v1022_v35  ;;  %1750 = vmatmul.f32.vlgmr.msra.gmra.mxu1 %v2586_v58  ;;  %v151_v53 = vld [vmem:[#allocation5 + $0x328] sm:$0xff] }
 0x1b2   :  { %v758_v37 = vld [vmem:[#allocation5 + $0x1620] sm:$0xff]  ;;  %1802 = vmatpush.msrb.mxu0 %v622_v36  ;;  %v1451_v4 = vpop.f32.mrf.mxu2  ;;  %v287_v5 = vld [vmem:[#allocation5 + $0x768] sm:$0xff] }
 0x1b3   :  { %v878_v61 = vld [vmem:[#allocation5 + $0x19e0] sm:$0xff]  ;;  %1821 = vmatpush.msrb.mxu1 %v758_v37  ;;  %v1452_v8 = vadd.f32 %v1451_v4, %v1432_v3  ;;  %v407_v35 = vld [vmem:[#allocation5 + $0xb28] sm:$0xff] }
 0x1b4   :  { %v1014_v38 = vld [vmem:[#allocation5 + $0x1e20] sm:$0xff]  ;;  %1842 = vmatpush.msrb.mxu2 %v878_v61  ;;  %v543_v37 = vld [vmem:[#allocation5 + $0xf68] sm:$0xff] }
 0x1b5   :  { %v614_v40 = vld [vmem:[#allocation5 + $0x11a0] sm:$0xff]  ;;  %1861 = vmatpush.msrb.mxu3 %v1014_v38  ;;  %v1472_v13 = vadd.f32 %v1471_v11, %v1452_v8  ;;  %v2589_v38 = vld [vmem:[#allocation2 + $0x30] sm:$0xff]  ;;  %v239_v3 = vld [vmem:[#allocation5 + $0x5e8] sm:$0xff] }
 0x1b6   :  { %v750_v41 = vld [vmem:[#allocation5 + $0x15e0] sm:$0xff]  ;;  %1803 = vmatpush.msrb.mxu0 %v614_v40  ;;  %v143_v40 = vld [vmem:[#allocation5 + $0x2e8] sm:$0xff] }
 0x1b7   :  { %v870_v14 = vld [vmem:[#allocation5 + $0x19a0] sm:$0xff]  ;;  %1822 = vmatpush.msrb.mxu1 %v750_v41  ;;  %v1492_v39 = vadd.f32 %v1491_v17, %v1472_v13  ;;  %v1511_v28 = vpop.f32.mrf.mxu1  ;;  %v279_v41 = vld [vmem:[#allocation5 + $0x728] sm:$0xff] }
 0x1b8   :  { %v1006_v42 = vld [vmem:[#allocation5 + $0x1de0] sm:$0xff]  ;;  %1843 = vmatpush.msrb.mxu2 %v870_v14  ;;  %v399_v14 = vld [vmem:[#allocation5 + $0xae8] sm:$0xff] }
 0x1b9   :  { %v606_v43 = vld [vmem:[#allocation5 + $0x1160] sm:$0xff]  ;;  %1862 = vmatpush.msrb.mxu3 %v1006_v42  ;;  %v1512_v31 = vadd.f32 %v1511_v28, %v1492_v39  ;;  %v359_v4 = vld [vmem:[#allocation5 + $0x9a8] sm:$0xff] }
 0x1ba   :  { %v742_v44 = vld [vmem:[#allocation5 + $0x15a0] sm:$0xff]  ;;  %1804 = vmatpush.msrb.mxu0 %v606_v43  ;;  %v1531_v32 = vpop.f32.mrf.mxu2  ;;  %v535_v43 = vld [vmem:[#allocation5 + $0xf28] sm:$0xff] }
 0x1bb   :  { %v862_v19 = vld [vmem:[#allocation5 + $0x1960] sm:$0xff]  ;;  %1823 = vmatpush.msrb.mxu1 %v742_v44  ;;  %v1532_v55 = vadd.f32 %v1531_v32, %v1512_v31  ;;  %v1551_v36 = vpop.f32.mrf.mxu3  ;;  %v2595_v44 = vld [vmem:[#allocation2 + $0x38] sm:$0xff]  ;;  %v351_v8 = vld [vmem:[#allocation5 + $0x968] sm:$0xff] }
 0x1bc   :  { %v998_v20 = vld [vmem:[#allocation5 + $0x1da0] sm:$0xff]  ;;  %1844 = vmatpush.msrb.mxu2 %v862_v19  ;;  %v135_v19 = vld [vmem:[#allocation5 + $0x2a8] sm:$0xff] }
 0x1bd   :  { %v598_v45 = vld [vmem:[#allocation5 + $0x1120] sm:$0xff]  ;;  %1863 = vmatpush.msrb.mxu3 %v998_v20  ;;  %v1552_v61 = vadd.f32 %v1551_v36, %v1532_v55  ;;  %v271_v20 = vld [vmem:[#allocation5 + $0x6e8] sm:$0xff] }
 0x1be   :  { %v734_v46 = vld [vmem:[#allocation5 + $0x1560] sm:$0xff]  ;;  %1805 = vmatpush.msrb.mxu0 %v598_v45  ;;  %v391_v45 = vld [vmem:[#allocation5 + $0xaa8] sm:$0xff] }
 0x1bf   :  { %v854_v47 = vld [vmem:[#allocation5 + $0x1920] sm:$0xff]  ;;  %1824 = vmatpush.msrb.mxu1 %v734_v46  ;;  %2356 = vst [vmem:[#allocation7 + $0x10] sm:$0xff] %v1552_v61  ;;  %v527_v46 = vld [vmem:[#allocation5 + $0xee8] sm:$0xff] }
 0x1c0   :  { %v990_v48 = vld [vmem:[#allocation5 + $0x1d60] sm:$0xff]  ;;  %1845 = vmatpush.msrb.mxu2 %v854_v47  ;;  %v2598_v47 = vld [vmem:[#allocation2 + $0x28] sm:$0xff] }
 0x1c1   :  { %v590_v25 = vld [vmem:[#allocation5 + $0x10e0] sm:$0xff]  ;;  %1864 = vmatpush.msrb.mxu3 %v990_v48  ;;  %v127_v48 = vld [vmem:[#allocation5 + $0x268] sm:$0xff] }
 0x1c2   :  { %v726_v50 = vld [vmem:[#allocation5 + $0x1520] sm:$0xff]  ;;  %1806 = vmatpush.msrb.mxu0 %v590_v25  ;;  %v263_v25 = vld [vmem:[#allocation5 + $0x6a8] sm:$0xff] }
 0x1c3   :  { %v846_v52 = vld [vmem:[#allocation5 + $0x18e0] sm:$0xff]  ;;  %1825 = vmatpush.msrb.mxu1 %v726_v50  ;;  %v383_v50 = vld [vmem:[#allocation5 + $0xa68] sm:$0xff] }
 0x1c4   :  { %v982_v54 = vld [vmem:[#allocation5 + $0x1d20] sm:$0xff]  ;;  %1846 = vmatpush.msrb.mxu2 %v846_v52  ;;  %v119_v52 = vld [vmem:[#allocation5 + $0x228] sm:$0xff] }
 0x1c5   :  { %v582_v56 = vld [vmem:[#allocation5 + $0x10a0] sm:$0xff]  ;;  %1865 = vmatpush.msrb.mxu3 %v982_v54  ;;  %v255_v54 = vld [vmem:[#allocation5 + $0x668] sm:$0xff] }
 0x1c6   :  { %v718_v57 = vld [vmem:[#allocation5 + $0x14e0] sm:$0xff]  ;;  %1807 = vmatpush.msrb.mxu0 %v582_v56  ;;  %v375_v56 = vld [vmem:[#allocation5 + $0xa28] sm:$0xff] }
 0x1c7   :  { %v838_v59 = vld [vmem:[#allocation5 + $0x18a0] sm:$0xff]  ;;  %1826 = vmatpush.msrb.mxu1 %v718_v57  ;;  %v511_v57 = vld [vmem:[#allocation5 + $0xe68] sm:$0xff] }
 0x1c8   :  { %v974_v60 = vld [vmem:[#allocation5 + $0x1ce0] sm:$0xff]  ;;  %1847 = vmatpush.msrb.mxu2 %v838_v59  ;;  %v111_v59 = vld [vmem:[#allocation5 + $0x1e8] sm:$0xff] }
 0x1c9   :  { %v574_v1 = vld [vmem:[#allocation5 + $0x1060] sm:$0xff]  ;;  %1866 = vmatpush.msrb.mxu3 %v974_v60  ;;  %v247_v60 = vld [vmem:[#allocation5 + $0x628] sm:$0xff] }
 0x1ca   :  { %v710_v2 = vld [vmem:[#allocation5 + $0x14a0] sm:$0xff]  ;;  %1808 = vmatpush.msrb.mxu0 %v574_v1  ;;  %v503_v1 = vld [vmem:[#allocation5 + $0xe28] sm:$0xff] }
 0x1cb   :  { %v830_v6 = vld [vmem:[#allocation5 + $0x1860] sm:$0xff]  ;;  %1827 = vmatpush.msrb.mxu1 %v710_v2  ;;  %v103_v2 = vld [vmem:[#allocation5 + $0x1a8] sm:$0xff] }
 0x1cc   :  { %v966_v7 = vld [vmem:[#allocation5 + $0x1ca0] sm:$0xff]  ;;  %1848 = vmatpush.msrb.mxu2 %v830_v6  ;;  %v495_v6 = vld [vmem:[#allocation5 + $0xde8] sm:$0xff] }
 0x1cd   :  { %v566_v29 = vld [vmem:[#allocation5 + $0x1020] sm:$0xff]  ;;  %1867 = vmatpush.msrb.mxu3 %v966_v7  ;;  %v95_v7 = vld [vmem:[#allocation5 + $0x168] sm:$0xff] }
 0x1ce   :  { %v702_v9 = vld [vmem:[#allocation5 + $0x1460] sm:$0xff]  ;;  %1809 = vmatpush.msrb.mxu0 %v566_v29  ;;  %v231_v29 = vld [vmem:[#allocation5 + $0x5a8] sm:$0xff] }
 0x1cf   :  { %v822_v10 = vld [vmem:[#allocation5 + $0x1820] sm:$0xff]  ;;  %1828 = vmatpush.msrb.mxu1 %v702_v9  ;;  %v487_v9 = vld [vmem:[#allocation5 + $0xda8] sm:$0xff] }
 0x1d0   :  { %v958_v12 = vld [vmem:[#allocation5 + $0x1c60] sm:$0xff]  ;;  %1849 = vmatpush.msrb.mxu2 %v822_v10  ;;  %v87_v10 = vld [vmem:[#allocation5 + $0x128] sm:$0xff] }
 0x1d1   :  { %v694_v16 = vld [vmem:[#allocation5 + $0x1420] sm:$0xff]  ;;  %1868 = vmatpush.msrb.mxu3 %v958_v12  ;;  %1850 = vmatmul.f32.vlgmr.msrb.gmra.mxu2 %v2589_v38  ;;  %v223_v11 = vld [vmem:[#allocation5 + $0x568] sm:$0xff] }
 0x1d2   :  { %v2580_v18 = vld [vmem:[#allocation2] sm:$0xff]  ;;  %1914 = vmatpush.msra.mxu2 %v431_v34  ;;  %1829 = vmatpush.msrb.mxu1 %v694_v16  ;;  %v343_v12 = vld [vmem:[#allocation5 + $0x928] sm:$0xff] }
 0x1d3   :  { %1730 = vmatmul.f32.vlgmr.msra.gmra.mxu0 %v2580_v18  ;;  %v950_v21 = vld [vmem:[#allocation5 + $0x1c20] sm:$0xff]  ;;  %1830 = vmatmul.f32.vlgmr.msrb.gmra.mxu1 %v2598_v47  ;;  %v479_v13 = vld [vmem:[#allocation5 + $0xd68] sm:$0xff] }
 0x1d4   :  { %1874 = vmatpush.msra.mxu0 %v175_v15  ;;  %1869 = vmatpush.msrb.mxu3 %v950_v21  ;;  %v2592_v42 = vld [vmem:[#allocation2 + $0x20] sm:$0xff]  ;;  %v79_v15 = vld [vmem:[#allocation5 + $0xe8] sm:$0xff] }
 0x1d5   :  { %1894 = vmatpush.msra.mxu1 %v303_v24  ;;  %1915 = vmatpush.msra.mxu2 %v423_v26  ;;  %v215_v34 = vld [vmem:[#allocation5 + $0x528] sm:$0xff] }
 0x1d6   :  { %1875 = vmatpush.msra.mxu0 %v167_v23  ;;  %1934 = vmatpush.msra.mxu3 %v559_v27  ;;  %v335_v16 = vld [vmem:[#allocation5 + $0x8e8] sm:$0xff] }
 0x1d7   :  { %1895 = vmatpush.msra.mxu1 %v295_v49  ;;  %1916 = vmatpush.msra.mxu2 %v415_v0  ;;  %v471_v17 = vld [vmem:[#allocation5 + $0xd28] sm:$0xff] }
 0x1d8   :  { %1876 = vmatpush.msra.mxu0 %v159_v30  ;;  %1935 = vmatpush.msra.mxu3 %v551_v33  ;;  %v71_v21 = vld [vmem:[#allocation5 + $0xa8] sm:$0xff] }
 0x1d9   :  { %1896 = vmatpush.msra.mxu1 %v287_v5  ;;  %1917 = vmatpush.msra.mxu2 %v407_v35  ;;  %v207_v39 = vld [vmem:[#allocation5 + $0x4e8] sm:$0xff] }
 0x1da   :  { %1877 = vmatpush.msra.mxu0 %v151_v53  ;;  %1936 = vmatpush.msra.mxu3 %v543_v37  ;;  %v327_v23 = vld [vmem:[#allocation5 + $0x8a8] sm:$0xff] }
 0x1db   :  { %1810 = vmatmul.f32.vlgmr.msrb.gmra.mxu0 %v2592_v42  ;;  %1870 = vmatmul.f32.vlgmr.msrb.gmra.mxu3 %v2595_v44  ;;  %v463_v24 = vld [vmem:[#allocation5 + $0xce8] sm:$0xff] }
 0x1dc   :  { %1878 = vmatpush.msra.mxu0 %v143_v40  ;;  %1897 = vmatpush.msra.mxu1 %v279_v41  ;;  %v63_v26 = vld [vmem:[#allocation5 + $0x68] sm:$0xff] }
 0x1dd   :  { %1918 = vmatpush.msra.mxu2 %v399_v14  ;;  %1937 = vmatpush.msra.mxu3 %v535_v43  ;;  %v199_v27 = vld [vmem:[#allocation5 + $0x4a8] sm:$0xff] }
 0x1de   :  { %1879 = vmatpush.msra.mxu0 %v135_v19  ;;  %1898 = vmatpush.msra.mxu1 %v271_v20  ;;  %v319_v28 = vld [vmem:[#allocation5 + $0x868] sm:$0xff] }
 0x1df   :  { %1919 = vmatpush.msra.mxu2 %v391_v45  ;;  %1938 = vmatpush.msra.mxu3 %v527_v46  ;;  %v455_v30 = vld [vmem:[#allocation5 + $0xca8] sm:$0xff] }
 0x1e0   :  { %1880 = vmatpush.msra.mxu0 %v127_v48  ;;  %1899 = vmatpush.msra.mxu1 %v263_v25  ;;  %v55_v49 = vld [vmem:[#allocation5 + $0x28] sm:$0xff] }
 0x1e1   :  { %1920 = vmatpush.msra.mxu2 %v383_v50  ;;  %1939 = vmatpush.msra.mxu3 %v519_v51  ;;  %v191_v31 = vld [vmem:[#allocation5 + $0x468] sm:$0xff] }
 0x1e2   :  { %1881 = vmatpush.msra.mxu0 %v119_v52  ;;  %1900 = vmatpush.msra.mxu1 %v255_v54  ;;  %v311_v32 = vld [vmem:[#allocation5 + $0x828] sm:$0xff] }
 0x1e3   :  { %1921 = vmatpush.msra.mxu2 %v375_v56  ;;  %1940 = vmatpush.msra.mxu3 %v511_v57  ;;  %v447_v0 = vld [vmem:[#allocation5 + $0xc68] sm:$0xff] }
 0x1e4   :  { %1882 = vmatpush.msra.mxu0 %v111_v59  ;;  %1901 = vmatpush.msra.mxu1 %v247_v60  ;;  %v687_v33 = vld [vmem:[#allocation5 + $0x13e8] sm:$0xff] }
 0x1e5   :  { %1922 = vmatpush.msra.mxu2 %v367_v62  ;;  %1941 = vmatpush.msra.mxu3 %v503_v1  ;;  %v943_v53 = vld [vmem:[#allocation5 + $0x1be8] sm:$0xff] }
 0x1e6   :  { %1883 = vmatpush.msra.mxu0 %v103_v2  ;;  %1902 = vmatpush.msra.mxu1 %v239_v3  ;;  %v183_v55 = vld [vmem:[#allocation5 + $0x428] sm:$0xff] }
 0x1e7   :  { %1923 = vmatpush.msra.mxu2 %v359_v4  ;;  %1942 = vmatpush.msra.mxu3 %v495_v6  ;;  %v439_v5 = vld [vmem:[#allocation5 + $0xc28] sm:$0xff] }
 0x1e8   :  { %1884 = vmatpush.msra.mxu0 %v95_v7  ;;  %1903 = vmatpush.msra.mxu1 %v231_v29  ;;  %v679_v35 = vld [vmem:[#allocation5 + $0x13a8] sm:$0xff] }
 0x1e9   :  { %1924 = vmatpush.msra.mxu2 %v351_v8  ;;  %1943 = vmatpush.msra.mxu3 %v487_v9  ;;  %v815_v36 = vld [vmem:[#allocation5 + $0x17e8] sm:$0xff] }
 0x1ea   :  { %1885 = vmatpush.msra.mxu0 %v87_v10  ;;  %1904 = vmatpush.msra.mxu1 %v223_v11  ;;  %v935_v37 = vld [vmem:[#allocation5 + $0x1ba8] sm:$0xff] }
 0x1eb   :  { %1925 = vmatpush.msra.mxu2 %v343_v12  ;;  %1944 = vmatpush.msra.mxu3 %v479_v13  ;;  %v1071_v61 = vld [vmem:[#allocation5 + $0x1fe8] sm:$0xff] }
 0x1ec   :  { %1886 = vmatpush.msra.mxu0 %v79_v15  ;;  %1905 = vmatpush.msra.mxu1 %v215_v34  ;;  %v671_v40 = vld [vmem:[#allocation5 + $0x1368] sm:$0xff] }
 0x1ed   :  { %1926 = vmatpush.msra.mxu2 %v335_v16  ;;  %1945 = vmatpush.msra.mxu3 %v471_v17  ;;  %v807_v41 = vld [vmem:[#allocation5 + $0x17a8] sm:$0xff] }
 0x1ee   :  { %1887 = vmatpush.msra.mxu0 %v71_v21  ;;  %1906 = vmatpush.msra.mxu1 %v207_v39  ;;  %v927_v14 = vld [vmem:[#allocation5 + $0x1b68] sm:$0xff] }
 0x1ef   :  { %1927 = vmatpush.msra.mxu2 %v327_v23  ;;  %1946 = vmatpush.msra.mxu3 %v463_v24  ;;  %v1063_v43 = vld [vmem:[#allocation5 + $0x1fa8] sm:$0xff] }
 0x1f0   :  { %1888 = vmatpush.msra.mxu0 %v63_v26  ;;  %1907 = vmatpush.msra.mxu1 %v199_v27  ;;  %v663_v19 = vld [vmem:[#allocation5 + $0x1328] sm:$0xff] }
 0x1f1   :  { %1928 = vmatpush.msra.mxu2 %v319_v28  ;;  %1947 = vmatpush.msra.mxu3 %v455_v30  ;;  %v799_v20 = vld [vmem:[#allocation5 + $0x1768] sm:$0xff]  ;;  %v1571_v28 = vpop.f32.mrf.mxu0 }
 0x1f2   :  { %1889 = vmatpush.msra.mxu0 %v55_v49  ;;  %1908 = vmatpush.msra.mxu1 %v191_v31  ;;  %v919_v45 = vld [vmem:[#allocation5 + $0x1b28] sm:$0xff] }
 0x1f3   :  { %1929 = vmatpush.msra.mxu2 %v311_v32  ;;  %1948 = vmatpush.msra.mxu3 %v447_v0  ;;  %v1055_v46 = vld [vmem:[#allocation5 + $0x1f68] sm:$0xff] }
 0x1f4   :  { %1954 = vmatpush.msrb.mxu0 %v687_v33  ;;  %1909 = vmatpush.msra.mxu1 %v183_v55  ;;  %v655_v48 = vld [vmem:[#allocation5 + $0x12e8] sm:$0xff] }
 0x1f5   :  { %1994 = vmatpush.msrb.mxu2 %v943_v53  ;;  %1949 = vmatpush.msra.mxu3 %v439_v5  ;;  %v791_v25 = vld [vmem:[#allocation5 + $0x1728] sm:$0xff]  ;;  %v1591_v53 = vpop.f32.mrf.mxu1 }
 0x1f6   :  { %1955 = vmatpush.msrb.mxu0 %v679_v35  ;;  %1974 = vmatpush.msrb.mxu1 %v815_v36  ;;  %v911_v50 = vld [vmem:[#allocation5 + $0x1ae8] sm:$0xff]  ;;  %v1592_v35 = vadd.f32 %v1591_v53, %v1571_v28  ;;  %v1611_v36 = vpop.f32.mrf.mxu2  ;;  %v504_v28 = vld [vmem:[#allocation5 + $0xe30] sm:$0xff] }
 0x1f7   :  { %1995 = vmatpush.msrb.mxu2 %v935_v37  ;;  %2014 = vmatpush.msrb.mxu3 %v1071_v61  ;;  %v1047_v51 = vld [vmem:[#allocation5 + $0x1f28] sm:$0xff]  ;;  %v352_v53 = vld [vmem:[#allocation5 + $0x970] sm:$0xff] }
 0x1f8   :  { %1956 = vmatpush.msrb.mxu0 %v671_v40  ;;  %1975 = vmatpush.msrb.mxu1 %v807_v41  ;;  %v647_v52 = vld [vmem:[#allocation5 + $0x12a8] sm:$0xff]  ;;  %v1612_v41 = vadd.f32 %v1611_v36, %v1592_v35  ;;  %v224_v35 = vld [vmem:[#allocation5 + $0x570] sm:$0xff] }
 0x1f9   :  { %1996 = vmatpush.msrb.mxu2 %v927_v14  ;;  %2015 = vmatpush.msrb.mxu3 %v1063_v43  ;;  %v783_v54 = vld [vmem:[#allocation5 + $0x16e8] sm:$0xff]  ;;  %v344_v36 = vld [vmem:[#allocation5 + $0x930] sm:$0xff] }
 0x1fa   :  { %1957 = vmatpush.msrb.mxu0 %v663_v19  ;;  %1976 = vmatpush.msrb.mxu1 %v799_v20  ;;  %v903_v56 = vld [vmem:[#allocation5 + $0x1aa8] sm:$0xff]  ;;  %v1631_v19 = vpop.f32.mrf.mxu3 }
 0x1fb   :  { %1997 = vmatpush.msrb.mxu2 %v919_v45  ;;  %2016 = vmatpush.msrb.mxu3 %v1055_v46  ;;  %v1039_v57 = vld [vmem:[#allocation5 + $0x1ee8] sm:$0xff]  ;;  %v1632_v45 = vadd.f32 %v1631_v19, %v1612_v41  ;;  %v176_v46 = vld [vmem:[#allocation5 + $0x3f0] sm:$0xff] }
 0x1fc   :  { %1958 = vmatpush.msrb.mxu0 %v655_v48  ;;  %1977 = vmatpush.msrb.mxu1 %v791_v25  ;;  %v639_v59 = vld [vmem:[#allocation5 + $0x1268] sm:$0xff]  ;;  %v432_v48 = vld [vmem:[#allocation5 + $0xbf0] sm:$0xff] }
 0x1fd   :  { %1998 = vmatpush.msrb.mxu2 %v911_v50  ;;  %2017 = vmatpush.msrb.mxu3 %v1047_v51  ;;  %v775_v60 = vld [vmem:[#allocation5 + $0x16a8] sm:$0xff]  ;;  %v1651_v50 = vpop.f32.mrf.mxu0  ;;  %v336_v41 = vld [vmem:[#allocation5 + $0x8f0] sm:$0xff] }
 0x1fe   :  { %1959 = vmatpush.msrb.mxu0 %v647_v52  ;;  %1978 = vmatpush.msrb.mxu1 %v783_v54  ;;  %v895_v62 = vld [vmem:[#allocation5 + $0x1a68] sm:$0xff]  ;;  %v1652_v52 = vadd.f32 %v1651_v50, %v1632_v45  ;;  %v168_v54 = vld [vmem:[#allocation5 + $0x3b0] sm:$0xff] }
 0x1ff   :  { %v1031_v1 = vld [vmem:[#allocation5 + $0x1ea8] sm:$0xff]  ;;  %1999 = vmatpush.msrb.mxu2 %v903_v56  ;;  %2018 = vmatpush.msrb.mxu3 %v1039_v57  ;;  %v304_v56 = vld [vmem:[#allocation5 + $0x7f0] sm:$0xff] }
 0x200   :  { %v631_v2 = vld [vmem:[#allocation5 + $0x1228] sm:$0xff]  ;;  %1960 = vmatpush.msrb.mxu0 %v639_v59  ;;  %1979 = vmatpush.msrb.mxu1 %v775_v60  ;;  %v560_v57 = vld [vmem:[#allocation5 + $0xff0] sm:$0xff] }
 0x201   :  { %v767_v3 = vld [vmem:[#allocation5 + $0x1668] sm:$0xff]  ;;  %2000 = vmatpush.msrb.mxu2 %v895_v62  ;;  %2019 = vmatpush.msrb.mxu3 %v1031_v1  ;;  %v160_v60 = vld [vmem:[#allocation5 + $0x370] sm:$0xff] }
 0x202   :  { %v887_v4 = vld [vmem:[#allocation5 + $0x1a28] sm:$0xff]  ;;  %1961 = vmatpush.msrb.mxu0 %v631_v2  ;;  %1980 = vmatpush.msrb.mxu1 %v767_v3  ;;  %v296_v62 = vld [vmem:[#allocation5 + $0x7b0] sm:$0xff]  ;;  %v1691_v2 = vpop.f32.mrf.mxu2 }
 0x203   :  { %v1023_v6 = vld [vmem:[#allocation5 + $0x1e68] sm:$0xff]  ;;  %2001 = vmatpush.msrb.mxu2 %v887_v4  ;;  %1890 = vmatmul.f32.vlgmr.msra.gmra.mxu0 %v2580_v18  ;;  %v416_v18 = vld [vmem:[#allocation5 + $0xb70] sm:$0xff] }
 0x204   :  { %v623_v7 = vld [vmem:[#allocation5 + $0x11e8] sm:$0xff]  ;;  %2020 = vmatpush.msrb.mxu3 %v1023_v6  ;;  %1930 = vmatmul.f32.vlgmr.msra.gmra.mxu2 %v2577_v63  ;;  %v424_v63 = vld [vmem:[#allocation5 + $0xbb0] sm:$0xff] }
 0x205   :  { %v759_v29 = vld [vmem:[#allocation5 + $0x1628] sm:$0xff]  ;;  %1962 = vmatpush.msrb.mxu0 %v623_v7  ;;  %1950 = vmatmul.f32.vlgmr.msra.gmra.mxu3 %v2583_v22  ;;  %v552_v3 = vld [vmem:[#allocation5 + $0xfb0] sm:$0xff] }
 0x206   :  { %v879_v8 = vld [vmem:[#allocation5 + $0x19e8] sm:$0xff]  ;;  %1981 = vmatpush.msrb.mxu1 %v759_v29  ;;  %v152_v22 = vld [vmem:[#allocation5 + $0x330] sm:$0xff] }
 0x207   :  { %v1015_v9 = vld [vmem:[#allocation5 + $0x1e28] sm:$0xff]  ;;  %2002 = vmatpush.msrb.mxu2 %v879_v8  ;;  %v1671_v59 = vpop.f32.mrf.mxu1  ;;  %1910 = vmatmul.f32.vlgmr.msra.gmra.mxu1 %v2586_v58  ;;  %v288_v6 = vld [vmem:[#allocation5 + $0x770] sm:$0xff] }
 0x208   :  { %v615_v10 = vld [vmem:[#allocation5 + $0x11a8] sm:$0xff]  ;;  %2021 = vmatpush.msrb.mxu3 %v1015_v9  ;;  %v1672_v1 = vadd.f32 %v1671_v59, %v1652_v52  ;;  %v408_v7 = vld [vmem:[#allocation5 + $0xb30] sm:$0xff] }
 0x209   :  { %v751_v11 = vld [vmem:[#allocation5 + $0x15e8] sm:$0xff]  ;;  %1963 = vmatpush.msrb.mxu0 %v615_v10  ;;  %v544_v58 = vld [vmem:[#allocation5 + $0xf70] sm:$0xff] }
 0x20a   :  { %v871_v12 = vld [vmem:[#allocation5 + $0x19a8] sm:$0xff]  ;;  %1982 = vmatpush.msrb.mxu1 %v751_v11  ;;  %v1692_v4 = vadd.f32 %v1691_v2, %v1672_v1  ;;  %v144_v9 = vld [vmem:[#allocation5 + $0x2f0] sm:$0xff] }
 0x20b   :  { %v1007_v13 = vld [vmem:[#allocation5 + $0x1de8] sm:$0xff]  ;;  %2003 = vmatpush.msrb.mxu2 %v871_v12  ;;  %v1711_v29 = vpop.f32.mrf.mxu3  ;;  %v280_v10 = vld [vmem:[#allocation5 + $0x730] sm:$0xff] }
 0x20c   :  { %v607_v15 = vld [vmem:[#allocation5 + $0x1168] sm:$0xff]  ;;  %2022 = vmatpush.msrb.mxu3 %v1007_v13  ;;  %v1712_v8 = vadd.f32 %v1711_v29, %v1692_v4  ;;  %v400_v11 = vld [vmem:[#allocation5 + $0xaf0] sm:$0xff] }
 0x20d   :  { %v743_v34 = vld [vmem:[#allocation5 + $0x15a8] sm:$0xff]  ;;  %1964 = vmatpush.msrb.mxu0 %v607_v15  ;;  %v536_v12 = vld [vmem:[#allocation5 + $0xf30] sm:$0xff] }
 0x20e   :  { %v863_v16 = vld [vmem:[#allocation5 + $0x1968] sm:$0xff]  ;;  %1983 = vmatpush.msrb.mxu1 %v743_v34  ;;  %2357 = vst [vmem:[#allocation7 + $0x18] sm:$0xff] %v1712_v8  ;;  %v136_v13 = vld [vmem:[#allocation5 + $0x2b0] sm:$0xff] }
 0x20f   :  { %v999_v17 = vld [vmem:[#allocation5 + $0x1da8] sm:$0xff]  ;;  %2004 = vmatpush.msrb.mxu2 %v863_v16  ;;  %v272_v15 = vld [vmem:[#allocation5 + $0x6f0] sm:$0xff] }
 0x210   :  { %v599_v21 = vld [vmem:[#allocation5 + $0x1128] sm:$0xff]  ;;  %2023 = vmatpush.msrb.mxu3 %v999_v17  ;;  %v392_v34 = vld [vmem:[#allocation5 + $0xab0] sm:$0xff] }
 0x211   :  { %v735_v39 = vld [vmem:[#allocation5 + $0x1568] sm:$0xff]  ;;  %1965 = vmatpush.msrb.mxu0 %v599_v21  ;;  %v128_v16 = vld [vmem:[#allocation5 + $0x270] sm:$0xff] }
 0x212   :  { %v855_v23 = vld [vmem:[#allocation5 + $0x1928] sm:$0xff]  ;;  %1984 = vmatpush.msrb.mxu1 %v735_v39  ;;  %v264_v17 = vld [vmem:[#allocation5 + $0x6b0] sm:$0xff] }
 0x213   :  { %v991_v24 = vld [vmem:[#allocation5 + $0x1d68] sm:$0xff]  ;;  %2005 = vmatpush.msrb.mxu2 %v855_v23  ;;  %v384_v21 = vld [vmem:[#allocation5 + $0xa70] sm:$0xff] }
 0x214   :  { %v591_v26 = vld [vmem:[#allocation5 + $0x10e8] sm:$0xff]  ;;  %2024 = vmatpush.msrb.mxu3 %v991_v24  ;;  %v520_v39 = vld [vmem:[#allocation5 + $0xeb0] sm:$0xff] }
 0x215   :  { %v727_v27 = vld [vmem:[#allocation5 + $0x1528] sm:$0xff]  ;;  %1966 = vmatpush.msrb.mxu0 %v591_v26  ;;  %v376_v23 = vld [vmem:[#allocation5 + $0xa30] sm:$0xff] }
 0x216   :  { %v847_v30 = vld [vmem:[#allocation5 + $0x18e8] sm:$0xff]  ;;  %1985 = vmatpush.msrb.mxu1 %v727_v27  ;;  %v512_v24 = vld [vmem:[#allocation5 + $0xe70] sm:$0xff] }
 0x217   :  { %v983_v49 = vld [vmem:[#allocation5 + $0x1d28] sm:$0xff]  ;;  %2006 = vmatpush.msrb.mxu2 %v847_v30  ;;  %v112_v26 = vld [vmem:[#allocation5 + $0x1f0] sm:$0xff] }
 0x218   :  { %v583_v31 = vld [vmem:[#allocation5 + $0x10a8] sm:$0xff]  ;;  %2025 = vmatpush.msrb.mxu3 %v983_v49  ;;  %v248_v27 = vld [vmem:[#allocation5 + $0x630] sm:$0xff] }
 0x219   :  { %v719_v32 = vld [vmem:[#allocation5 + $0x14e8] sm:$0xff]  ;;  %1967 = vmatpush.msrb.mxu0 %v583_v31  ;;  %v104_v30 = vld [vmem:[#allocation5 + $0x1b0] sm:$0xff] }
 0x21a   :  { %v839_v0 = vld [vmem:[#allocation5 + $0x18a8] sm:$0xff]  ;;  %1986 = vmatpush.msrb.mxu1 %v719_v32  ;;  %v240_v49 = vld [vmem:[#allocation5 + $0x5f0] sm:$0xff] }
 0x21b   :  { %v975_v33 = vld [vmem:[#allocation5 + $0x1ce8] sm:$0xff]  ;;  %2007 = vmatpush.msrb.mxu2 %v839_v0  ;;  %v360_v31 = vld [vmem:[#allocation5 + $0x9b0] sm:$0xff] }
 0x21c   :  { %v575_v55 = vld [vmem:[#allocation5 + $0x1068] sm:$0xff]  ;;  %2026 = vmatpush.msrb.mxu3 %v975_v33  ;;  %v496_v32 = vld [vmem:[#allocation5 + $0xdf0] sm:$0xff] }
 0x21d   :  { %v711_v5 = vld [vmem:[#allocation5 + $0x14a8] sm:$0xff]  ;;  %1968 = vmatpush.msrb.mxu0 %v575_v55  ;;  %v96_v0 = vld [vmem:[#allocation5 + $0x170] sm:$0xff] }
 0x21e   :  { %v831_v37 = vld [vmem:[#allocation5 + $0x1868] sm:$0xff]  ;;  %1987 = vmatpush.msrb.mxu1 %v711_v5  ;;  %v232_v33 = vld [vmem:[#allocation5 + $0x5b0] sm:$0xff] }
 0x21f   :  { %v967_v61 = vld [vmem:[#allocation5 + $0x1ca8] sm:$0xff]  ;;  %2008 = vmatpush.msrb.mxu2 %v831_v37  ;;  %v488_v55 = vld [vmem:[#allocation5 + $0xdb0] sm:$0xff] }
 0x220   :  { %v567_v40 = vld [vmem:[#allocation5 + $0x1028] sm:$0xff]  ;;  %2027 = vmatpush.msrb.mxu3 %v967_v61  ;;  %v88_v5 = vld [vmem:[#allocation5 + $0x130] sm:$0xff] }
 0x221   :  { %v703_v14 = vld [vmem:[#allocation5 + $0x1468] sm:$0xff]  ;;  %1969 = vmatpush.msrb.mxu0 %v567_v40  ;;  %v480_v37 = vld [vmem:[#allocation5 + $0xd70] sm:$0xff] }
 0x222   :  { %v823_v43 = vld [vmem:[#allocation5 + $0x1828] sm:$0xff]  ;;  %1988 = vmatpush.msrb.mxu1 %v703_v14  ;;  %1970 = vmatmul.f32.vlgmr.msrb.gmra.mxu0 %v2592_v42  ;;  %v120_v42 = vld [vmem:[#allocation5 + $0x230] sm:$0xff] }
 0x223   :  { %v959_v20 = vld [vmem:[#allocation5 + $0x1c68] sm:$0xff]  ;;  %2009 = vmatpush.msrb.mxu2 %v823_v43  ;;  %2034 = vmatpush.msra.mxu0 %v176_v46  ;;  %v80_v61 = vld [vmem:[#allocation5 + $0xf0] sm:$0xff] }
 0x224   :  { %v695_v25 = vld [vmem:[#allocation5 + $0x1428] sm:$0xff]  ;;  %2028 = vmatpush.msrb.mxu3 %v959_v20  ;;  %2010 = vmatmul.f32.vlgmr.msrb.gmra.mxu2 %v2589_v38  ;;  %v528_v38 = vld [vmem:[#allocation5 + $0xef0] sm:$0xff] }
 0x225   :  { %v951_v51 = vld [vmem:[#allocation5 + $0x1c28] sm:$0xff]  ;;  %2074 = vmatpush.msra.mxu2 %v432_v48  ;;  %1989 = vmatpush.msrb.mxu1 %v695_v25  ;;  %v216_v40 = vld [vmem:[#allocation5 + $0x530] sm:$0xff] }
 0x226   :  { %2029 = vmatpush.msrb.mxu3 %v951_v51  ;;  %2035 = vmatpush.msra.mxu0 %v168_v54  ;;  %v472_v14 = vld [vmem:[#allocation5 + $0xd30] sm:$0xff] }
 0x227   :  { %2054 = vmatpush.msra.mxu1 %v304_v56  ;;  %2075 = vmatpush.msra.mxu2 %v424_v63  ;;  %v72_v43 = vld [vmem:[#allocation5 + $0xb0] sm:$0xff] }
 0x228   :  { %2094 = vmatpush.msra.mxu3 %v560_v57  ;;  %2036 = vmatpush.msra.mxu0 %v160_v60  ;;  %v208_v19 = vld [vmem:[#allocation5 + $0x4f0] sm:$0xff] }
 0x229   :  { %2055 = vmatpush.msra.mxu1 %v296_v62  ;;  %2076 = vmatpush.msra.mxu2 %v416_v18  ;;  %v328_v20 = vld [vmem:[#allocation5 + $0x8b0] sm:$0xff] }
 0x22a   :  { %2095 = vmatpush.msra.mxu3 %v552_v3  ;;  %2037 = vmatpush.msra.mxu0 %v152_v22  ;;  %v464_v45 = vld [vmem:[#allocation5 + $0xcf0] sm:$0xff] }
 0x22b   :  { %2056 = vmatpush.msra.mxu1 %v288_v6  ;;  %2077 = vmatpush.msra.mxu2 %v408_v7  ;;  %v64_v46 = vld [vmem:[#allocation5 + $0x70] sm:$0xff] }
 0x22c   :  { %2096 = vmatpush.msra.mxu3 %v544_v58  ;;  %2038 = vmatpush.msra.mxu0 %v144_v9  ;;  %v200_v48 = vld [vmem:[#allocation5 + $0x4b0] sm:$0xff] }
 0x22d   :  { %2030 = vmatmul.f32.vlgmr.msrb.gmra.mxu3 %v2595_v44  ;;  %2057 = vmatpush.msra.mxu1 %v280_v10  ;;  %v256_v44 = vld [vmem:[#allocation5 + $0x670] sm:$0xff] }
 0x22e   :  { %2078 = vmatpush.msra.mxu2 %v400_v11  ;;  %2097 = vmatpush.msra.mxu3 %v536_v12  ;;  %v320_v25 = vld [vmem:[#allocation5 + $0x870] sm:$0xff] }
 0x22f   :  { %1990 = vmatmul.f32.vlgmr.msrb.gmra.mxu1 %v2598_v47  ;;  %2039 = vmatpush.msra.mxu0 %v136_v13  ;;  %v368_v47 = vld [vmem:[#allocation5 + $0x9f0] sm:$0xff] }
 0x230   :  { %2058 = vmatpush.msra.mxu1 %v272_v15  ;;  %2079 = vmatpush.msra.mxu2 %v392_v34  ;;  %v456_v50 = vld [vmem:[#allocation5 + $0xcb0] sm:$0xff] }
 0x231   :  { %2098 = vmatpush.msra.mxu3 %v528_v38  ;;  %2040 = vmatpush.msra.mxu0 %v128_v16  ;;  %v56_v51 = vld [vmem:[#allocation5 + $0x30] sm:$0xff] }
 0x232   :  { %2059 = vmatpush.msra.mxu1 %v264_v17  ;;  %2080 = vmatpush.msra.mxu2 %v384_v21  ;;  %v192_v52 = vld [vmem:[#allocation5 + $0x470] sm:$0xff] }
 0x233   :  { %2099 = vmatpush.msra.mxu3 %v520_v39  ;;  %2041 = vmatpush.msra.mxu0 %v120_v42  ;;  %v312_v54 = vld [vmem:[#allocation5 + $0x830] sm:$0xff] }
 0x234   :  { %2060 = vmatpush.msra.mxu1 %v256_v44  ;;  %2081 = vmatpush.msra.mxu2 %v376_v23  ;;  %v448_v56 = vld [vmem:[#allocation5 + $0xc70] sm:$0xff] }
 0x235   :  { %2100 = vmatpush.msra.mxu3 %v512_v24  ;;  %2042 = vmatpush.msra.mxu0 %v112_v26  ;;  %v688_v63 = vld [vmem:[#allocation5 + $0x13f0] sm:$0xff] }
 0x236   :  { %2061 = vmatpush.msra.mxu1 %v248_v27  ;;  %2082 = vmatpush.msra.mxu2 %v368_v47  ;;  %v944_v57 = vld [vmem:[#allocation5 + $0x1bf0] sm:$0xff] }
 0x237   :  { %2101 = vmatpush.msra.mxu3 %v504_v28  ;;  %2043 = vmatpush.msra.mxu0 %v104_v30  ;;  %v184_v59 = vld [vmem:[#allocation5 + $0x430] sm:$0xff] }
 0x238   :  { %2062 = vmatpush.msra.mxu1 %v240_v49  ;;  %2083 = vmatpush.msra.mxu2 %v360_v31  ;;  %v440_v60 = vld [vmem:[#allocation5 + $0xc30] sm:$0xff] }
 0x239   :  { %2102 = vmatpush.msra.mxu3 %v496_v32  ;;  %2044 = vmatpush.msra.mxu0 %v96_v0  ;;  %v680_v62 = vld [vmem:[#allocation5 + $0x13b0] sm:$0xff] }
 0x23a   :  { %2063 = vmatpush.msra.mxu1 %v232_v33  ;;  %2084 = vmatpush.msra.mxu2 %v352_v53  ;;  %v816_v1 = vld [vmem:[#allocation5 + $0x17f0] sm:$0xff] }
 0x23b   :  { %2103 = vmatpush.msra.mxu3 %v488_v55  ;;  %2045 = vmatpush.msra.mxu0 %v88_v5  ;;  %v936_v2 = vld [vmem:[#allocation5 + $0x1bb0] sm:$0xff] }
 0x23c   :  { %2064 = vmatpush.msra.mxu1 %v224_v35  ;;  %2085 = vmatpush.msra.mxu2 %v344_v36  ;;  %v1072_v18 = vld [vmem:[#allocation5 + $0x1ff0] sm:$0xff] }
 0x23d   :  { %2104 = vmatpush.msra.mxu3 %v480_v37  ;;  %2046 = vmatpush.msra.mxu0 %v80_v61  ;;  %v672_v3 = vld [vmem:[#allocation5 + $0x1370] sm:$0xff] }
 0x23e   :  { %2065 = vmatpush.msra.mxu1 %v216_v40  ;;  %2086 = vmatpush.msra.mxu2 %v336_v41  ;;  %v808_v22 = vld [vmem:[#allocation5 + $0x17b0] sm:$0xff] }
 0x23f   :  { %2105 = vmatpush.msra.mxu3 %v472_v14  ;;  %2047 = vmatpush.msra.mxu0 %v72_v43  ;;  %v928_v4 = vld [vmem:[#allocation5 + $0x1b70] sm:$0xff] }
 0x240   :  { %2066 = vmatpush.msra.mxu1 %v208_v19  ;;  %2087 = vmatpush.msra.mxu2 %v328_v20  ;;  %v1064_v6 = vld [vmem:[#allocation5 + $0x1fb0] sm:$0xff] }
 0x241   :  { %2106 = vmatpush.msra.mxu3 %v464_v45  ;;  %2048 = vmatpush.msra.mxu0 %v64_v46  ;;  %v664_v7 = vld [vmem:[#allocation5 + $0x1330] sm:$0xff] }
 0x242   :  { %2067 = vmatpush.msra.mxu1 %v200_v48  ;;  %2088 = vmatpush.msra.mxu2 %v320_v25  ;;  %v800_v29 = vld [vmem:[#allocation5 + $0x1770] sm:$0xff]  ;;  %v1751_v48 = vpop.f32.mrf.mxu1 }
 0x243   :  { %2107 = vmatpush.msra.mxu3 %v456_v50  ;;  %2049 = vmatpush.msra.mxu0 %v56_v51  ;;  %v920_v58 = vld [vmem:[#allocation5 + $0x1b30] sm:$0xff] }
 0x244   :  { %2068 = vmatpush.msra.mxu1 %v192_v52  ;;  %2089 = vmatpush.msra.mxu2 %v312_v54  ;;  %v1056_v8 = vld [vmem:[#allocation5 + $0x1f70] sm:$0xff]  ;;  %v1771_v52 = vpop.f32.mrf.mxu2 }
 0x245   :  { %2108 = vmatpush.msra.mxu3 %v448_v56  ;;  %2114 = vmatpush.msrb.mxu0 %v688_v63  ;;  %v656_v9 = vld [vmem:[#allocation5 + $0x12f0] sm:$0xff] }
 0x246   :  { %2154 = vmatpush.msrb.mxu2 %v944_v57  ;;  %2069 = vmatpush.msra.mxu1 %v184_v59  ;;  %v792_v10 = vld [vmem:[#allocation5 + $0x1730] sm:$0xff] }
 0x247   :  { %2109 = vmatpush.msra.mxu3 %v440_v60  ;;  %2115 = vmatpush.msrb.mxu0 %v680_v62  ;;  %v912_v11 = vld [vmem:[#allocation5 + $0x1af0] sm:$0xff]  ;;  %v1791_v62 = vpop.f32.mrf.mxu3 }
 0x248   :  { %2134 = vmatpush.msrb.mxu1 %v816_v1  ;;  %2155 = vmatpush.msrb.mxu2 %v936_v2  ;;  %v1048_v12 = vld [vmem:[#allocation5 + $0x1f30] sm:$0xff] }
 0x249   :  { %2174 = vmatpush.msrb.mxu3 %v1072_v18  ;;  %2116 = vmatpush.msrb.mxu0 %v672_v3  ;;  %v648_v13 = vld [vmem:[#allocation5 + $0x12b0] sm:$0xff]  ;;  %v177_v3 = vld [vmem:[#allocation5 + $0x3f8] sm:$0xff] }
 0x24a   :  { %2135 = vmatpush.msrb.mxu1 %v808_v22  ;;  %2156 = vmatpush.msrb.mxu2 %v928_v4  ;;  %v784_v15 = vld [vmem:[#allocation5 + $0x16f0] sm:$0xff]  ;;  %v433_v22 = vld [vmem:[#allocation5 + $0xbf8] sm:$0xff] }
 0x24b   :  { %2175 = vmatpush.msrb.mxu3 %v1064_v6  ;;  %2117 = vmatpush.msrb.mxu0 %v664_v7  ;;  %v904_v34 = vld [vmem:[#allocation5 + $0x1ab0] sm:$0xff]  ;;  %v2612_v7 = vld [vmem:[#allocation2] sm:$0xff] }
 0x24c   :  { %2136 = vmatpush.msrb.mxu1 %v800_v29  ;;  %2157 = vmatpush.msrb.mxu2 %v920_v58  ;;  %v1040_v38 = vld [vmem:[#allocation5 + $0x1ef0] sm:$0xff] }
 0x24d   :  { %2176 = vmatpush.msrb.mxu3 %v1056_v8  ;;  %2118 = vmatpush.msrb.mxu0 %v656_v9  ;;  %v640_v16 = vld [vmem:[#allocation5 + $0x1270] sm:$0xff]  ;;  %v2615_v8 = vld [vmem:[#allocation2 + $0x18] sm:$0xff] }
 0x24e   :  { %2137 = vmatpush.msrb.mxu1 %v792_v10  ;;  %2158 = vmatpush.msrb.mxu2 %v912_v11  ;;  %v776_v17 = vld [vmem:[#allocation5 + $0x16b0] sm:$0xff]  ;;  %v169_v9 = vld [vmem:[#allocation5 + $0x3b8] sm:$0xff] }
 0x24f   :  { %2177 = vmatpush.msrb.mxu3 %v1048_v12  ;;  %2119 = vmatpush.msrb.mxu0 %v648_v13  ;;  %v896_v21 = vld [vmem:[#allocation5 + $0x1a70] sm:$0xff]  ;;  %v305_v10 = vld [vmem:[#allocation5 + $0x7f8] sm:$0xff] }
 0x250   :  { %2138 = vmatpush.msrb.mxu1 %v784_v15  ;;  %v1032_v39 = vld [vmem:[#allocation5 + $0x1eb0] sm:$0xff]  ;;  %2159 = vmatpush.msrb.mxu2 %v904_v34  ;;  %v1731_v41 = vpop.f32.mrf.mxu0  ;;  %v425_v11 = vld [vmem:[#allocation5 + $0xbb8] sm:$0xff]  ;;  %v1831_v13 = vpop.f32.mrf.mxu1  ;;  %v2618_v15 = vld [vmem:[#allocation2 + $0x8] sm:$0xff] }
 0x251   :  { %2178 = vmatpush.msrb.mxu3 %v1040_v38  ;;  %v632_v42 = vld [vmem:[#allocation5 + $0x1230] sm:$0xff]  ;;  %2120 = vmatpush.msrb.mxu0 %v640_v16  ;;  %v1752_v51 = vadd.f32 %v1751_v48, %v1731_v41  ;;  %v561_v12 = vld [vmem:[#allocation5 + $0xff8] sm:$0xff] }
 0x252   :  { %v768_v44 = vld [vmem:[#allocation5 + $0x1670] sm:$0xff]  ;;  %2139 = vmatpush.msrb.mxu1 %v776_v17  ;;  %2160 = vmatpush.msrb.mxu2 %v896_v21  ;;  %v161_v34 = vld [vmem:[#allocation5 + $0x378] sm:$0xff] }
 0x253   :  { %v888_v23 = vld [vmem:[#allocation5 + $0x1a30] sm:$0xff]  ;;  %2179 = vmatpush.msrb.mxu3 %v1032_v39  ;;  %2121 = vmatpush.msrb.mxu0 %v632_v42  ;;  %v1772_v57 = vadd.f32 %v1771_v52, %v1752_v51  ;;  %v297_v38 = vld [vmem:[#allocation5 + $0x7b8] sm:$0xff] }
 0x254   :  { %v1024_v24 = vld [vmem:[#allocation5 + $0x1e70] sm:$0xff]  ;;  %2140 = vmatpush.msrb.mxu1 %v768_v44  ;;  %2161 = vmatpush.msrb.mxu2 %v888_v23  ;;  %v1851_v17 = vpop.f32.mrf.mxu2  ;;  %v417_v21 = vld [vmem:[#allocation5 + $0xb78] sm:$0xff] }
 0x255   :  { %v624_v26 = vld [vmem:[#allocation5 + $0x11f0] sm:$0xff]  ;;  %2180 = vmatpush.msrb.mxu3 %v1024_v24  ;;  %v1792_v2 = vadd.f32 %v1791_v62, %v1772_v57  ;;  %2050 = vmatmul.f32.vlgmr.msra.gmra.mxu0 %v2612_v7  ;;  %v553_v39 = vld [vmem:[#allocation5 + $0xfb8] sm:$0xff] }
 0x256   :  { %v760_v27 = vld [vmem:[#allocation5 + $0x1630] sm:$0xff]  ;;  %2122 = vmatpush.msrb.mxu0 %v624_v26  ;;  %2110 = vmatmul.f32.vlgmr.msra.gmra.mxu3 %v2615_v8  ;;  %v153_v42 = vld [vmem:[#allocation5 + $0x338] sm:$0xff] }
 0x257   :  { %v880_v47 = vld [vmem:[#allocation5 + $0x19f0] sm:$0xff]  ;;  %2141 = vmatpush.msrb.mxu1 %v760_v27  ;;  %v289_v23 = vld [vmem:[#allocation5 + $0x778] sm:$0xff] }
 0x258   :  { %v1016_v28 = vld [vmem:[#allocation5 + $0x1e30] sm:$0xff]  ;;  %2162 = vmatpush.msrb.mxu2 %v880_v47  ;;  %v1811_v6 = vpop.f32.mrf.mxu0  ;;  %2070 = vmatmul.f32.vlgmr.msra.gmra.mxu1 %v2618_v15  ;;  %v409_v24 = vld [vmem:[#allocation5 + $0xb38] sm:$0xff] }
 0x259   :  { %v616_v30 = vld [vmem:[#allocation5 + $0x11b0] sm:$0xff]  ;;  %2181 = vmatpush.msrb.mxu3 %v1016_v28  ;;  %v1812_v58 = vadd.f32 %v1811_v6, %v1792_v2  ;;  %v545_v27 = vld [vmem:[#allocation5 + $0xf78] sm:$0xff] }
 0x25a   :  { %v752_v49 = vld [vmem:[#allocation5 + $0x15f0] sm:$0xff]  ;;  %2123 = vmatpush.msrb.mxu0 %v616_v30  ;;  %v145_v30 = vld [vmem:[#allocation5 + $0x2f8] sm:$0xff] }
 0x25b   :  { %v872_v31 = vld [vmem:[#allocation5 + $0x19b0] sm:$0xff]  ;;  %2142 = vmatpush.msrb.mxu1 %v752_v49  ;;  %v1832_v16 = vadd.f32 %v1831_v13, %v1812_v58  ;;  %v281_v49 = vld [vmem:[#allocation5 + $0x738] sm:$0xff] }
 0x25c   :  { %v1008_v32 = vld [vmem:[#allocation5 + $0x1df0] sm:$0xff]  ;;  %2163 = vmatpush.msrb.mxu2 %v872_v31  ;;  %v401_v31 = vld [vmem:[#allocation5 + $0xaf8] sm:$0xff] }
 0x25d   :  { %v608_v0 = vld [vmem:[#allocation5 + $0x1170] sm:$0xff]  ;;  %2182 = vmatpush.msrb.mxu3 %v1008_v32  ;;  %v1852_v44 = vadd.f32 %v1851_v17, %v1832_v16  ;;  %v2624_v32 = vld [vmem:[#allocation2 + $0x20] sm:$0xff]  ;;  %v521_v41 = vld [vmem:[#allocation5 + $0xeb8] sm:$0xff] }
 0x25e   :  { %v744_v33 = vld [vmem:[#allocation5 + $0x15b0] sm:$0xff]  ;;  %2124 = vmatpush.msrb.mxu0 %v608_v0  ;;  %v1871_v26 = vpop.f32.mrf.mxu3  ;;  %v537_v0 = vld [vmem:[#allocation5 + $0xf38] sm:$0xff] }
 0x25f   :  { %v864_v53 = vld [vmem:[#allocation5 + $0x1970] sm:$0xff]  ;;  %2143 = vmatpush.msrb.mxu1 %v744_v33  ;;  %v1872_v47 = vadd.f32 %v1871_v26, %v1852_v44  ;;  %v2627_v33 = vld [vmem:[#allocation2 + $0x38] sm:$0xff] }
 0x260   :  { %v1000_v55 = vld [vmem:[#allocation5 + $0x1db0] sm:$0xff]  ;;  %2164 = vmatpush.msrb.mxu2 %v864_v53  ;;  %v137_v53 = vld [vmem:[#allocation5 + $0x2b8] sm:$0xff] }
 0x261   :  { %v600_v5 = vld [vmem:[#allocation5 + $0x1130] sm:$0xff]  ;;  %2183 = vmatpush.msrb.mxu3 %v1000_v55  ;;  %2358 = vst [vmem:[#allocation7 + $0x20] sm:$0xff] %v1872_v47  ;;  %v273_v55 = vld [vmem:[#allocation5 + $0x6f8] sm:$0xff] }
 0x262   :  { %v736_v35 = vld [vmem:[#allocation5 + $0x1570] sm:$0xff]  ;;  %2125 = vmatpush.msrb.mxu0 %v600_v5  ;;  %v393_v5 = vld [vmem:[#allocation5 + $0xab8] sm:$0xff] }
 0x263   :  { %v856_v36 = vld [vmem:[#allocation5 + $0x1930] sm:$0xff]  ;;  %2144 = vmatpush.msrb.mxu1 %v736_v35  ;;  %v529_v35 = vld [vmem:[#allocation5 + $0xef8] sm:$0xff] }
 0x264   :  { %v992_v37 = vld [vmem:[#allocation5 + $0x1d70] sm:$0xff]  ;;  %2165 = vmatpush.msrb.mxu2 %v856_v36  ;;  %v2630_v36 = vld [vmem:[#allocation2 + $0x28] sm:$0xff]  ;;  %v369_v48 = vld [vmem:[#allocation5 + $0x9f8] sm:$0xff] }
 0x265   :  { %v592_v61 = vld [vmem:[#allocation5 + $0x10f0] sm:$0xff]  ;;  %2184 = vmatpush.msrb.mxu3 %v992_v37  ;;  %v129_v37 = vld [vmem:[#allocation5 + $0x278] sm:$0xff] }
 0x266   :  { %v728_v40 = vld [vmem:[#allocation5 + $0x1530] sm:$0xff]  ;;  %2126 = vmatpush.msrb.mxu0 %v592_v61  ;;  %v265_v61 = vld [vmem:[#allocation5 + $0x6b8] sm:$0xff] }
 0x267   :  { %v848_v14 = vld [vmem:[#allocation5 + $0x18f0] sm:$0xff]  ;;  %2145 = vmatpush.msrb.mxu1 %v728_v40  ;;  %v385_v40 = vld [vmem:[#allocation5 + $0xa78] sm:$0xff] }
 0x268   :  { %v984_v43 = vld [vmem:[#allocation5 + $0x1d30] sm:$0xff]  ;;  %2166 = vmatpush.msrb.mxu2 %v848_v14  ;;  %v121_v14 = vld [vmem:[#allocation5 + $0x238] sm:$0xff] }
 0x269   :  { %v584_v19 = vld [vmem:[#allocation5 + $0x10b0] sm:$0xff]  ;;  %2185 = vmatpush.msrb.mxu3 %v984_v43  ;;  %v257_v43 = vld [vmem:[#allocation5 + $0x678] sm:$0xff] }
 0x26a   :  { %v720_v20 = vld [vmem:[#allocation5 + $0x14f0] sm:$0xff]  ;;  %2127 = vmatpush.msrb.mxu0 %v584_v19  ;;  %v377_v19 = vld [vmem:[#allocation5 + $0xa38] sm:$0xff] }
 0x26b   :  { %v840_v45 = vld [vmem:[#allocation5 + $0x18b0] sm:$0xff]  ;;  %2146 = vmatpush.msrb.mxu1 %v720_v20  ;;  %v513_v20 = vld [vmem:[#allocation5 + $0xe78] sm:$0xff] }
 0x26c   :  { %v976_v46 = vld [vmem:[#allocation5 + $0x1cf0] sm:$0xff]  ;;  %2167 = vmatpush.msrb.mxu2 %v840_v45  ;;  %v113_v45 = vld [vmem:[#allocation5 + $0x1f8] sm:$0xff] }
 0x26d   :  { %v576_v25 = vld [vmem:[#allocation5 + $0x1070] sm:$0xff]  ;;  %2186 = vmatpush.msrb.mxu3 %v976_v46  ;;  %v249_v46 = vld [vmem:[#allocation5 + $0x638] sm:$0xff] }
 0x26e   :  { %v712_v50 = vld [vmem:[#allocation5 + $0x14b0] sm:$0xff]  ;;  %2128 = vmatpush.msrb.mxu0 %v576_v25  ;;  %v505_v25 = vld [vmem:[#allocation5 + $0xe38] sm:$0xff] }
 0x26f   :  { %v832_v54 = vld [vmem:[#allocation5 + $0x1870] sm:$0xff]  ;;  %2147 = vmatpush.msrb.mxu1 %v712_v50  ;;  %v105_v50 = vld [vmem:[#allocation5 + $0x1b8] sm:$0xff] }
 0x270   :  { %v968_v56 = vld [vmem:[#allocation5 + $0x1cb0] sm:$0xff]  ;;  %2168 = vmatpush.msrb.mxu2 %v832_v54  ;;  %v241_v51 = vld [vmem:[#allocation5 + $0x5f8] sm:$0xff] }
 0x271   :  { %v568_v63 = vld [vmem:[#allocation5 + $0x1030] sm:$0xff]  ;;  %2187 = vmatpush.msrb.mxu3 %v968_v56  ;;  %v361_v52 = vld [vmem:[#allocation5 + $0x9b8] sm:$0xff] }
 0x272   :  { %v704_v59 = vld [vmem:[#allocation5 + $0x1470] sm:$0xff]  ;;  %2129 = vmatpush.msrb.mxu0 %v568_v63  ;;  %v497_v54 = vld [vmem:[#allocation5 + $0xdf8] sm:$0xff] }
 0x273   :  { %v824_v60 = vld [vmem:[#allocation5 + $0x1830] sm:$0xff]  ;;  %2148 = vmatpush.msrb.mxu1 %v704_v59  ;;  %2130 = vmatmul.f32.vlgmr.msrb.gmra.mxu0 %v2624_v32  ;;  %v97_v56 = vld [vmem:[#allocation5 + $0x178] sm:$0xff] }
 0x274   :  { %v960_v1 = vld [vmem:[#allocation5 + $0x1c70] sm:$0xff]  ;;  %2169 = vmatpush.msrb.mxu2 %v824_v60  ;;  %2194 = vmatpush.msra.mxu0 %v177_v3  ;;  %v233_v63 = vld [vmem:[#allocation5 + $0x5b8] sm:$0xff] }
 0x275   :  { %v2609_v18 = vld [vmem:[#allocation2 + $0x10] sm:$0xff]  ;;  %2188 = vmatpush.msrb.mxu3 %v960_v1  ;;  %v353_v57 = vld [vmem:[#allocation5 + $0x978] sm:$0xff] }
 0x276   :  { %2090 = vmatmul.f32.vlgmr.msra.gmra.mxu2 %v2609_v18  ;;  %v696_v4 = vld [vmem:[#allocation5 + $0x1430] sm:$0xff]  ;;  %2195 = vmatpush.msra.mxu0 %v169_v9  ;;  %v489_v59 = vld [vmem:[#allocation5 + $0xdb8] sm:$0xff] }
 0x277   :  { %v952_v29 = vld [vmem:[#allocation5 + $0x1c30] sm:$0xff]  ;;  %2234 = vmatpush.msra.mxu2 %v433_v22  ;;  %2149 = vmatpush.msrb.mxu1 %v696_v4  ;;  %v89_v60 = vld [vmem:[#allocation5 + $0x138] sm:$0xff] }
 0x278   :  { %2189 = vmatpush.msrb.mxu3 %v952_v29  ;;  %2196 = vmatpush.msra.mxu0 %v161_v34  ;;  %v2621_v28 = vld [vmem:[#allocation2 + $0x30] sm:$0xff]  ;;  %v225_v62 = vld [vmem:[#allocation5 + $0x578] sm:$0xff] }
 0x279   :  { %2214 = vmatpush.msra.mxu1 %v305_v10  ;;  %2235 = vmatpush.msra.mxu2 %v425_v11  ;;  %v345_v1 = vld [vmem:[#allocation5 + $0x938] sm:$0xff] }
 0x27a   :  { %2254 = vmatpush.msra.mxu3 %v561_v12  ;;  %2197 = vmatpush.msra.mxu0 %v153_v42  ;;  %v481_v2 = vld [vmem:[#allocation5 + $0xd78] sm:$0xff] }
 0x27b   :  { %2215 = vmatpush.msra.mxu1 %v297_v38  ;;  %2236 = vmatpush.msra.mxu2 %v417_v21  ;;  %v81_v3 = vld [vmem:[#allocation5 + $0xf8] sm:$0xff] }
 0x27c   :  { %2255 = vmatpush.msra.mxu3 %v553_v39  ;;  %2198 = vmatpush.msra.mxu0 %v145_v30  ;;  %v217_v22 = vld [vmem:[#allocation5 + $0x538] sm:$0xff] }
 0x27d   :  { %2216 = vmatpush.msra.mxu1 %v289_v23  ;;  %2237 = vmatpush.msra.mxu2 %v409_v24  ;;  %v337_v4 = vld [vmem:[#allocation5 + $0x8f8] sm:$0xff] }
 0x27e   :  { %2170 = vmatmul.f32.vlgmr.msrb.gmra.mxu2 %v2621_v28  ;;  %2256 = vmatpush.msra.mxu3 %v545_v27  ;;  %v473_v6 = vld [vmem:[#allocation5 + $0xd38] sm:$0xff] }
 0x27f   :  { %2190 = vmatmul.f32.vlgmr.msrb.gmra.mxu3 %v2627_v33  ;;  %2217 = vmatpush.msra.mxu1 %v281_v49  ;;  %v73_v29 = vld [vmem:[#allocation5 + $0xb8] sm:$0xff] }
 0x280   :  { %2238 = vmatpush.msra.mxu2 %v401_v31  ;;  %2257 = vmatpush.msra.mxu3 %v537_v0  ;;  %v209_v58 = vld [vmem:[#allocation5 + $0x4f8] sm:$0xff] }
 0x281   :  { %2150 = vmatmul.f32.vlgmr.msrb.gmra.mxu1 %v2630_v36  ;;  %2199 = vmatpush.msra.mxu0 %v137_v53  ;;  %v329_v9 = vld [vmem:[#allocation5 + $0x8b8] sm:$0xff] }
 0x282   :  { %2218 = vmatpush.msra.mxu1 %v273_v55  ;;  %2239 = vmatpush.msra.mxu2 %v393_v5  ;;  %v465_v10 = vld [vmem:[#allocation5 + $0xcf8] sm:$0xff] }
 0x283   :  { %2258 = vmatpush.msra.mxu3 %v529_v35  ;;  %2200 = vmatpush.msra.mxu0 %v129_v37  ;;  %v65_v11 = vld [vmem:[#allocation5 + $0x78] sm:$0xff] }
 0x284   :  { %2219 = vmatpush.msra.mxu1 %v265_v61  ;;  %2240 = vmatpush.msra.mxu2 %v385_v40  ;;  %v201_v12 = vld [vmem:[#allocation5 + $0x4b8] sm:$0xff] }
 0x285   :  { %2259 = vmatpush.msra.mxu3 %v521_v41  ;;  %2201 = vmatpush.msra.mxu0 %v121_v14  ;;  %v321_v13 = vld [vmem:[#allocation5 + $0x878] sm:$0xff] }
 0x286   :  { %2220 = vmatpush.msra.mxu1 %v257_v43  ;;  %2241 = vmatpush.msra.mxu2 %v377_v19  ;;  %v457_v34 = vld [vmem:[#allocation5 + $0xcb8] sm:$0xff] }
 0x287   :  { %2260 = vmatpush.msra.mxu3 %v513_v20  ;;  %2202 = vmatpush.msra.mxu0 %v113_v45  ;;  %v57_v38 = vld [vmem:[#allocation5 + $0x38] sm:$0xff] }
 0x288   :  { %2221 = vmatpush.msra.mxu1 %v249_v46  ;;  %2242 = vmatpush.msra.mxu2 %v369_v48  ;;  %v193_v16 = vld [vmem:[#allocation5 + $0x478] sm:$0xff] }
 0x289   :  { %2261 = vmatpush.msra.mxu3 %v505_v25  ;;  %2203 = vmatpush.msra.mxu0 %v105_v50  ;;  %v313_v17 = vld [vmem:[#allocation5 + $0x838] sm:$0xff] }
 0x28a   :  { %2222 = vmatpush.msra.mxu1 %v241_v51  ;;  %2243 = vmatpush.msra.mxu2 %v361_v52  ;;  %v449_v21 = vld [vmem:[#allocation5 + $0xc78] sm:$0xff] }
 0x28b   :  { %2262 = vmatpush.msra.mxu3 %v497_v54  ;;  %2204 = vmatpush.msra.mxu0 %v97_v56  ;;  %v689_v39 = vld [vmem:[#allocation5 + $0x13f8] sm:$0xff] }
 0x28c   :  { %2223 = vmatpush.msra.mxu1 %v233_v63  ;;  %2244 = vmatpush.msra.mxu2 %v353_v57  ;;  %v945_v42 = vld [vmem:[#allocation5 + $0x1bf8] sm:$0xff] }
 0x28d   :  { %2263 = vmatpush.msra.mxu3 %v489_v59  ;;  %2205 = vmatpush.msra.mxu0 %v89_v60  ;;  %v185_v44 = vld [vmem:[#allocation5 + $0x438] sm:$0xff] }
 0x28e   :  { %2224 = vmatpush.msra.mxu1 %v225_v62  ;;  %2245 = vmatpush.msra.mxu2 %v345_v1  ;;  %v441_v23 = vld [vmem:[#allocation5 + $0xc38] sm:$0xff] }
 0x28f   :  { %2264 = vmatpush.msra.mxu3 %v481_v2  ;;  %2206 = vmatpush.msra.mxu0 %v81_v3  ;;  %v681_v24 = vld [vmem:[#allocation5 + $0x13b8] sm:$0xff] }
 0x290   :  { %2225 = vmatpush.msra.mxu1 %v217_v22  ;;  %2246 = vmatpush.msra.mxu2 %v337_v4  ;;  %v817_v26 = vld [vmem:[#allocation5 + $0x17f8] sm:$0xff] }
 0x291   :  { %2265 = vmatpush.msra.mxu3 %v473_v6  ;;  %2207 = vmatpush.msra.mxu0 %v73_v29  ;;  %v937_v27 = vld [vmem:[#allocation5 + $0x1bb8] sm:$0xff] }
 0x292   :  { %2226 = vmatpush.msra.mxu1 %v209_v58  ;;  %2247 = vmatpush.msra.mxu2 %v329_v9  ;;  %v1073_v47 = vld [vmem:[#allocation5 + $0x1ff8] sm:$0xff] }
 0x293   :  { %2266 = vmatpush.msra.mxu3 %v465_v10  ;;  %2208 = vmatpush.msra.mxu0 %v65_v11  ;;  %v673_v30 = vld [vmem:[#allocation5 + $0x1378] sm:$0xff]  ;;  %v1891_v11 = vpop.f32.mrf.mxu0 }
 0x294   :  { %2227 = vmatpush.msra.mxu1 %v201_v12  ;;  %2248 = vmatpush.msra.mxu2 %v321_v13  ;;  %v809_v49 = vld [vmem:[#allocation5 + $0x17b8] sm:$0xff] }
 0x295   :  { %2267 = vmatpush.msra.mxu3 %v457_v34  ;;  %2209 = vmatpush.msra.mxu0 %v57_v38  ;;  %v929_v31 = vld [vmem:[#allocation5 + $0x1b78] sm:$0xff] }
 0x296   :  { %2228 = vmatpush.msra.mxu1 %v193_v16  ;;  %2249 = vmatpush.msra.mxu2 %v313_v17  ;;  %v1065_v0 = vld [vmem:[#allocation5 + $0x1fb8] sm:$0xff]  ;;  %v1911_v16 = vpop.f32.mrf.mxu1 }
 0x297   :  { %2268 = vmatpush.msra.mxu3 %v449_v21  ;;  %2274 = vmatpush.msrb.mxu0 %v689_v39  ;;  %v665_v53 = vld [vmem:[#allocation5 + $0x1338] sm:$0xff]  ;;  %v1912_v39 = vadd.f32 %v1911_v16, %v1891_v11 }
 0x298   :  { %2314 = vmatpush.msrb.mxu2 %v945_v42  ;;  %2229 = vmatpush.msra.mxu1 %v185_v44  ;;  %v801_v55 = vld [vmem:[#allocation5 + $0x1778] sm:$0xff]  ;;  %v1931_v42 = vpop.f32.mrf.mxu2 }
 0x299   :  { %2269 = vmatpush.msra.mxu3 %v441_v23  ;;  %2275 = vmatpush.msrb.mxu0 %v681_v24  ;;  %v921_v5 = vld [vmem:[#allocation5 + $0x1b38] sm:$0xff] }
 0x29a   :  { %2294 = vmatpush.msrb.mxu1 %v817_v26  ;;  %2315 = vmatpush.msrb.mxu2 %v937_v27  ;;  %v1057_v35 = vld [vmem:[#allocation5 + $0x1f78] sm:$0xff]  ;;  %v1932_v26 = vadd.f32 %v1931_v42, %v1912_v39 }
 0x29b   :  { %2334 = vmatpush.msrb.mxu3 %v1073_v47  ;;  %2276 = vmatpush.msrb.mxu0 %v673_v30  ;;  %v657_v37 = vld [vmem:[#allocation5 + $0x12f8] sm:$0xff] }
 0x29c   :  { %2295 = vmatpush.msrb.mxu1 %v809_v49  ;;  %2316 = vmatpush.msrb.mxu2 %v929_v31  ;;  %v793_v61 = vld [vmem:[#allocation5 + $0x1738] sm:$0xff] }
 0x29d   :  { %2335 = vmatpush.msrb.mxu3 %v1065_v0  ;;  %2277 = vmatpush.msrb.mxu0 %v665_v53  ;;  %v913_v40 = vld [vmem:[#allocation5 + $0x1af8] sm:$0xff] }
 0x29e   :  { %2296 = vmatpush.msrb.mxu1 %v801_v55  ;;  %v1049_v41 = vld [vmem:[#allocation5 + $0x1f38] sm:$0xff]  ;;  %2317 = vmatpush.msrb.mxu2 %v921_v5 }
 0x29f   :  { %2336 = vmatpush.msrb.mxu3 %v1057_v35  ;;  %v649_v14 = vld [vmem:[#allocation5 + $0x12b8] sm:$0xff]  ;;  %2278 = vmatpush.msrb.mxu0 %v657_v37 }
 0x2a0   :  { %v785_v43 = vld [vmem:[#allocation5 + $0x16f8] sm:$0xff]  ;;  %2297 = vmatpush.msrb.mxu1 %v793_v61  ;;  %2318 = vmatpush.msrb.mxu2 %v913_v40 }
 0x2a1   :  { %v905_v19 = vld [vmem:[#allocation5 + $0x1ab8] sm:$0xff]  ;;  %2337 = vmatpush.msrb.mxu3 %v1049_v41  ;;  %2279 = vmatpush.msrb.mxu0 %v649_v14 }
 0x2a2   :  { %v1041_v20 = vld [vmem:[#allocation5 + $0x1ef8] sm:$0xff]  ;;  %2298 = vmatpush.msrb.mxu1 %v785_v43  ;;  %2319 = vmatpush.msrb.mxu2 %v905_v19 }
 0x2a3   :  { %v641_v45 = vld [vmem:[#allocation5 + $0x1278] sm:$0xff]  ;;  %2338 = vmatpush.msrb.mxu3 %v1041_v20  ;;  %2250 = vmatmul.f32.vlgmr.msra.gmra.mxu2 %v2609_v18 }
 0x2a4   :  { %v777_v46 = vld [vmem:[#allocation5 + $0x16b8] sm:$0xff]  ;;  %2280 = vmatpush.msrb.mxu0 %v641_v45  ;;  %2270 = vmatmul.f32.vlgmr.msra.gmra.mxu3 %v2615_v8  ;;  %v1951_v8 = vpop.f32.mrf.mxu3 }
 0x2a5   :  { %v897_v48 = vld [vmem:[#allocation5 + $0x1a78] sm:$0xff]  ;;  %2299 = vmatpush.msrb.mxu1 %v777_v46  ;;  %2210 = vmatmul.f32.vlgmr.msra.gmra.mxu0 %v2612_v7  ;;  %v1952_v49 = vadd.f32 %v1951_v8, %v1932_v26 }
 0x2a6   :  { %v1033_v25 = vld [vmem:[#allocation5 + $0x1eb8] sm:$0xff]  ;;  %2320 = vmatpush.msrb.mxu2 %v897_v48  ;;  %2230 = vmatmul.f32.vlgmr.msra.gmra.mxu1 %v2618_v15  ;;  %v1971_v15 = vpop.f32.mrf.mxu0 }
 0x2a7   :  { %v633_v50 = vld [vmem:[#allocation5 + $0x1238] sm:$0xff]  ;;  %2339 = vmatpush.msrb.mxu3 %v1033_v25  ;;  %v1972_v5 = vadd.f32 %v1971_v15, %v1952_v49  ;;  %v2011_v61 = vpop.f32.mrf.mxu2 }
 0x2a8   :  { %v769_v51 = vld [vmem:[#allocation5 + $0x1678] sm:$0xff]  ;;  %2281 = vmatpush.msrb.mxu0 %v633_v50 }
 0x2a9   :  { %v889_v52 = vld [vmem:[#allocation5 + $0x1a38] sm:$0xff]  ;;  %2300 = vmatpush.msrb.mxu1 %v769_v51 }
 0x2aa   :  { %v1025_v54 = vld [vmem:[#allocation5 + $0x1e78] sm:$0xff]  ;;  %2321 = vmatpush.msrb.mxu2 %v889_v52 }
 0x2ab   :  { %v625_v56 = vld [vmem:[#allocation5 + $0x11f8] sm:$0xff]  ;;  %2340 = vmatpush.msrb.mxu3 %v1025_v54 }
 0x2ac   :  { %v761_v63 = vld [vmem:[#allocation5 + $0x1638] sm:$0xff]  ;;  %2282 = vmatpush.msrb.mxu0 %v625_v56  ;;  %v1991_v35 = vpop.f32.mrf.mxu1 }
 0x2ad   :  { %v881_v57 = vld [vmem:[#allocation5 + $0x19f8] sm:$0xff]  ;;  %2301 = vmatpush.msrb.mxu1 %v761_v63  ;;  %v1992_v37 = vadd.f32 %v1991_v35, %v1972_v5 }
 0x2ae   :  { %v1017_v59 = vld [vmem:[#allocation5 + $0x1e38] sm:$0xff]  ;;  %2322 = vmatpush.msrb.mxu2 %v881_v57 }
 0x2af   :  { %v617_v60 = vld [vmem:[#allocation5 + $0x11b8] sm:$0xff]  ;;  %2341 = vmatpush.msrb.mxu3 %v1017_v59  ;;  %v2012_v40 = vadd.f32 %v2011_v61, %v1992_v37 }
 0x2b0   :  { %v753_v62 = vld [vmem:[#allocation5 + $0x15f8] sm:$0xff]  ;;  %2283 = vmatpush.msrb.mxu0 %v617_v60  ;;  %v2031_v41 = vpop.f32.mrf.mxu3 }
 0x2b1   :  { %v873_v1 = vld [vmem:[#allocation5 + $0x19b8] sm:$0xff]  ;;  %2302 = vmatpush.msrb.mxu1 %v753_v62  ;;  %v2032_v14 = vadd.f32 %v2031_v41, %v2012_v40 }
 0x2b2   :  { %v1009_v2 = vld [vmem:[#allocation5 + $0x1df8] sm:$0xff]  ;;  %2323 = vmatpush.msrb.mxu2 %v873_v1 }
 0x2b3   :  { %v609_v3 = vld [vmem:[#allocation5 + $0x1178] sm:$0xff]  ;;  %2342 = vmatpush.msrb.mxu3 %v1009_v2  ;;  %2359 = vst [vmem:[#allocation7 + $0x28] sm:$0xff] %v2032_v14 }
 0x2b4   :  { %v745_v22 = vld [vmem:[#allocation5 + $0x15b8] sm:$0xff]  ;;  %2284 = vmatpush.msrb.mxu0 %v609_v3 }
 0x2b5   :  { %v865_v4 = vld [vmem:[#allocation5 + $0x1978] sm:$0xff]  ;;  %2303 = vmatpush.msrb.mxu1 %v745_v22 }
 0x2b6   :  { %v1001_v6 = vld [vmem:[#allocation5 + $0x1db8] sm:$0xff]  ;;  %2324 = vmatpush.msrb.mxu2 %v865_v4 }
 0x2b7   :  { %v601_v29 = vld [vmem:[#allocation5 + $0x1138] sm:$0xff]  ;;  %2343 = vmatpush.msrb.mxu3 %v1001_v6 }
 0x2b8   :  { %v737_v58 = vld [vmem:[#allocation5 + $0x1578] sm:$0xff]  ;;  %2285 = vmatpush.msrb.mxu0 %v601_v29 }
 0x2b9   :  { %v857_v9 = vld [vmem:[#allocation5 + $0x1938] sm:$0xff]  ;;  %2304 = vmatpush.msrb.mxu1 %v737_v58 }
 0x2ba   :  { %v993_v10 = vld [vmem:[#allocation5 + $0x1d78] sm:$0xff]  ;;  %2325 = vmatpush.msrb.mxu2 %v857_v9 }
 0x2bb   :  { %v593_v12 = vld [vmem:[#allocation5 + $0x10f8] sm:$0xff]  ;;  %2344 = vmatpush.msrb.mxu3 %v993_v10 }
 0x2bc   :  { %v729_v13 = vld [vmem:[#allocation5 + $0x1538] sm:$0xff]  ;;  %2286 = vmatpush.msrb.mxu0 %v593_v12 }
 0x2bd   :  { %v849_v34 = vld [vmem:[#allocation5 + $0x18f8] sm:$0xff]  ;;  %2305 = vmatpush.msrb.mxu1 %v729_v13 }
 0x2be   :  { %v985_v38 = vld [vmem:[#allocation5 + $0x1d38] sm:$0xff]  ;;  %2326 = vmatpush.msrb.mxu2 %v849_v34 }
 0x2bf   :  { %v585_v17 = vld [vmem:[#allocation5 + $0x10b8] sm:$0xff]  ;;  %2345 = vmatpush.msrb.mxu3 %v985_v38 }
 0x2c0   :  { %v721_v21 = vld [vmem:[#allocation5 + $0x14f8] sm:$0xff]  ;;  %2287 = vmatpush.msrb.mxu0 %v585_v17 }
 0x2c1   :  { %v841_v18 = vld [vmem:[#allocation5 + $0x18b8] sm:$0xff]  ;;  %2306 = vmatpush.msrb.mxu1 %v721_v21 }
 0x2c2   :  { %v977_v44 = vld [vmem:[#allocation5 + $0x1cf8] sm:$0xff]  ;;  %2327 = vmatpush.msrb.mxu2 %v841_v18 }
 0x2c3   :  { %v577_v23 = vld [vmem:[#allocation5 + $0x1078] sm:$0xff]  ;;  %2346 = vmatpush.msrb.mxu3 %v977_v44 }
 0x2c4   :  { %v713_v24 = vld [vmem:[#allocation5 + $0x14b8] sm:$0xff]  ;;  %2288 = vmatpush.msrb.mxu0 %v577_v23 }
 0x2c5   :  { %v833_v7 = vld [vmem:[#allocation5 + $0x1878] sm:$0xff]  ;;  %2307 = vmatpush.msrb.mxu1 %v713_v24 }
 0x2c6   :  { %v969_v27 = vld [vmem:[#allocation5 + $0x1cb8] sm:$0xff]  ;;  %2328 = vmatpush.msrb.mxu2 %v833_v7 }
 0x2c7   :  { %v569_v47 = vld [vmem:[#allocation5 + $0x1038] sm:$0xff]  ;;  %2347 = vmatpush.msrb.mxu3 %v969_v27 }
 0x2c8   :  { %v705_v30 = vld [vmem:[#allocation5 + $0x1478] sm:$0xff]  ;;  %2289 = vmatpush.msrb.mxu0 %v569_v47 }
 0x2c9   :  { %v825_v31 = vld [vmem:[#allocation5 + $0x1838] sm:$0xff]  ;;  %2308 = vmatpush.msrb.mxu1 %v705_v30  ;;  %2290 = vmatmul.f32.vlgmr.msrb.gmra.mxu0 %v2624_v32 }
 0x2ca   :  { %v961_v0 = vld [vmem:[#allocation5 + $0x1c78] sm:$0xff]  ;;  %2329 = vmatpush.msrb.mxu2 %v825_v31 }
 0x2cb   :  { %v697_v53 = vld [vmem:[#allocation5 + $0x1438] sm:$0xff]  ;;  %2348 = vmatpush.msrb.mxu3 %v961_v0  ;;  %2330 = vmatmul.f32.vlgmr.msrb.gmra.mxu2 %v2621_v28 }
 0x2cc   :  { %v953_v55 = vld [vmem:[#allocation5 + $0x1c38] sm:$0xff]  ;;  %2309 = vmatpush.msrb.mxu1 %v697_v53 }
 0x2cd   :  { %2349 = vmatpush.msrb.mxu3 %v953_v55  ;;  %2310 = vmatmul.f32.vlgmr.msrb.gmra.mxu1 %v2630_v36 }
 0x2ce   :  { %2350 = vmatmul.f32.vlgmr.msrb.gmra.mxu3 %v2627_v33 }
 0x2d2   :  { %v2051_v43 = vpop.f32.mrf.mxu0 }
 0x2d5   :  { %v2071_v19 = vpop.f32.mrf.mxu1 }
 0x2d6   :  { %v2072_v20 = vadd.f32 %v2071_v19, %v2051_v43 }
 0x2d9   :  { %v2111_v46 = vpop.f32.mrf.mxu3 }
 0x2f0   :  { %v2131_v48 = vpop.f32.mrf.mxu0 }
 0x2f9   :  { %v2091_v45 = vpop.f32.mrf.mxu2 }
 0x2fa   :  { %v2092_v32 = vadd.f32 %v2091_v45, %v2072_v20 }
 0x2fc   :  { %v2112_v28 = vadd.f32 %v2111_v46, %v2092_v32 }
 0x2fe   :  { %v2132_v25 = vadd.f32 %v2131_v48, %v2112_v28  ;;  %v2151_v50 = vpop.f32.mrf.mxu1 }
 0x300   :  { %v2152_v51 = vadd.f32 %v2151_v50, %v2132_v25 }
 0x301   :  { %v2171_v52 = vpop.f32.mrf.mxu2 }
 0x302   :  { %v2172_v54 = vadd.f32 %v2171_v52, %v2152_v51  ;;  %v2191_v36 = vpop.f32.mrf.mxu3 }
 0x304   :  { %v2192_v56 = vadd.f32 %v2191_v36, %v2172_v54 }
 0x306   :  { %2360 = vst [vmem:[#allocation7 + $0x30] sm:$0xff] %v2192_v56 }
 0x322   :  { %v2211_v33 = vpop.f32.mrf.mxu0 }
 0x323   :  { %v2231_v63 = vpop.f32.mrf.mxu1 }
 0x324   :  { %v2232_v57 = vadd.f32 %v2231_v63, %v2211_v33 }
 0x326   :  { %v2251_v59 = vpop.f32.mrf.mxu2 }
 0x327   :  { %v2252_v60 = vadd.f32 %v2251_v59, %v2232_v57  ;;  %v2271_v62 = vpop.f32.mrf.mxu3 }
 0x329   :  { %v2272_v1 = vadd.f32 %v2271_v62, %v2252_v60 }
 0x346   :  { %v2291_v2 = vpop.f32.mrf.mxu0 }
 0x347   :  { %v2292_v3 = vadd.f32 %v2291_v2, %v2272_v1 }
 0x34a   :  { %v2311_v22 = vpop.f32.mrf.mxu1 }
 0x34b   :  { %v2312_v4 = vadd.f32 %v2311_v22, %v2292_v3 }
 0x34e   :  { %v2331_v6 = vpop.f32.mrf.mxu2 }
 0x34f   :  { %v2332_v29 = vadd.f32 %v2331_v6, %v2312_v4 }
 0x351   :  { %v2351_v58 = vpop.f32.mrf.mxu3 }
 0x352   :  { %v2352_v9 = vadd.f32 %v2351_v58, %v2332_v29 }
 0x354   :  { %2361 = vst [vmem:[#allocation7 + $0x38] sm:$0xff] %v2352_v9 }
 0x355   :  { %2372 = dma.vmem_to_hbm [thread:$0]  %s2368_s1, 1024, %s2370_s23, [#allocation4]  }
 0x356   :  { %2485 = dma.done.wait [#allocation4], 1024  }
 0x357   :  { %2486 = vsyncadd [#allocation4], 4294966272 }
 0x358   :  { %2377 = vsyncpa [#allocation3], 1 }
 0x359   :  { %2378 = vsyncpa [#allocation6], 1 }
 0x35a   :  { %2379 = vsyncpa [#allocation4], 1 }

</bundles_post_ra>
